<compile_context>
chip_gen: v6e
topology: v6e:2x2x1
jax: 0.10.0
libtpu: 0.0.40
codegen_flags: <defaults>
</compile_context>

<pallas_src>
import functools

import jax
import jax.numpy as jnp
from jax.experimental import pallas as pl
from jax.experimental.pallas import tpu as pltpu

OP_NAMES = ("add", "sub", "mul", "div", "max", "min", "abs")
NUM_OPS = len(OP_NAMES)
NUM_FEATS = 14
NUM_LAYERS = 6
TEMPERATURE = 5.0

_LANES = 128
_SUBLANES = 8
_VREG_ROWS = _LANES * _SUBLANES        # 1024 batch rows per one-vreg sub-block
_DEFAULT_SUBS_PER_STEP = 16            # up to 16384 batch rows DMA'd per grid step


def _ceil_div(a, b):
    return -(-a // b)


def _op_bank(a, b):
    """The OP_LIBRARY used by _SymbolicNode (order == OP_NAMES)."""
    return [
        a + b,                 # add
        a - b,                 # sub
        a * b,                 # mul
        a / (b + 1e-4),        # div (exact; approx reciprocal would risk 1e-5 tol)
        jnp.maximum(a, b),     # max
        jnp.minimum(a, b),     # min
        jnp.abs(a),            # abs
    ]


# ----------------------------------------------------------------------------- #
# Pallas kernel
# ----------------------------------------------------------------------------- #
def _symbolic_net_kernel(aw_ref, bw_ref, opw_ref, feats_ref, out_ref, *,
                         layers, subs_per_step):
    """One batch tile (subs_per_step * 1024 rows) of the SymbolicNet forward pass.

    aw_ref, bw_ref : SMEM (layers, 14+layers-1) gumbel-softmax input-selection
                     weights, zero-padded past each node's num_inputs (prefetched).
    opw_ref        : SMEM (layers, 7) gumbel-softmax op-selection weights (prefetched).
    feats_ref      : VMEM (subs_per_step, 14, 8, 128) feature tile, batch on
                     (sublane, lane).
    out_ref        : VMEM (subs_per_step, 8, 128) output tile (lane-dense).
    """
    # Hoist all SMEM weight scalar reads out of the sub-block loop: loaded once per
    # grid step instead of once per sub-block.
    aw = [[aw_ref[l, j] for j in range(NUM_FEATS + l)] for l in range(layers)]
    bw = [[bw_ref[l, j] for j in range(NUM_FEATS + l)] for l in range(layers)]
    ow = [[opw_ref[l, k] for k in range(NUM_OPS)] for l in range(layers)]

    @pl.loop(0, subs_per_step)
    def _(s):
        blk = feats_ref[s]                              # (14, 8, 128)
        cols = [blk[i] for i in range(NUM_FEATS)]       # one (8,128) vreg per column

        for l in range(layers):
            n_in = NUM_FEATS + l
            # a = sum_j a_w[j] * inter[j],  b = sum_j b_w[j] * inter[j]
            a = cols[0] * aw[l][0]
            b = cols[0] * bw[l][0]
            for j in range(1, n_in):
                a = a + cols[j] * aw[l][j]
                b = b + cols[j] * bw[l][j]

            # y = sum_k op_w[k] * op_k(a, b); node output = tanh(y)
            res = _op_bank(a, b)
            y = res[0] * ow[l][0]
            for k in range(1, NUM_OPS):
                y = y + res[k] * ow[l][k]
            cols.append(jnp.tanh(y))

        out_ref[s] = jnp.clip(cols[-1], -100.0, 100.0)


# ----------------------------------------------------------------------------- #
# Wrapper
# ----------------------------------------------------------------------------- #
def symbolic_net_forward(feats, a_w, b_w, op_w, *, layers=NUM_LAYERS,
                         subs_per_step=None):
    """Pallas-call wrapper. feats: (B, 14) f32 -> (B, 1) f32."""
    B, F = feats.shape
    assert F == NUM_FEATS
    feats = feats.astype(jnp.float32)

    total_subs = max(1, _ceil_div(B, _VREG_ROWS))
    if subs_per_step is None:
        # Large tiles to amortize per-step overhead, but keep >=2 grid steps when
        # possible so the parallel grid axis can shard across TensorCores.
        subs_per_step = min(_DEFAULT_SUBS_PER_STEP,
                            _ceil_div(total_subs, 2) if total_subs > 1 else 1)
    subs_per_step = max(1, min(subs_per_step, total_subs))
    steps = _ceil_div(total_subs, subs_per_step)
    n_sub_p = steps * subs_per_step
    Bp = n_sub_p * _VREG_ROWS

    # (B, 14) -> zero-pad -> (n_sub, 14, 8, 128): batch on (sublane, lane).
    fp = jnp.pad(feats, ((0, Bp - B), (0, 0)))
    fx = fp.reshape(n_sub_p, _SUBLANES, _LANES, NUM_FEATS).transpose(0, 3, 1, 2)

    kernel = functools.partial(_symbolic_net_kernel, layers=layers,
                               subs_per_step=subs_per_step)

    out3d = pl.pallas_call(
        kernel,
        out_shape=jax.ShapeDtypeStruct((n_sub_p, _SUBLANES, _LANES), jnp.float32),
        grid_spec=pltpu.PrefetchScalarGridSpec(
            num_scalar_prefetch=3,                       # a_w, b_w, op_w -> SMEM
            grid=(steps,),
            in_specs=[
                pl.BlockSpec((subs_per_step, NUM_FEATS, _SUBLANES, _LANES),
                             lambda i, aw, bw, ow: (i, 0, 0, 0)),
            ],
            out_specs=pl.BlockSpec((subs_per_step, _SUBLANES, _LANES),
                                   lambda i, aw, bw, ow: (i, 0, 0)),
        ),
        compiler_params=pltpu.CompilerParams(
            dimension_semantics=("parallel",)),
    )(a_w, b_w, op_w, fx)

    return out3d.reshape(-1)[:B].reshape(B, 1)


# ----------------------------------------------------------------------------- #
# Deterministic parameter init (mirrors _SymbolicNode.__init__ + _gs, hard=False)
# ----------------------------------------------------------------------------- #
def init_gumbel_softmax_weights(key, *, layers=NUM_LAYERS, temperature=TEMPERATURE):
    t = max(temperature, 0.3)  # torch.clamp(temperature, min=0.3)
    max_in = NUM_FEATS + layers - 1
    a_rows, b_rows, op_rows = [], [], []
    for l in range(layers):
        n_in = NUM_FEATS + l
        key, k_op, k_a, k_b, g_op, g_a, g_b = jax.random.split(key, 7)
        op_logits = jax.random.normal(k_op, (NUM_OPS,), jnp.float32)
        a_logits = jax.random.normal(k_a, (n_in,), jnp.float32)
        b_logits = jax.random.normal(k_b, (n_in,), jnp.float32)
        op_w = jax.nn.softmax((op_logits + jax.random.gumbel(g_op, (NUM_OPS,))) / t)
        a_wl = jax.nn.softmax((a_logits + jax.random.gumbel(g_a, (n_in,))) / t)
        b_wl = jax.nn.softmax((b_logits + jax.random.gumbel(g_b, (n_in,))) / t)
        a_rows.append(jnp.pad(a_wl, (0, max_in - n_in)))
        b_rows.append(jnp.pad(b_wl, (0, max_in - n_in)))
        op_rows.append(op_w)
    return jnp.stack(a_rows), jnp.stack(b_rows), jnp.stack(op_rows)


# ----------------------------------------------------------------------------- #
# Pure-JAX reference (mirrors the PyTorch forward, same sampled weights)
# ----------------------------------------------------------------------------- #
def reference_forward(feats, a_w, b_w, op_w, *, layers=NUM_LAYERS):
    inter = [feats[:, i] for i in range(NUM_FEATS)]
    for l in range(layers):
        n_in = NUM_FEATS + l
        stacked = jnp.stack(inter, 0)                       # (n_in, B)
        a = (stacked * a_w[l, :n_in, None]).sum(0)
        b = (stacked * b_w[l, :n_in, None]).sum(0)
        res = jnp.stack(_op_bank(a, b), 0)                  # (7, B)
        y = (op_w[l, :, None] * res).sum(0)
        inter.append(jnp.tanh(y))
    return jnp.clip(inter[-1][:, None], -100.0, 100.0)


if __name__ == "__main__":
    key = jax.random.PRNGKey(0)
    k_params, k_feats, k_feats2 = jax.random.split(key, 3)

    a_w, b_w, op_w = init_gumbel_softmax_weights(k_params)

    # Small example (single grid step, padded to one 1024-row sub-block).
    feats = jax.random.normal(k_feats, (16, NUM_FEATS), jnp.float32)
    out = jax.block_until_ready(symbolic_net_forward(feats, a_w, b_w, op_w))
    ref = reference_forward(feats, a_w, b_w, op_w)
    assert out.shape == (16, 1)
    assert jnp.allclose(out, ref, atol=1e-5, rtol=1e-5), (out, ref)

    # Non-multiple-of-1024 batch: exercises zero-pad tail + multi-step parallel grid.
    feats2 = jax.random.normal(k_feats2, (2050, NUM_FEATS), jnp.float32)
    out2 = jax.block_until_ready(symbolic_net_forward(feats2, a_w, b_w, op_w))
    ref2 = reference_forward(feats2, a_w, b_w, op_w)
    assert out2.shape == (2050, 1)
    assert jnp.allclose(out2, ref2, atol=1e-5, rtol=1e-5)

    print("KERNEL_OK")
</pallas_src>

<mosaic_0001>
module attributes {stable_mosaic.version = 11 : i64} {
  func.func @_symbolic_net_kernel(%arg0: i32, %arg1: memref<6x19xf32, #tpu.memory_space<smem>>, %arg2: memref<6x19xf32, #tpu.memory_space<smem>>, %arg3: memref<6x7xf32, #tpu.memory_space<smem>>, %arg4: memref<1x14x8x128xf32, #tpu.memory_space<vmem>>, %arg5: memref<1x8x128xf32, #tpu.memory_space<vmem>>) attributes {dimension_semantics = [#tpu.dimension_semantics<parallel>], iteration_bounds = array<i64: 1>, scalar_prefetch = 3 : i64, scratch_operands = 0 : i64, tpu.core_type = #tpu.core_type<tc>, window_params = [{transform_indices = @transform_0, window_bounds = array<i64: 1, 14, 8, 128>}, {transform_indices = @transform_1, window_bounds = array<i64: 1, 8, 128>}]} {
    %c0 = arith.constant 0 : index
    %c0_0 = arith.constant 0 : index
    %0 = memref.load %arg1[%c0, %c0_0] : memref<6x19xf32, #tpu.memory_space<smem>>
    %c0_1 = arith.constant 0 : index
    %c1 = arith.constant 1 : index
    %1 = memref.load %arg1[%c0_1, %c1] : memref<6x19xf32, #tpu.memory_space<smem>>
    %c0_2 = arith.constant 0 : index
    %c2 = arith.constant 2 : index
    %2 = memref.load %arg1[%c0_2, %c2] : memref<6x19xf32, #tpu.memory_space<smem>>
    %c0_3 = arith.constant 0 : index
    %c3 = arith.constant 3 : index
    %3 = memref.load %arg1[%c0_3, %c3] : memref<6x19xf32, #tpu.memory_space<smem>>
    %c0_4 = arith.constant 0 : index
    %c4 = arith.constant 4 : index
    %4 = memref.load %arg1[%c0_4, %c4] : memref<6x19xf32, #tpu.memory_space<smem>>
    %c0_5 = arith.constant 0 : index
    %c5 = arith.constant 5 : index
    %5 = memref.load %arg1[%c0_5, %c5] : memref<6x19xf32, #tpu.memory_space<smem>>
    %c0_6 = arith.constant 0 : index
    %c6 = arith.constant 6 : index
    %6 = memref.load %arg1[%c0_6, %c6] : memref<6x19xf32, #tpu.memory_space<smem>>
    %c0_7 = arith.constant 0 : index
    %c7 = arith.constant 7 : index
    %7 = memref.load %arg1[%c0_7, %c7] : memref<6x19xf32, #tpu.memory_space<smem>>
    %c0_8 = arith.constant 0 : index
    %c8 = arith.constant 8 : index
    %8 = memref.load %arg1[%c0_8, %c8] : memref<6x19xf32, #tpu.memory_space<smem>>
    %c0_9 = arith.constant 0 : index
    %c9 = arith.constant 9 : index
    %9 = memref.load %arg1[%c0_9, %c9] : memref<6x19xf32, #tpu.memory_space<smem>>
    %c0_10 = arith.constant 0 : index
    %c10 = arith.constant 10 : index
    %10 = memref.load %arg1[%c0_10, %c10] : memref<6x19xf32, #tpu.memory_space<smem>>
    %c0_11 = arith.constant 0 : index
    %c11 = arith.constant 11 : index
    %11 = memref.load %arg1[%c0_11, %c11] : memref<6x19xf32, #tpu.memory_space<smem>>
    %c0_12 = arith.constant 0 : index
    %c12 = arith.constant 12 : index
    %12 = memref.load %arg1[%c0_12, %c12] : memref<6x19xf32, #tpu.memory_space<smem>>
    %c0_13 = arith.constant 0 : index
    %c13 = arith.constant 13 : index
    %13 = memref.load %arg1[%c0_13, %c13] : memref<6x19xf32, #tpu.memory_space<smem>>
    %c1_14 = arith.constant 1 : index
    %c0_15 = arith.constant 0 : index
    %14 = memref.load %arg1[%c1_14, %c0_15] : memref<6x19xf32, #tpu.memory_space<smem>>
    %c1_16 = arith.constant 1 : index
    %c1_17 = arith.constant 1 : index
    %15 = memref.load %arg1[%c1_16, %c1_17] : memref<6x19xf32, #tpu.memory_space<smem>>
    %c1_18 = arith.constant 1 : index
    %c2_19 = arith.constant 2 : index
    %16 = memref.load %arg1[%c1_18, %c2_19] : memref<6x19xf32, #tpu.memory_space<smem>>
    %c1_20 = arith.constant 1 : index
    %c3_21 = arith.constant 3 : index
    %17 = memref.load %arg1[%c1_20, %c3_21] : memref<6x19xf32, #tpu.memory_space<smem>>
    %c1_22 = arith.constant 1 : index
    %c4_23 = arith.constant 4 : index
    %18 = memref.load %arg1[%c1_22, %c4_23] : memref<6x19xf32, #tpu.memory_space<smem>>
    %c1_24 = arith.constant 1 : index
    %c5_25 = arith.constant 5 : index
    %19 = memref.load %arg1[%c1_24, %c5_25] : memref<6x19xf32, #tpu.memory_space<smem>>
    %c1_26 = arith.constant 1 : index
    %c6_27 = arith.constant 6 : index
    %20 = memref.load %arg1[%c1_26, %c6_27] : memref<6x19xf32, #tpu.memory_space<smem>>
    %c1_28 = arith.constant 1 : index
    %c7_29 = arith.constant 7 : index
    %21 = memref.load %arg1[%c1_28, %c7_29] : memref<6x19xf32, #tpu.memory_space<smem>>
    %c1_30 = arith.constant 1 : index
    %c8_31 = arith.constant 8 : index
    %22 = memref.load %arg1[%c1_30, %c8_31] : memref<6x19xf32, #tpu.memory_space<smem>>
    %c1_32 = arith.constant 1 : index
    %c9_33 = arith.constant 9 : index
    %23 = memref.load %arg1[%c1_32, %c9_33] : memref<6x19xf32, #tpu.memory_space<smem>>
    %c1_34 = arith.constant 1 : index
    %c10_35 = arith.constant 10 : index
    %24 = memref.load %arg1[%c1_34, %c10_35] : memref<6x19xf32, #tpu.memory_space<smem>>
    %c1_36 = arith.constant 1 : index
    %c11_37 = arith.constant 11 : index
    %25 = memref.load %arg1[%c1_36, %c11_37] : memref<6x19xf32, #tpu.memory_space<smem>>
    %c1_38 = arith.constant 1 : index
    %c12_39 = arith.constant 12 : index
    %26 = memref.load %arg1[%c1_38, %c12_39] : memref<6x19xf32, #tpu.memory_space<smem>>
    %c1_40 = arith.constant 1 : index
    %c13_41 = arith.constant 13 : index
    %27 = memref.load %arg1[%c1_40, %c13_41] : memref<6x19xf32, #tpu.memory_space<smem>>
    %c1_42 = arith.constant 1 : index
    %c14 = arith.constant 14 : index
    %28 = memref.load %arg1[%c1_42, %c14] : memref<6x19xf32, #tpu.memory_space<smem>>
    %c2_43 = arith.constant 2 : index
    %c0_44 = arith.constant 0 : index
    %29 = memref.load %arg1[%c2_43, %c0_44] : memref<6x19xf32, #tpu.memory_space<smem>>
    %c2_45 = arith.constant 2 : index
    %c1_46 = arith.constant 1 : index
    %30 = memref.load %arg1[%c2_45, %c1_46] : memref<6x19xf32, #tpu.memory_space<smem>>
    %c2_47 = arith.constant 2 : index
    %c2_48 = arith.constant 2 : index
    %31 = memref.load %arg1[%c2_47, %c2_48] : memref<6x19xf32, #tpu.memory_space<smem>>
    %c2_49 = arith.constant 2 : index
    %c3_50 = arith.constant 3 : index
    %32 = memref.load %arg1[%c2_49, %c3_50] : memref<6x19xf32, #tpu.memory_space<smem>>
    %c2_51 = arith.constant 2 : index
    %c4_52 = arith.constant 4 : index
    %33 = memref.load %arg1[%c2_51, %c4_52] : memref<6x19xf32, #tpu.memory_space<smem>>
    %c2_53 = arith.constant 2 : index
    %c5_54 = arith.constant 5 : index
    %34 = memref.load %arg1[%c2_53, %c5_54] : memref<6x19xf32, #tpu.memory_space<smem>>
    %c2_55 = arith.constant 2 : index
    %c6_56 = arith.constant 6 : index
    %35 = memref.load %arg1[%c2_55, %c6_56] : memref<6x19xf32, #tpu.memory_space<smem>>
    %c2_57 = arith.constant 2 : index
    %c7_58 = arith.constant 7 : index
    %36 = memref.load %arg1[%c2_57, %c7_58] : memref<6x19xf32, #tpu.memory_space<smem>>
    %c2_59 = arith.constant 2 : index
    %c8_60 = arith.constant 8 : index
    %37 = memref.load %arg1[%c2_59, %c8_60] : memref<6x19xf32, #tpu.memory_space<smem>>
    %c2_61 = arith.constant 2 : index
    %c9_62 = arith.constant 9 : index
    %38 = memref.load %arg1[%c2_61, %c9_62] : memref<6x19xf32, #tpu.memory_space<smem>>
    %c2_63 = arith.constant 2 : index
    %c10_64 = arith.constant 10 : index
    %39 = memref.load %arg1[%c2_63, %c10_64] : memref<6x19xf32, #tpu.memory_space<smem>>
    %c2_65 = arith.constant 2 : index
    %c11_66 = arith.constant 11 : index
    %40 = memref.load %arg1[%c2_65, %c11_66] : memref<6x19xf32, #tpu.memory_space<smem>>
    %c2_67 = arith.constant 2 : index
    %c12_68 = arith.constant 12 : index
    %41 = memref.load %arg1[%c2_67, %c12_68] : memref<6x19xf32, #tpu.memory_space<smem>>
    %c2_69 = arith.constant 2 : index
    %c13_70 = arith.constant 13 : index
    %42 = memref.load %arg1[%c2_69, %c13_70] : memref<6x19xf32, #tpu.memory_space<smem>>
    %c2_71 = arith.constant 2 : index
    %c14_72 = arith.constant 14 : index
    %43 = memref.load %arg1[%c2_71, %c14_72] : memref<6x19xf32, #tpu.memory_space<smem>>
    %c2_73 = arith.constant 2 : index
    %c15 = arith.constant 15 : index
    %44 = memref.load %arg1[%c2_73, %c15] : memref<6x19xf32, #tpu.memory_space<smem>>
    %c3_74 = arith.constant 3 : index
    %c0_75 = arith.constant 0 : index
    %45 = memref.load %arg1[%c3_74, %c0_75] : memref<6x19xf32, #tpu.memory_space<smem>>
    %c3_76 = arith.constant 3 : index
    %c1_77 = arith.constant 1 : index
    %46 = memref.load %arg1[%c3_76, %c1_77] : memref<6x19xf32, #tpu.memory_space<smem>>
    %c3_78 = arith.constant 3 : index
    %c2_79 = arith.constant 2 : index
    %47 = memref.load %arg1[%c3_78, %c2_79] : memref<6x19xf32, #tpu.memory_space<smem>>
    %c3_80 = arith.constant 3 : index
    %c3_81 = arith.constant 3 : index
    %48 = memref.load %arg1[%c3_80, %c3_81] : memref<6x19xf32, #tpu.memory_space<smem>>
    %c3_82 = arith.constant 3 : index
    %c4_83 = arith.constant 4 : index
    %49 = memref.load %arg1[%c3_82, %c4_83] : memref<6x19xf32, #tpu.memory_space<smem>>
    %c3_84 = arith.constant 3 : index
    %c5_85 = arith.constant 5 : index
    %50 = memref.load %arg1[%c3_84, %c5_85] : memref<6x19xf32, #tpu.memory_space<smem>>
    %c3_86 = arith.constant 3 : index
    %c6_87 = arith.constant 6 : index
    %51 = memref.load %arg1[%c3_86, %c6_87] : memref<6x19xf32, #tpu.memory_space<smem>>
    %c3_88 = arith.constant 3 : index
    %c7_89 = arith.constant 7 : index
    %52 = memref.load %arg1[%c3_88, %c7_89] : memref<6x19xf32, #tpu.memory_space<smem>>
    %c3_90 = arith.constant 3 : index
    %c8_91 = arith.constant 8 : index
    %53 = memref.load %arg1[%c3_90, %c8_91] : memref<6x19xf32, #tpu.memory_space<smem>>
    %c3_92 = arith.constant 3 : index
    %c9_93 = arith.constant 9 : index
    %54 = memref.load %arg1[%c3_92, %c9_93] : memref<6x19xf32, #tpu.memory_space<smem>>
    %c3_94 = arith.constant 3 : index
    %c10_95 = arith.constant 10 : index
    %55 = memref.load %arg1[%c3_94, %c10_95] : memref<6x19xf32, #tpu.memory_space<smem>>
    %c3_96 = arith.constant 3 : index
    %c11_97 = arith.constant 11 : index
    %56 = memref.load %arg1[%c3_96, %c11_97] : memref<6x19xf32, #tpu.memory_space<smem>>
    %c3_98 = arith.constant 3 : index
    %c12_99 = arith.constant 12 : index
    %57 = memref.load %arg1[%c3_98, %c12_99] : memref<6x19xf32, #tpu.memory_space<smem>>
    %c3_100 = arith.constant 3 : index
    %c13_101 = arith.constant 13 : index
    %58 = memref.load %arg1[%c3_100, %c13_101] : memref<6x19xf32, #tpu.memory_space<smem>>
    %c3_102 = arith.constant 3 : index
    %c14_103 = arith.constant 14 : index
    %59 = memref.load %arg1[%c3_102, %c14_103] : memref<6x19xf32, #tpu.memory_space<smem>>
    %c3_104 = arith.constant 3 : index
    %c15_105 = arith.constant 15 : index
    %60 = memref.load %arg1[%c3_104, %c15_105] : memref<6x19xf32, #tpu.memory_space<smem>>
    %c3_106 = arith.constant 3 : index
    %c16 = arith.constant 16 : index
    %61 = memref.load %arg1[%c3_106, %c16] : memref<6x19xf32, #tpu.memory_space<smem>>
    %c4_107 = arith.constant 4 : index
    %c0_108 = arith.constant 0 : index
    %62 = memref.load %arg1[%c4_107, %c0_108] : memref<6x19xf32, #tpu.memory_space<smem>>
    %c4_109 = arith.constant 4 : index
    %c1_110 = arith.constant 1 : index
    %63 = memref.load %arg1[%c4_109, %c1_110] : memref<6x19xf32, #tpu.memory_space<smem>>
    %c4_111 = arith.constant 4 : index
    %c2_112 = arith.constant 2 : index
    %64 = memref.load %arg1[%c4_111, %c2_112] : memref<6x19xf32, #tpu.memory_space<smem>>
    %c4_113 = arith.constant 4 : index
    %c3_114 = arith.constant 3 : index
    %65 = memref.load %arg1[%c4_113, %c3_114] : memref<6x19xf32, #tpu.memory_space<smem>>
    %c4_115 = arith.constant 4 : index
    %c4_116 = arith.constant 4 : index
    %66 = memref.load %arg1[%c4_115, %c4_116] : memref<6x19xf32, #tpu.memory_space<smem>>
    %c4_117 = arith.constant 4 : index
    %c5_118 = arith.constant 5 : index
    %67 = memref.load %arg1[%c4_117, %c5_118] : memref<6x19xf32, #tpu.memory_space<smem>>
    %c4_119 = arith.constant 4 : index
    %c6_120 = arith.constant 6 : index
    %68 = memref.load %arg1[%c4_119, %c6_120] : memref<6x19xf32, #tpu.memory_space<smem>>
    %c4_121 = arith.constant 4 : index
    %c7_122 = arith.constant 7 : index
    %69 = memref.load %arg1[%c4_121, %c7_122] : memref<6x19xf32, #tpu.memory_space<smem>>
    %c4_123 = arith.constant 4 : index
    %c8_124 = arith.constant 8 : index
    %70 = memref.load %arg1[%c4_123, %c8_124] : memref<6x19xf32, #tpu.memory_space<smem>>
    %c4_125 = arith.constant 4 : index
    %c9_126 = arith.constant 9 : index
    %71 = memref.load %arg1[%c4_125, %c9_126] : memref<6x19xf32, #tpu.memory_space<smem>>
    %c4_127 = arith.constant 4 : index
    %c10_128 = arith.constant 10 : index
    %72 = memref.load %arg1[%c4_127, %c10_128] : memref<6x19xf32, #tpu.memory_space<smem>>
    %c4_129 = arith.constant 4 : index
    %c11_130 = arith.constant 11 : index
    %73 = memref.load %arg1[%c4_129, %c11_130] : memref<6x19xf32, #tpu.memory_space<smem>>
    %c4_131 = arith.constant 4 : index
    %c12_132 = arith.constant 12 : index
    %74 = memref.load %arg1[%c4_131, %c12_132] : memref<6x19xf32, #tpu.memory_space<smem>>
    %c4_133 = arith.constant 4 : index
    %c13_134 = arith.constant 13 : index
    %75 = memref.load %arg1[%c4_133, %c13_134] : memref<6x19xf32, #tpu.memory_space<smem>>
    %c4_135 = arith.constant 4 : index
    %c14_136 = arith.constant 14 : index
    %76 = memref.load %arg1[%c4_135, %c14_136] : memref<6x19xf32, #tpu.memory_space<smem>>
    %c4_137 = arith.constant 4 : index
    %c15_138 = arith.constant 15 : index
    %77 = memref.load %arg1[%c4_137, %c15_138] : memref<6x19xf32, #tpu.memory_space<smem>>
    %c4_139 = arith.constant 4 : index
    %c16_140 = arith.constant 16 : index
    %78 = memref.load %arg1[%c4_139, %c16_140] : memref<6x19xf32, #tpu.memory_space<smem>>
    %c4_141 = arith.constant 4 : index
    %c17 = arith.constant 17 : index
    %79 = memref.load %arg1[%c4_141, %c17] : memref<6x19xf32, #tpu.memory_space<smem>>
    %c5_142 = arith.constant 5 : index
    %c0_143 = arith.constant 0 : index
    %80 = memref.load %arg1[%c5_142, %c0_143] : memref<6x19xf32, #tpu.memory_space<smem>>
    %c5_144 = arith.constant 5 : index
    %c1_145 = arith.constant 1 : index
    %81 = memref.load %arg1[%c5_144, %c1_145] : memref<6x19xf32, #tpu.memory_space<smem>>
    %c5_146 = arith.constant 5 : index
    %c2_147 = arith.constant 2 : index
    %82 = memref.load %arg1[%c5_146, %c2_147] : memref<6x19xf32, #tpu.memory_space<smem>>
    %c5_148 = arith.constant 5 : index
    %c3_149 = arith.constant 3 : index
    %83 = memref.load %arg1[%c5_148, %c3_149] : memref<6x19xf32, #tpu.memory_space<smem>>
    %c5_150 = arith.constant 5 : index
    %c4_151 = arith.constant 4 : index
    %84 = memref.load %arg1[%c5_150, %c4_151] : memref<6x19xf32, #tpu.memory_space<smem>>
    %c5_152 = arith.constant 5 : index
    %c5_153 = arith.constant 5 : index
    %85 = memref.load %arg1[%c5_152, %c5_153] : memref<6x19xf32, #tpu.memory_space<smem>>
    %c5_154 = arith.constant 5 : index
    %c6_155 = arith.constant 6 : index
    %86 = memref.load %arg1[%c5_154, %c6_155] : memref<6x19xf32, #tpu.memory_space<smem>>
    %c5_156 = arith.constant 5 : index
    %c7_157 = arith.constant 7 : index
    %87 = memref.load %arg1[%c5_156, %c7_157] : memref<6x19xf32, #tpu.memory_space<smem>>
    %c5_158 = arith.constant 5 : index
    %c8_159 = arith.constant 8 : index
    %88 = memref.load %arg1[%c5_158, %c8_159] : memref<6x19xf32, #tpu.memory_space<smem>>
    %c5_160 = arith.constant 5 : index
    %c9_161 = arith.constant 9 : index
    %89 = memref.load %arg1[%c5_160, %c9_161] : memref<6x19xf32, #tpu.memory_space<smem>>
    %c5_162 = arith.constant 5 : index
    %c10_163 = arith.constant 10 : index
    %90 = memref.load %arg1[%c5_162, %c10_163] : memref<6x19xf32, #tpu.memory_space<smem>>
    %c5_164 = arith.constant 5 : index
    %c11_165 = arith.constant 11 : index
    %91 = memref.load %arg1[%c5_164, %c11_165] : memref<6x19xf32, #tpu.memory_space<smem>>
    %c5_166 = arith.constant 5 : index
    %c12_167 = arith.constant 12 : index
    %92 = memref.load %arg1[%c5_166, %c12_167] : memref<6x19xf32, #tpu.memory_space<smem>>
    %c5_168 = arith.constant 5 : index
    %c13_169 = arith.constant 13 : index
    %93 = memref.load %arg1[%c5_168, %c13_169] : memref<6x19xf32, #tpu.memory_space<smem>>
    %c5_170 = arith.constant 5 : index
    %c14_171 = arith.constant 14 : index
    %94 = memref.load %arg1[%c5_170, %c14_171] : memref<6x19xf32, #tpu.memory_space<smem>>
    %c5_172 = arith.constant 5 : index
    %c15_173 = arith.constant 15 : index
    %95 = memref.load %arg1[%c5_172, %c15_173] : memref<6x19xf32, #tpu.memory_space<smem>>
    %c5_174 = arith.constant 5 : index
    %c16_175 = arith.constant 16 : index
    %96 = memref.load %arg1[%c5_174, %c16_175] : memref<6x19xf32, #tpu.memory_space<smem>>
    %c5_176 = arith.constant 5 : index
    %c17_177 = arith.constant 17 : index
    %97 = memref.load %arg1[%c5_176, %c17_177] : memref<6x19xf32, #tpu.memory_space<smem>>
    %c5_178 = arith.constant 5 : index
    %c18 = arith.constant 18 : index
    %98 = memref.load %arg1[%c5_178, %c18] : memref<6x19xf32, #tpu.memory_space<smem>>
    %c0_179 = arith.constant 0 : index
    %c0_180 = arith.constant 0 : index
    %99 = memref.load %arg2[%c0_179, %c0_180] : memref<6x19xf32, #tpu.memory_space<smem>>
    %c0_181 = arith.constant 0 : index
    %c1_182 = arith.constant 1 : index
    %100 = memref.load %arg2[%c0_181, %c1_182] : memref<6x19xf32, #tpu.memory_space<smem>>
    %c0_183 = arith.constant 0 : index
    %c2_184 = arith.constant 2 : index
    %101 = memref.load %arg2[%c0_183, %c2_184] : memref<6x19xf32, #tpu.memory_space<smem>>
    %c0_185 = arith.constant 0 : index
    %c3_186 = arith.constant 3 : index
    %102 = memref.load %arg2[%c0_185, %c3_186] : memref<6x19xf32, #tpu.memory_space<smem>>
    %c0_187 = arith.constant 0 : index
    %c4_188 = arith.constant 4 : index
    %103 = memref.load %arg2[%c0_187, %c4_188] : memref<6x19xf32, #tpu.memory_space<smem>>
    %c0_189 = arith.constant 0 : index
    %c5_190 = arith.constant 5 : index
    %104 = memref.load %arg2[%c0_189, %c5_190] : memref<6x19xf32, #tpu.memory_space<smem>>
    %c0_191 = arith.constant 0 : index
    %c6_192 = arith.constant 6 : index
    %105 = memref.load %arg2[%c0_191, %c6_192] : memref<6x19xf32, #tpu.memory_space<smem>>
    %c0_193 = arith.constant 0 : index
    %c7_194 = arith.constant 7 : index
    %106 = memref.load %arg2[%c0_193, %c7_194] : memref<6x19xf32, #tpu.memory_space<smem>>
    %c0_195 = arith.constant 0 : index
    %c8_196 = arith.constant 8 : index
    %107 = memref.load %arg2[%c0_195, %c8_196] : memref<6x19xf32, #tpu.memory_space<smem>>
    %c0_197 = arith.constant 0 : index
    %c9_198 = arith.constant 9 : index
    %108 = memref.load %arg2[%c0_197, %c9_198] : memref<6x19xf32, #tpu.memory_space<smem>>
    %c0_199 = arith.constant 0 : index
    %c10_200 = arith.constant 10 : index
    %109 = memref.load %arg2[%c0_199, %c10_200] : memref<6x19xf32, #tpu.memory_space<smem>>
    %c0_201 = arith.constant 0 : index
    %c11_202 = arith.constant 11 : index
    %110 = memref.load %arg2[%c0_201, %c11_202] : memref<6x19xf32, #tpu.memory_space<smem>>
    %c0_203 = arith.constant 0 : index
    %c12_204 = arith.constant 12 : index
    %111 = memref.load %arg2[%c0_203, %c12_204] : memref<6x19xf32, #tpu.memory_space<smem>>
    %c0_205 = arith.constant 0 : index
    %c13_206 = arith.constant 13 : index
    %112 = memref.load %arg2[%c0_205, %c13_206] : memref<6x19xf32, #tpu.memory_space<smem>>
    %c1_207 = arith.constant 1 : index
    %c0_208 = arith.constant 0 : index
    %113 = memref.load %arg2[%c1_207, %c0_208] : memref<6x19xf32, #tpu.memory_space<smem>>
    %c1_209 = arith.constant 1 : index
    %c1_210 = arith.constant 1 : index
    %114 = memref.load %arg2[%c1_209, %c1_210] : memref<6x19xf32, #tpu.memory_space<smem>>
    %c1_211 = arith.constant 1 : index
    %c2_212 = arith.constant 2 : index
    %115 = memref.load %arg2[%c1_211, %c2_212] : memref<6x19xf32, #tpu.memory_space<smem>>
    %c1_213 = arith.constant 1 : index
    %c3_214 = arith.constant 3 : index
    %116 = memref.load %arg2[%c1_213, %c3_214] : memref<6x19xf32, #tpu.memory_space<smem>>
    %c1_215 = arith.constant 1 : index
    %c4_216 = arith.constant 4 : index
    %117 = memref.load %arg2[%c1_215, %c4_216] : memref<6x19xf32, #tpu.memory_space<smem>>
    %c1_217 = arith.constant 1 : index
    %c5_218 = arith.constant 5 : index
    %118 = memref.load %arg2[%c1_217, %c5_218] : memref<6x19xf32, #tpu.memory_space<smem>>
    %c1_219 = arith.constant 1 : index
    %c6_220 = arith.constant 6 : index
    %119 = memref.load %arg2[%c1_219, %c6_220] : memref<6x19xf32, #tpu.memory_space<smem>>
    %c1_221 = arith.constant 1 : index
    %c7_222 = arith.constant 7 : index
    %120 = memref.load %arg2[%c1_221, %c7_222] : memref<6x19xf32, #tpu.memory_space<smem>>
    %c1_223 = arith.constant 1 : index
    %c8_224 = arith.constant 8 : index
    %121 = memref.load %arg2[%c1_223, %c8_224] : memref<6x19xf32, #tpu.memory_space<smem>>
    %c1_225 = arith.constant 1 : index
    %c9_226 = arith.constant 9 : index
    %122 = memref.load %arg2[%c1_225, %c9_226] : memref<6x19xf32, #tpu.memory_space<smem>>
    %c1_227 = arith.constant 1 : index
    %c10_228 = arith.constant 10 : index
    %123 = memref.load %arg2[%c1_227, %c10_228] : memref<6x19xf32, #tpu.memory_space<smem>>
    %c1_229 = arith.constant 1 : index
    %c11_230 = arith.constant 11 : index
    %124 = memref.load %arg2[%c1_229, %c11_230] : memref<6x19xf32, #tpu.memory_space<smem>>
    %c1_231 = arith.constant 1 : index
    %c12_232 = arith.constant 12 : index
    %125 = memref.load %arg2[%c1_231, %c12_232] : memref<6x19xf32, #tpu.memory_space<smem>>
    %c1_233 = arith.constant 1 : index
    %c13_234 = arith.constant 13 : index
    %126 = memref.load %arg2[%c1_233, %c13_234] : memref<6x19xf32, #tpu.memory_space<smem>>
    %c1_235 = arith.constant 1 : index
    %c14_236 = arith.constant 14 : index
    %127 = memref.load %arg2[%c1_235, %c14_236] : memref<6x19xf32, #tpu.memory_space<smem>>
    %c2_237 = arith.constant 2 : index
    %c0_238 = arith.constant 0 : index
    %128 = memref.load %arg2[%c2_237, %c0_238] : memref<6x19xf32, #tpu.memory_space<smem>>
    %c2_239 = arith.constant 2 : index
    %c1_240 = arith.constant 1 : index
    %129 = memref.load %arg2[%c2_239, %c1_240] : memref<6x19xf32, #tpu.memory_space<smem>>
    %c2_241 = arith.constant 2 : index
    %c2_242 = arith.constant 2 : index
    %130 = memref.load %arg2[%c2_241, %c2_242] : memref<6x19xf32, #tpu.memory_space<smem>>
    %c2_243 = arith.constant 2 : index
    %c3_244 = arith.constant 3 : index
    %131 = memref.load %arg2[%c2_243, %c3_244] : memref<6x19xf32, #tpu.memory_space<smem>>
    %c2_245 = arith.constant 2 : index
    %c4_246 = arith.constant 4 : index
    %132 = memref.load %arg2[%c2_245, %c4_246] : memref<6x19xf32, #tpu.memory_space<smem>>
    %c2_247 = arith.constant 2 : index
    %c5_248 = arith.constant 5 : index
    %133 = memref.load %arg2[%c2_247, %c5_248] : memref<6x19xf32, #tpu.memory_space<smem>>
    %c2_249 = arith.constant 2 : index
    %c6_250 = arith.constant 6 : index
    %134 = memref.load %arg2[%c2_249, %c6_250] : memref<6x19xf32, #tpu.memory_space<smem>>
    %c2_251 = arith.constant 2 : index
    %c7_252 = arith.constant 7 : index
    %135 = memref.load %arg2[%c2_251, %c7_252] : memref<6x19xf32, #tpu.memory_space<smem>>
    %c2_253 = arith.constant 2 : index
    %c8_254 = arith.constant 8 : index
    %136 = memref.load %arg2[%c2_253, %c8_254] : memref<6x19xf32, #tpu.memory_space<smem>>
    %c2_255 = arith.constant 2 : index
    %c9_256 = arith.constant 9 : index
    %137 = memref.load %arg2[%c2_255, %c9_256] : memref<6x19xf32, #tpu.memory_space<smem>>
    %c2_257 = arith.constant 2 : index
    %c10_258 = arith.constant 10 : index
    %138 = memref.load %arg2[%c2_257, %c10_258] : memref<6x19xf32, #tpu.memory_space<smem>>
    %c2_259 = arith.constant 2 : index
    %c11_260 = arith.constant 11 : index
    %139 = memref.load %arg2[%c2_259, %c11_260] : memref<6x19xf32, #tpu.memory_space<smem>>
    %c2_261 = arith.constant 2 : index
    %c12_262 = arith.constant 12 : index
    %140 = memref.load %arg2[%c2_261, %c12_262] : memref<6x19xf32, #tpu.memory_space<smem>>
    %c2_263 = arith.constant 2 : index
    %c13_264 = arith.constant 13 : index
    %141 = memref.load %arg2[%c2_263, %c13_264] : memref<6x19xf32, #tpu.memory_space<smem>>
    %c2_265 = arith.constant 2 : index
    %c14_266 = arith.constant 14 : index
    %142 = memref.load %arg2[%c2_265, %c14_266] : memref<6x19xf32, #tpu.memory_space<smem>>
    %c2_267 = arith.constant 2 : index
    %c15_268 = arith.constant 15 : index
    %143 = memref.load %arg2[%c2_267, %c15_268] : memref<6x19xf32, #tpu.memory_space<smem>>
    %c3_269 = arith.constant 3 : index
    %c0_270 = arith.constant 0 : index
    %144 = memref.load %arg2[%c3_269, %c0_270] : memref<6x19xf32, #tpu.memory_space<smem>>
    %c3_271 = arith.constant 3 : index
    %c1_272 = arith.constant 1 : index
    %145 = memref.load %arg2[%c3_271, %c1_272] : memref<6x19xf32, #tpu.memory_space<smem>>
    %c3_273 = arith.constant 3 : index
    %c2_274 = arith.constant 2 : index
    %146 = memref.load %arg2[%c3_273, %c2_274] : memref<6x19xf32, #tpu.memory_space<smem>>
    %c3_275 = arith.constant 3 : index
    %c3_276 = arith.constant 3 : index
    %147 = memref.load %arg2[%c3_275, %c3_276] : memref<6x19xf32, #tpu.memory_space<smem>>
    %c3_277 = arith.constant 3 : index
    %c4_278 = arith.constant 4 : index
    %148 = memref.load %arg2[%c3_277, %c4_278] : memref<6x19xf32, #tpu.memory_space<smem>>
    %c3_279 = arith.constant 3 : index
    %c5_280 = arith.constant 5 : index
    %149 = memref.load %arg2[%c3_279, %c5_280] : memref<6x19xf32, #tpu.memory_space<smem>>
    %c3_281 = arith.constant 3 : index
    %c6_282 = arith.constant 6 : index
    %150 = memref.load %arg2[%c3_281, %c6_282] : memref<6x19xf32, #tpu.memory_space<smem>>
    %c3_283 = arith.constant 3 : index
    %c7_284 = arith.constant 7 : index
    %151 = memref.load %arg2[%c3_283, %c7_284] : memref<6x19xf32, #tpu.memory_space<smem>>
    %c3_285 = arith.constant 3 : index
    %c8_286 = arith.constant 8 : index
    %152 = memref.load %arg2[%c3_285, %c8_286] : memref<6x19xf32, #tpu.memory_space<smem>>
    %c3_287 = arith.constant 3 : index
    %c9_288 = arith.constant 9 : index
    %153 = memref.load %arg2[%c3_287, %c9_288] : memref<6x19xf32, #tpu.memory_space<smem>>
    %c3_289 = arith.constant 3 : index
    %c10_290 = arith.constant 10 : index
    %154 = memref.load %arg2[%c3_289, %c10_290] : memref<6x19xf32, #tpu.memory_space<smem>>
    %c3_291 = arith.constant 3 : index
    %c11_292 = arith.constant 11 : index
    %155 = memref.load %arg2[%c3_291, %c11_292] : memref<6x19xf32, #tpu.memory_space<smem>>
    %c3_293 = arith.constant 3 : index
    %c12_294 = arith.constant 12 : index
    %156 = memref.load %arg2[%c3_293, %c12_294] : memref<6x19xf32, #tpu.memory_space<smem>>
    %c3_295 = arith.constant 3 : index
    %c13_296 = arith.constant 13 : index
    %157 = memref.load %arg2[%c3_295, %c13_296] : memref<6x19xf32, #tpu.memory_space<smem>>
    %c3_297 = arith.constant 3 : index
    %c14_298 = arith.constant 14 : index
    %158 = memref.load %arg2[%c3_297, %c14_298] : memref<6x19xf32, #tpu.memory_space<smem>>
    %c3_299 = arith.constant 3 : index
    %c15_300 = arith.constant 15 : index
    %159 = memref.load %arg2[%c3_299, %c15_300] : memref<6x19xf32, #tpu.memory_space<smem>>
    %c3_301 = arith.constant 3 : index
    %c16_302 = arith.constant 16 : index
    %160 = memref.load %arg2[%c3_301, %c16_302] : memref<6x19xf32, #tpu.memory_space<smem>>
    %c4_303 = arith.constant 4 : index
    %c0_304 = arith.constant 0 : index
    %161 = memref.load %arg2[%c4_303, %c0_304] : memref<6x19xf32, #tpu.memory_space<smem>>
    %c4_305 = arith.constant 4 : index
    %c1_306 = arith.constant 1 : index
    %162 = memref.load %arg2[%c4_305, %c1_306] : memref<6x19xf32, #tpu.memory_space<smem>>
    %c4_307 = arith.constant 4 : index
    %c2_308 = arith.constant 2 : index
    %163 = memref.load %arg2[%c4_307, %c2_308] : memref<6x19xf32, #tpu.memory_space<smem>>
    %c4_309 = arith.constant 4 : index
    %c3_310 = arith.constant 3 : index
    %164 = memref.load %arg2[%c4_309, %c3_310] : memref<6x19xf32, #tpu.memory_space<smem>>
    %c4_311 = arith.constant 4 : index
    %c4_312 = arith.constant 4 : index
    %165 = memref.load %arg2[%c4_311, %c4_312] : memref<6x19xf32, #tpu.memory_space<smem>>
    %c4_313 = arith.constant 4 : index
    %c5_314 = arith.constant 5 : index
    %166 = memref.load %arg2[%c4_313, %c5_314] : memref<6x19xf32, #tpu.memory_space<smem>>
    %c4_315 = arith.constant 4 : index
    %c6_316 = arith.constant 6 : index
    %167 = memref.load %arg2[%c4_315, %c6_316] : memref<6x19xf32, #tpu.memory_space<smem>>
    %c4_317 = arith.constant 4 : index
    %c7_318 = arith.constant 7 : index
    %168 = memref.load %arg2[%c4_317, %c7_318] : memref<6x19xf32, #tpu.memory_space<smem>>
    %c4_319 = arith.constant 4 : index
    %c8_320 = arith.constant 8 : index
    %169 = memref.load %arg2[%c4_319, %c8_320] : memref<6x19xf32, #tpu.memory_space<smem>>
    %c4_321 = arith.constant 4 : index
    %c9_322 = arith.constant 9 : index
    %170 = memref.load %arg2[%c4_321, %c9_322] : memref<6x19xf32, #tpu.memory_space<smem>>
    %c4_323 = arith.constant 4 : index
    %c10_324 = arith.constant 10 : index
    %171 = memref.load %arg2[%c4_323, %c10_324] : memref<6x19xf32, #tpu.memory_space<smem>>
    %c4_325 = arith.constant 4 : index
    %c11_326 = arith.constant 11 : index
    %172 = memref.load %arg2[%c4_325, %c11_326] : memref<6x19xf32, #tpu.memory_space<smem>>
    %c4_327 = arith.constant 4 : index
    %c12_328 = arith.constant 12 : index
    %173 = memref.load %arg2[%c4_327, %c12_328] : memref<6x19xf32, #tpu.memory_space<smem>>
    %c4_329 = arith.constant 4 : index
    %c13_330 = arith.constant 13 : index
    %174 = memref.load %arg2[%c4_329, %c13_330] : memref<6x19xf32, #tpu.memory_space<smem>>
    %c4_331 = arith.constant 4 : index
    %c14_332 = arith.constant 14 : index
    %175 = memref.load %arg2[%c4_331, %c14_332] : memref<6x19xf32, #tpu.memory_space<smem>>
    %c4_333 = arith.constant 4 : index
    %c15_334 = arith.constant 15 : index
    %176 = memref.load %arg2[%c4_333, %c15_334] : memref<6x19xf32, #tpu.memory_space<smem>>
    %c4_335 = arith.constant 4 : index
    %c16_336 = arith.constant 16 : index
    %177 = memref.load %arg2[%c4_335, %c16_336] : memref<6x19xf32, #tpu.memory_space<smem>>
    %c4_337 = arith.constant 4 : index
    %c17_338 = arith.constant 17 : index
    %178 = memref.load %arg2[%c4_337, %c17_338] : memref<6x19xf32, #tpu.memory_space<smem>>
    %c5_339 = arith.constant 5 : index
    %c0_340 = arith.constant 0 : index
    %179 = memref.load %arg2[%c5_339, %c0_340] : memref<6x19xf32, #tpu.memory_space<smem>>
    %c5_341 = arith.constant 5 : index
    %c1_342 = arith.constant 1 : index
    %180 = memref.load %arg2[%c5_341, %c1_342] : memref<6x19xf32, #tpu.memory_space<smem>>
    %c5_343 = arith.constant 5 : index
    %c2_344 = arith.constant 2 : index
    %181 = memref.load %arg2[%c5_343, %c2_344] : memref<6x19xf32, #tpu.memory_space<smem>>
    %c5_345 = arith.constant 5 : index
    %c3_346 = arith.constant 3 : index
    %182 = memref.load %arg2[%c5_345, %c3_346] : memref<6x19xf32, #tpu.memory_space<smem>>
    %c5_347 = arith.constant 5 : index
    %c4_348 = arith.constant 4 : index
    %183 = memref.load %arg2[%c5_347, %c4_348] : memref<6x19xf32, #tpu.memory_space<smem>>
    %c5_349 = arith.constant 5 : index
    %c5_350 = arith.constant 5 : index
    %184 = memref.load %arg2[%c5_349, %c5_350] : memref<6x19xf32, #tpu.memory_space<smem>>
    %c5_351 = arith.constant 5 : index
    %c6_352 = arith.constant 6 : index
    %185 = memref.load %arg2[%c5_351, %c6_352] : memref<6x19xf32, #tpu.memory_space<smem>>
    %c5_353 = arith.constant 5 : index
    %c7_354 = arith.constant 7 : index
    %186 = memref.load %arg2[%c5_353, %c7_354] : memref<6x19xf32, #tpu.memory_space<smem>>
    %c5_355 = arith.constant 5 : index
    %c8_356 = arith.constant 8 : index
    %187 = memref.load %arg2[%c5_355, %c8_356] : memref<6x19xf32, #tpu.memory_space<smem>>
    %c5_357 = arith.constant 5 : index
    %c9_358 = arith.constant 9 : index
    %188 = memref.load %arg2[%c5_357, %c9_358] : memref<6x19xf32, #tpu.memory_space<smem>>
    %c5_359 = arith.constant 5 : index
    %c10_360 = arith.constant 10 : index
    %189 = memref.load %arg2[%c5_359, %c10_360] : memref<6x19xf32, #tpu.memory_space<smem>>
    %c5_361 = arith.constant 5 : index
    %c11_362 = arith.constant 11 : index
    %190 = memref.load %arg2[%c5_361, %c11_362] : memref<6x19xf32, #tpu.memory_space<smem>>
    %c5_363 = arith.constant 5 : index
    %c12_364 = arith.constant 12 : index
    %191 = memref.load %arg2[%c5_363, %c12_364] : memref<6x19xf32, #tpu.memory_space<smem>>
    %c5_365 = arith.constant 5 : index
    %c13_366 = arith.constant 13 : index
    %192 = memref.load %arg2[%c5_365, %c13_366] : memref<6x19xf32, #tpu.memory_space<smem>>
    %c5_367 = arith.constant 5 : index
    %c14_368 = arith.constant 14 : index
    %193 = memref.load %arg2[%c5_367, %c14_368] : memref<6x19xf32, #tpu.memory_space<smem>>
    %c5_369 = arith.constant 5 : index
    %c15_370 = arith.constant 15 : index
    %194 = memref.load %arg2[%c5_369, %c15_370] : memref<6x19xf32, #tpu.memory_space<smem>>
    %c5_371 = arith.constant 5 : index
    %c16_372 = arith.constant 16 : index
    %195 = memref.load %arg2[%c5_371, %c16_372] : memref<6x19xf32, #tpu.memory_space<smem>>
    %c5_373 = arith.constant 5 : index
    %c17_374 = arith.constant 17 : index
    %196 = memref.load %arg2[%c5_373, %c17_374] : memref<6x19xf32, #tpu.memory_space<smem>>
    %c5_375 = arith.constant 5 : index
    %c18_376 = arith.constant 18 : index
    %197 = memref.load %arg2[%c5_375, %c18_376] : memref<6x19xf32, #tpu.memory_space<smem>>
    %c0_377 = arith.constant 0 : index
    %c0_378 = arith.constant 0 : index
    %198 = memref.load %arg3[%c0_377, %c0_378] : memref<6x7xf32, #tpu.memory_space<smem>>
    %c0_379 = arith.constant 0 : index
    %c1_380 = arith.constant 1 : index
    %199 = memref.load %arg3[%c0_379, %c1_380] : memref<6x7xf32, #tpu.memory_space<smem>>
    %c0_381 = arith.constant 0 : index
    %c2_382 = arith.constant 2 : index
    %200 = memref.load %arg3[%c0_381, %c2_382] : memref<6x7xf32, #tpu.memory_space<smem>>
    %c0_383 = arith.constant 0 : index
    %c3_384 = arith.constant 3 : index
    %201 = memref.load %arg3[%c0_383, %c3_384] : memref<6x7xf32, #tpu.memory_space<smem>>
    %c0_385 = arith.constant 0 : index
    %c4_386 = arith.constant 4 : index
    %202 = memref.load %arg3[%c0_385, %c4_386] : memref<6x7xf32, #tpu.memory_space<smem>>
    %c0_387 = arith.constant 0 : index
    %c5_388 = arith.constant 5 : index
    %203 = memref.load %arg3[%c0_387, %c5_388] : memref<6x7xf32, #tpu.memory_space<smem>>
    %c0_389 = arith.constant 0 : index
    %c6_390 = arith.constant 6 : index
    %204 = memref.load %arg3[%c0_389, %c6_390] : memref<6x7xf32, #tpu.memory_space<smem>>
    %c1_391 = arith.constant 1 : index
    %c0_392 = arith.constant 0 : index
    %205 = memref.load %arg3[%c1_391, %c0_392] : memref<6x7xf32, #tpu.memory_space<smem>>
    %c1_393 = arith.constant 1 : index
    %c1_394 = arith.constant 1 : index
    %206 = memref.load %arg3[%c1_393, %c1_394] : memref<6x7xf32, #tpu.memory_space<smem>>
    %c1_395 = arith.constant 1 : index
    %c2_396 = arith.constant 2 : index
    %207 = memref.load %arg3[%c1_395, %c2_396] : memref<6x7xf32, #tpu.memory_space<smem>>
    %c1_397 = arith.constant 1 : index
    %c3_398 = arith.constant 3 : index
    %208 = memref.load %arg3[%c1_397, %c3_398] : memref<6x7xf32, #tpu.memory_space<smem>>
    %c1_399 = arith.constant 1 : index
    %c4_400 = arith.constant 4 : index
    %209 = memref.load %arg3[%c1_399, %c4_400] : memref<6x7xf32, #tpu.memory_space<smem>>
    %c1_401 = arith.constant 1 : index
    %c5_402 = arith.constant 5 : index
    %210 = memref.load %arg3[%c1_401, %c5_402] : memref<6x7xf32, #tpu.memory_space<smem>>
    %c1_403 = arith.constant 1 : index
    %c6_404 = arith.constant 6 : index
    %211 = memref.load %arg3[%c1_403, %c6_404] : memref<6x7xf32, #tpu.memory_space<smem>>
    %c2_405 = arith.constant 2 : index
    %c0_406 = arith.constant 0 : index
    %212 = memref.load %arg3[%c2_405, %c0_406] : memref<6x7xf32, #tpu.memory_space<smem>>
    %c2_407 = arith.constant 2 : index
    %c1_408 = arith.constant 1 : index
    %213 = memref.load %arg3[%c2_407, %c1_408] : memref<6x7xf32, #tpu.memory_space<smem>>
    %c2_409 = arith.constant 2 : index
    %c2_410 = arith.constant 2 : index
    %214 = memref.load %arg3[%c2_409, %c2_410] : memref<6x7xf32, #tpu.memory_space<smem>>
    %c2_411 = arith.constant 2 : index
    %c3_412 = arith.constant 3 : index
    %215 = memref.load %arg3[%c2_411, %c3_412] : memref<6x7xf32, #tpu.memory_space<smem>>
    %c2_413 = arith.constant 2 : index
    %c4_414 = arith.constant 4 : index
    %216 = memref.load %arg3[%c2_413, %c4_414] : memref<6x7xf32, #tpu.memory_space<smem>>
    %c2_415 = arith.constant 2 : index
    %c5_416 = arith.constant 5 : index
    %217 = memref.load %arg3[%c2_415, %c5_416] : memref<6x7xf32, #tpu.memory_space<smem>>
    %c2_417 = arith.constant 2 : index
    %c6_418 = arith.constant 6 : index
    %218 = memref.load %arg3[%c2_417, %c6_418] : memref<6x7xf32, #tpu.memory_space<smem>>
    %c3_419 = arith.constant 3 : index
    %c0_420 = arith.constant 0 : index
    %219 = memref.load %arg3[%c3_419, %c0_420] : memref<6x7xf32, #tpu.memory_space<smem>>
    %c3_421 = arith.constant 3 : index
    %c1_422 = arith.constant 1 : index
    %220 = memref.load %arg3[%c3_421, %c1_422] : memref<6x7xf32, #tpu.memory_space<smem>>
    %c3_423 = arith.constant 3 : index
    %c2_424 = arith.constant 2 : index
    %221 = memref.load %arg3[%c3_423, %c2_424] : memref<6x7xf32, #tpu.memory_space<smem>>
    %c3_425 = arith.constant 3 : index
    %c3_426 = arith.constant 3 : index
    %222 = memref.load %arg3[%c3_425, %c3_426] : memref<6x7xf32, #tpu.memory_space<smem>>
    %c3_427 = arith.constant 3 : index
    %c4_428 = arith.constant 4 : index
    %223 = memref.load %arg3[%c3_427, %c4_428] : memref<6x7xf32, #tpu.memory_space<smem>>
    %c3_429 = arith.constant 3 : index
    %c5_430 = arith.constant 5 : index
    %224 = memref.load %arg3[%c3_429, %c5_430] : memref<6x7xf32, #tpu.memory_space<smem>>
    %c3_431 = arith.constant 3 : index
    %c6_432 = arith.constant 6 : index
    %225 = memref.load %arg3[%c3_431, %c6_432] : memref<6x7xf32, #tpu.memory_space<smem>>
    %c4_433 = arith.constant 4 : index
    %c0_434 = arith.constant 0 : index
    %226 = memref.load %arg3[%c4_433, %c0_434] : memref<6x7xf32, #tpu.memory_space<smem>>
    %c4_435 = arith.constant 4 : index
    %c1_436 = arith.constant 1 : index
    %227 = memref.load %arg3[%c4_435, %c1_436] : memref<6x7xf32, #tpu.memory_space<smem>>
    %c4_437 = arith.constant 4 : index
    %c2_438 = arith.constant 2 : index
    %228 = memref.load %arg3[%c4_437, %c2_438] : memref<6x7xf32, #tpu.memory_space<smem>>
    %c4_439 = arith.constant 4 : index
    %c3_440 = arith.constant 3 : index
    %229 = memref.load %arg3[%c4_439, %c3_440] : memref<6x7xf32, #tpu.memory_space<smem>>
    %c4_441 = arith.constant 4 : index
    %c4_442 = arith.constant 4 : index
    %230 = memref.load %arg3[%c4_441, %c4_442] : memref<6x7xf32, #tpu.memory_space<smem>>
    %c4_443 = arith.constant 4 : index
    %c5_444 = arith.constant 5 : index
    %231 = memref.load %arg3[%c4_443, %c5_444] : memref<6x7xf32, #tpu.memory_space<smem>>
    %c4_445 = arith.constant 4 : index
    %c6_446 = arith.constant 6 : index
    %232 = memref.load %arg3[%c4_445, %c6_446] : memref<6x7xf32, #tpu.memory_space<smem>>
    %c5_447 = arith.constant 5 : index
    %c0_448 = arith.constant 0 : index
    %233 = memref.load %arg3[%c5_447, %c0_448] : memref<6x7xf32, #tpu.memory_space<smem>>
    %c5_449 = arith.constant 5 : index
    %c1_450 = arith.constant 1 : index
    %234 = memref.load %arg3[%c5_449, %c1_450] : memref<6x7xf32, #tpu.memory_space<smem>>
    %c5_451 = arith.constant 5 : index
    %c2_452 = arith.constant 2 : index
    %235 = memref.load %arg3[%c5_451, %c2_452] : memref<6x7xf32, #tpu.memory_space<smem>>
    %c5_453 = arith.constant 5 : index
    %c3_454 = arith.constant 3 : index
    %236 = memref.load %arg3[%c5_453, %c3_454] : memref<6x7xf32, #tpu.memory_space<smem>>
    %c5_455 = arith.constant 5 : index
    %c4_456 = arith.constant 4 : index
    %237 = memref.load %arg3[%c5_455, %c4_456] : memref<6x7xf32, #tpu.memory_space<smem>>
    %c5_457 = arith.constant 5 : index
    %c5_458 = arith.constant 5 : index
    %238 = memref.load %arg3[%c5_457, %c5_458] : memref<6x7xf32, #tpu.memory_space<smem>>
    %c5_459 = arith.constant 5 : index
    %c6_460 = arith.constant 6 : index
    %239 = memref.load %arg3[%c5_459, %c6_460] : memref<6x7xf32, #tpu.memory_space<smem>>
    %c0_i32 = arith.constant 0 : i32
    %c1_i32 = arith.constant 1 : i32
    %240 = arith.muli %c0_i32, %c1_i32 : i32
    %c0_i32_461 = arith.constant 0 : i32
    %241 = arith.addi %c0_i32_461, %240 : i32
    %242 = arith.index_cast %241 : i32 to index
    %c0_462 = arith.constant 0 : index
    %c0_463 = arith.constant 0 : index
    %c0_464 = arith.constant 0 : index
    %243 = vector.load %arg4[%242, %c0_462, %c0_463, %c0_464] : memref<1x14x8x128xf32, #tpu.memory_space<vmem>>, vector<1x14x8x128xf32>
    %244 = vector.shape_cast %243 : vector<1x14x8x128xf32> to vector<14x8x128xf32>
    %245 = vector.extract_strided_slice %244 {offsets = [0, 0, 0], sizes = [1, 8, 128], strides = [1, 1, 1]} : vector<14x8x128xf32> to vector<1x8x128xf32>
    %246 = vector.shape_cast %245 : vector<1x8x128xf32> to vector<8x128xf32>
    %247 = vector.extract_strided_slice %244 {offsets = [1, 0, 0], sizes = [1, 8, 128], strides = [1, 1, 1]} : vector<14x8x128xf32> to vector<1x8x128xf32>
    %248 = vector.shape_cast %247 : vector<1x8x128xf32> to vector<8x128xf32>
    %249 = vector.extract_strided_slice %244 {offsets = [2, 0, 0], sizes = [1, 8, 128], strides = [1, 1, 1]} : vector<14x8x128xf32> to vector<1x8x128xf32>
    %250 = vector.shape_cast %249 : vector<1x8x128xf32> to vector<8x128xf32>
    %251 = vector.extract_strided_slice %244 {offsets = [3, 0, 0], sizes = [1, 8, 128], strides = [1, 1, 1]} : vector<14x8x128xf32> to vector<1x8x128xf32>
    %252 = vector.shape_cast %251 : vector<1x8x128xf32> to vector<8x128xf32>
    %253 = vector.extract_strided_slice %244 {offsets = [4, 0, 0], sizes = [1, 8, 128], strides = [1, 1, 1]} : vector<14x8x128xf32> to vector<1x8x128xf32>
    %254 = vector.shape_cast %253 : vector<1x8x128xf32> to vector<8x128xf32>
    %255 = vector.extract_strided_slice %244 {offsets = [5, 0, 0], sizes = [1, 8, 128], strides = [1, 1, 1]} : vector<14x8x128xf32> to vector<1x8x128xf32>
    %256 = vector.shape_cast %255 : vector<1x8x128xf32> to vector<8x128xf32>
    %257 = vector.extract_strided_slice %244 {offsets = [6, 0, 0], sizes = [1, 8, 128], strides = [1, 1, 1]} : vector<14x8x128xf32> to vector<1x8x128xf32>
    %258 = vector.shape_cast %257 : vector<1x8x128xf32> to vector<8x128xf32>
    %259 = vector.extract_strided_slice %244 {offsets = [7, 0, 0], sizes = [1, 8, 128], strides = [1, 1, 1]} : vector<14x8x128xf32> to vector<1x8x128xf32>
    %260 = vector.shape_cast %259 : vector<1x8x128xf32> to vector<8x128xf32>
    %261 = vector.extract_strided_slice %244 {offsets = [8, 0, 0], sizes = [1, 8, 128], strides = [1, 1, 1]} : vector<14x8x128xf32> to vector<1x8x128xf32>
    %262 = vector.shape_cast %261 : vector<1x8x128xf32> to vector<8x128xf32>
    %263 = vector.extract_strided_slice %244 {offsets = [9, 0, 0], sizes = [1, 8, 128], strides = [1, 1, 1]} : vector<14x8x128xf32> to vector<1x8x128xf32>
    %264 = vector.shape_cast %263 : vector<1x8x128xf32> to vector<8x128xf32>
    %265 = vector.extract_strided_slice %244 {offsets = [10, 0, 0], sizes = [1, 8, 128], strides = [1, 1, 1]} : vector<14x8x128xf32> to vector<1x8x128xf32>
    %266 = vector.shape_cast %265 : vector<1x8x128xf32> to vector<8x128xf32>
    %267 = vector.extract_strided_slice %244 {offsets = [11, 0, 0], sizes = [1, 8, 128], strides = [1, 1, 1]} : vector<14x8x128xf32> to vector<1x8x128xf32>
    %268 = vector.shape_cast %267 : vector<1x8x128xf32> to vector<8x128xf32>
    %269 = vector.extract_strided_slice %244 {offsets = [12, 0, 0], sizes = [1, 8, 128], strides = [1, 1, 1]} : vector<14x8x128xf32> to vector<1x8x128xf32>
    %270 = vector.shape_cast %269 : vector<1x8x128xf32> to vector<8x128xf32>
    %271 = vector.extract_strided_slice %244 {offsets = [13, 0, 0], sizes = [1, 8, 128], strides = [1, 1, 1]} : vector<14x8x128xf32> to vector<1x8x128xf32>
    %272 = vector.shape_cast %271 : vector<1x8x128xf32> to vector<8x128xf32>
    %273 = vector.broadcast %0 : f32 to vector<8x128xf32>
    %274 = arith.mulf %246, %273 : vector<8x128xf32>
    %275 = vector.broadcast %99 : f32 to vector<8x128xf32>
    %276 = arith.mulf %246, %275 : vector<8x128xf32>
    %277 = vector.broadcast %1 : f32 to vector<8x128xf32>
    %278 = arith.mulf %248, %277 : vector<8x128xf32>
    %279 = arith.addf %274, %278 : vector<8x128xf32>
    %280 = vector.broadcast %100 : f32 to vector<8x128xf32>
    %281 = arith.mulf %248, %280 : vector<8x128xf32>
    %282 = arith.addf %276, %281 : vector<8x128xf32>
    %283 = vector.broadcast %2 : f32 to vector<8x128xf32>
    %284 = arith.mulf %250, %283 : vector<8x128xf32>
    %285 = arith.addf %279, %284 : vector<8x128xf32>
    %286 = vector.broadcast %101 : f32 to vector<8x128xf32>
    %287 = arith.mulf %250, %286 : vector<8x128xf32>
    %288 = arith.addf %282, %287 : vector<8x128xf32>
    %289 = vector.broadcast %3 : f32 to vector<8x128xf32>
    %290 = arith.mulf %252, %289 : vector<8x128xf32>
    %291 = arith.addf %285, %290 : vector<8x128xf32>
    %292 = vector.broadcast %102 : f32 to vector<8x128xf32>
    %293 = arith.mulf %252, %292 : vector<8x128xf32>
    %294 = arith.addf %288, %293 : vector<8x128xf32>
    %295 = vector.broadcast %4 : f32 to vector<8x128xf32>
    %296 = arith.mulf %254, %295 : vector<8x128xf32>
    %297 = arith.addf %291, %296 : vector<8x128xf32>
    %298 = vector.broadcast %103 : f32 to vector<8x128xf32>
    %299 = arith.mulf %254, %298 : vector<8x128xf32>
    %300 = arith.addf %294, %299 : vector<8x128xf32>
    %301 = vector.broadcast %5 : f32 to vector<8x128xf32>
    %302 = arith.mulf %256, %301 : vector<8x128xf32>
    %303 = arith.addf %297, %302 : vector<8x128xf32>
    %304 = vector.broadcast %104 : f32 to vector<8x128xf32>
    %305 = arith.mulf %256, %304 : vector<8x128xf32>
    %306 = arith.addf %300, %305 : vector<8x128xf32>
    %307 = vector.broadcast %6 : f32 to vector<8x128xf32>
    %308 = arith.mulf %258, %307 : vector<8x128xf32>
    %309 = arith.addf %303, %308 : vector<8x128xf32>
    %310 = vector.broadcast %105 : f32 to vector<8x128xf32>
    %311 = arith.mulf %258, %310 : vector<8x128xf32>
    %312 = arith.addf %306, %311 : vector<8x128xf32>
    %313 = vector.broadcast %7 : f32 to vector<8x128xf32>
    %314 = arith.mulf %260, %313 : vector<8x128xf32>
    %315 = arith.addf %309, %314 : vector<8x128xf32>
    %316 = vector.broadcast %106 : f32 to vector<8x128xf32>
    %317 = arith.mulf %260, %316 : vector<8x128xf32>
    %318 = arith.addf %312, %317 : vector<8x128xf32>
    %319 = vector.broadcast %8 : f32 to vector<8x128xf32>
    %320 = arith.mulf %262, %319 : vector<8x128xf32>
    %321 = arith.addf %315, %320 : vector<8x128xf32>
    %322 = vector.broadcast %107 : f32 to vector<8x128xf32>
    %323 = arith.mulf %262, %322 : vector<8x128xf32>
    %324 = arith.addf %318, %323 : vector<8x128xf32>
    %325 = vector.broadcast %9 : f32 to vector<8x128xf32>
    %326 = arith.mulf %264, %325 : vector<8x128xf32>
    %327 = arith.addf %321, %326 : vector<8x128xf32>
    %328 = vector.broadcast %108 : f32 to vector<8x128xf32>
    %329 = arith.mulf %264, %328 : vector<8x128xf32>
    %330 = arith.addf %324, %329 : vector<8x128xf32>
    %331 = vector.broadcast %10 : f32 to vector<8x128xf32>
    %332 = arith.mulf %266, %331 : vector<8x128xf32>
    %333 = arith.addf %327, %332 : vector<8x128xf32>
    %334 = vector.broadcast %109 : f32 to vector<8x128xf32>
    %335 = arith.mulf %266, %334 : vector<8x128xf32>
    %336 = arith.addf %330, %335 : vector<8x128xf32>
    %337 = vector.broadcast %11 : f32 to vector<8x128xf32>
    %338 = arith.mulf %268, %337 : vector<8x128xf32>
    %339 = arith.addf %333, %338 : vector<8x128xf32>
    %340 = vector.broadcast %110 : f32 to vector<8x128xf32>
    %341 = arith.mulf %268, %340 : vector<8x128xf32>
    %342 = arith.addf %336, %341 : vector<8x128xf32>
    %343 = vector.broadcast %12 : f32 to vector<8x128xf32>
    %344 = arith.mulf %270, %343 : vector<8x128xf32>
    %345 = arith.addf %339, %344 : vector<8x128xf32>
    %346 = vector.broadcast %111 : f32 to vector<8x128xf32>
    %347 = arith.mulf %270, %346 : vector<8x128xf32>
    %348 = arith.addf %342, %347 : vector<8x128xf32>
    %349 = vector.broadcast %13 : f32 to vector<8x128xf32>
    %350 = arith.mulf %272, %349 : vector<8x128xf32>
    %351 = arith.addf %345, %350 : vector<8x128xf32>
    %352 = vector.broadcast %112 : f32 to vector<8x128xf32>
    %353 = arith.mulf %272, %352 : vector<8x128xf32>
    %354 = arith.addf %348, %353 : vector<8x128xf32>
    %355 = arith.addf %351, %354 : vector<8x128xf32>
    %356 = arith.subf %351, %354 : vector<8x128xf32>
    %357 = arith.mulf %351, %354 : vector<8x128xf32>
    %cst = arith.constant 9.99999974E-5 : f32
    %358 = vector.broadcast %cst : f32 to vector<8x128xf32>
    %359 = arith.addf %354, %358 : vector<8x128xf32>
    %360 = arith.divf %351, %359 : vector<8x128xf32>
    %361 = arith.maximumf %351, %354 : vector<8x128xf32>
    %362 = arith.minimumf %351, %354 : vector<8x128xf32>
    %363 = math.absf %351 : vector<8x128xf32>
    %364 = vector.broadcast %198 : f32 to vector<8x128xf32>
    %365 = arith.mulf %355, %364 : vector<8x128xf32>
    %366 = vector.broadcast %199 : f32 to vector<8x128xf32>
    %367 = arith.mulf %356, %366 : vector<8x128xf32>
    %368 = arith.addf %365, %367 : vector<8x128xf32>
    %369 = vector.broadcast %200 : f32 to vector<8x128xf32>
    %370 = arith.mulf %357, %369 : vector<8x128xf32>
    %371 = arith.addf %368, %370 : vector<8x128xf32>
    %372 = vector.broadcast %201 : f32 to vector<8x128xf32>
    %373 = arith.mulf %360, %372 : vector<8x128xf32>
    %374 = arith.addf %371, %373 : vector<8x128xf32>
    %375 = vector.broadcast %202 : f32 to vector<8x128xf32>
    %376 = arith.mulf %361, %375 : vector<8x128xf32>
    %377 = arith.addf %374, %376 : vector<8x128xf32>
    %378 = vector.broadcast %203 : f32 to vector<8x128xf32>
    %379 = arith.mulf %362, %378 : vector<8x128xf32>
    %380 = arith.addf %377, %379 : vector<8x128xf32>
    %381 = vector.broadcast %204 : f32 to vector<8x128xf32>
    %382 = arith.mulf %363, %381 : vector<8x128xf32>
    %383 = arith.addf %380, %382 : vector<8x128xf32>
    %384 = math.tanh %383 : vector<8x128xf32>
    %385 = vector.broadcast %14 : f32 to vector<8x128xf32>
    %386 = arith.mulf %246, %385 : vector<8x128xf32>
    %387 = vector.broadcast %113 : f32 to vector<8x128xf32>
    %388 = arith.mulf %246, %387 : vector<8x128xf32>
    %389 = vector.broadcast %15 : f32 to vector<8x128xf32>
    %390 = arith.mulf %248, %389 : vector<8x128xf32>
    %391 = arith.addf %386, %390 : vector<8x128xf32>
    %392 = vector.broadcast %114 : f32 to vector<8x128xf32>
    %393 = arith.mulf %248, %392 : vector<8x128xf32>
    %394 = arith.addf %388, %393 : vector<8x128xf32>
    %395 = vector.broadcast %16 : f32 to vector<8x128xf32>
    %396 = arith.mulf %250, %395 : vector<8x128xf32>
    %397 = arith.addf %391, %396 : vector<8x128xf32>
    %398 = vector.broadcast %115 : f32 to vector<8x128xf32>
    %399 = arith.mulf %250, %398 : vector<8x128xf32>
    %400 = arith.addf %394, %399 : vector<8x128xf32>
    %401 = vector.broadcast %17 : f32 to vector<8x128xf32>
    %402 = arith.mulf %252, %401 : vector<8x128xf32>
    %403 = arith.addf %397, %402 : vector<8x128xf32>
    %404 = vector.broadcast %116 : f32 to vector<8x128xf32>
    %405 = arith.mulf %252, %404 : vector<8x128xf32>
    %406 = arith.addf %400, %405 : vector<8x128xf32>
    %407 = vector.broadcast %18 : f32 to vector<8x128xf32>
    %408 = arith.mulf %254, %407 : vector<8x128xf32>
    %409 = arith.addf %403, %408 : vector<8x128xf32>
    %410 = vector.broadcast %117 : f32 to vector<8x128xf32>
    %411 = arith.mulf %254, %410 : vector<8x128xf32>
    %412 = arith.addf %406, %411 : vector<8x128xf32>
    %413 = vector.broadcast %19 : f32 to vector<8x128xf32>
    %414 = arith.mulf %256, %413 : vector<8x128xf32>
    %415 = arith.addf %409, %414 : vector<8x128xf32>
    %416 = vector.broadcast %118 : f32 to vector<8x128xf32>
    %417 = arith.mulf %256, %416 : vector<8x128xf32>
    %418 = arith.addf %412, %417 : vector<8x128xf32>
    %419 = vector.broadcast %20 : f32 to vector<8x128xf32>
    %420 = arith.mulf %258, %419 : vector<8x128xf32>
    %421 = arith.addf %415, %420 : vector<8x128xf32>
    %422 = vector.broadcast %119 : f32 to vector<8x128xf32>
    %423 = arith.mulf %258, %422 : vector<8x128xf32>
    %424 = arith.addf %418, %423 : vector<8x128xf32>
    %425 = vector.broadcast %21 : f32 to vector<8x128xf32>
    %426 = arith.mulf %260, %425 : vector<8x128xf32>
    %427 = arith.addf %421, %426 : vector<8x128xf32>
    %428 = vector.broadcast %120 : f32 to vector<8x128xf32>
    %429 = arith.mulf %260, %428 : vector<8x128xf32>
    %430 = arith.addf %424, %429 : vector<8x128xf32>
    %431 = vector.broadcast %22 : f32 to vector<8x128xf32>
    %432 = arith.mulf %262, %431 : vector<8x128xf32>
    %433 = arith.addf %427, %432 : vector<8x128xf32>
    %434 = vector.broadcast %121 : f32 to vector<8x128xf32>
    %435 = arith.mulf %262, %434 : vector<8x128xf32>
    %436 = arith.addf %430, %435 : vector<8x128xf32>
    %437 = vector.broadcast %23 : f32 to vector<8x128xf32>
    %438 = arith.mulf %264, %437 : vector<8x128xf32>
    %439 = arith.addf %433, %438 : vector<8x128xf32>
    %440 = vector.broadcast %122 : f32 to vector<8x128xf32>
    %441 = arith.mulf %264, %440 : vector<8x128xf32>
    %442 = arith.addf %436, %441 : vector<8x128xf32>
    %443 = vector.broadcast %24 : f32 to vector<8x128xf32>
    %444 = arith.mulf %266, %443 : vector<8x128xf32>
    %445 = arith.addf %439, %444 : vector<8x128xf32>
    %446 = vector.broadcast %123 : f32 to vector<8x128xf32>
    %447 = arith.mulf %266, %446 : vector<8x128xf32>
    %448 = arith.addf %442, %447 : vector<8x128xf32>
    %449 = vector.broadcast %25 : f32 to vector<8x128xf32>
    %450 = arith.mulf %268, %449 : vector<8x128xf32>
    %451 = arith.addf %445, %450 : vector<8x128xf32>
    %452 = vector.broadcast %124 : f32 to vector<8x128xf32>
    %453 = arith.mulf %268, %452 : vector<8x128xf32>
    %454 = arith.addf %448, %453 : vector<8x128xf32>
    %455 = vector.broadcast %26 : f32 to vector<8x128xf32>
    %456 = arith.mulf %270, %455 : vector<8x128xf32>
    %457 = arith.addf %451, %456 : vector<8x128xf32>
    %458 = vector.broadcast %125 : f32 to vector<8x128xf32>
    %459 = arith.mulf %270, %458 : vector<8x128xf32>
    %460 = arith.addf %454, %459 : vector<8x128xf32>
    %461 = vector.broadcast %27 : f32 to vector<8x128xf32>
    %462 = arith.mulf %272, %461 : vector<8x128xf32>
    %463 = arith.addf %457, %462 : vector<8x128xf32>
    %464 = vector.broadcast %126 : f32 to vector<8x128xf32>
    %465 = arith.mulf %272, %464 : vector<8x128xf32>
    %466 = arith.addf %460, %465 : vector<8x128xf32>
    %467 = vector.broadcast %28 : f32 to vector<8x128xf32>
    %468 = arith.mulf %384, %467 : vector<8x128xf32>
    %469 = arith.addf %463, %468 : vector<8x128xf32>
    %470 = vector.broadcast %127 : f32 to vector<8x128xf32>
    %471 = arith.mulf %384, %470 : vector<8x128xf32>
    %472 = arith.addf %466, %471 : vector<8x128xf32>
    %473 = arith.addf %469, %472 : vector<8x128xf32>
    %474 = arith.subf %469, %472 : vector<8x128xf32>
    %475 = arith.mulf %469, %472 : vector<8x128xf32>
    %cst_465 = arith.constant 9.99999974E-5 : f32
    %476 = vector.broadcast %cst_465 : f32 to vector<8x128xf32>
    %477 = arith.addf %472, %476 : vector<8x128xf32>
    %478 = arith.divf %469, %477 : vector<8x128xf32>
    %479 = arith.maximumf %469, %472 : vector<8x128xf32>
    %480 = arith.minimumf %469, %472 : vector<8x128xf32>
    %481 = math.absf %469 : vector<8x128xf32>
    %482 = vector.broadcast %205 : f32 to vector<8x128xf32>
    %483 = arith.mulf %473, %482 : vector<8x128xf32>
    %484 = vector.broadcast %206 : f32 to vector<8x128xf32>
    %485 = arith.mulf %474, %484 : vector<8x128xf32>
    %486 = arith.addf %483, %485 : vector<8x128xf32>
    %487 = vector.broadcast %207 : f32 to vector<8x128xf32>
    %488 = arith.mulf %475, %487 : vector<8x128xf32>
    %489 = arith.addf %486, %488 : vector<8x128xf32>
    %490 = vector.broadcast %208 : f32 to vector<8x128xf32>
    %491 = arith.mulf %478, %490 : vector<8x128xf32>
    %492 = arith.addf %489, %491 : vector<8x128xf32>
    %493 = vector.broadcast %209 : f32 to vector<8x128xf32>
    %494 = arith.mulf %479, %493 : vector<8x128xf32>
    %495 = arith.addf %492, %494 : vector<8x128xf32>
    %496 = vector.broadcast %210 : f32 to vector<8x128xf32>
    %497 = arith.mulf %480, %496 : vector<8x128xf32>
    %498 = arith.addf %495, %497 : vector<8x128xf32>
    %499 = vector.broadcast %211 : f32 to vector<8x128xf32>
    %500 = arith.mulf %481, %499 : vector<8x128xf32>
    %501 = arith.addf %498, %500 : vector<8x128xf32>
    %502 = math.tanh %501 : vector<8x128xf32>
    %503 = vector.broadcast %29 : f32 to vector<8x128xf32>
    %504 = arith.mulf %246, %503 : vector<8x128xf32>
    %505 = vector.broadcast %128 : f32 to vector<8x128xf32>
    %506 = arith.mulf %246, %505 : vector<8x128xf32>
    %507 = vector.broadcast %30 : f32 to vector<8x128xf32>
    %508 = arith.mulf %248, %507 : vector<8x128xf32>
    %509 = arith.addf %504, %508 : vector<8x128xf32>
    %510 = vector.broadcast %129 : f32 to vector<8x128xf32>
    %511 = arith.mulf %248, %510 : vector<8x128xf32>
    %512 = arith.addf %506, %511 : vector<8x128xf32>
    %513 = vector.broadcast %31 : f32 to vector<8x128xf32>
    %514 = arith.mulf %250, %513 : vector<8x128xf32>
    %515 = arith.addf %509, %514 : vector<8x128xf32>
    %516 = vector.broadcast %130 : f32 to vector<8x128xf32>
    %517 = arith.mulf %250, %516 : vector<8x128xf32>
    %518 = arith.addf %512, %517 : vector<8x128xf32>
    %519 = vector.broadcast %32 : f32 to vector<8x128xf32>
    %520 = arith.mulf %252, %519 : vector<8x128xf32>
    %521 = arith.addf %515, %520 : vector<8x128xf32>
    %522 = vector.broadcast %131 : f32 to vector<8x128xf32>
    %523 = arith.mulf %252, %522 : vector<8x128xf32>
    %524 = arith.addf %518, %523 : vector<8x128xf32>
    %525 = vector.broadcast %33 : f32 to vector<8x128xf32>
    %526 = arith.mulf %254, %525 : vector<8x128xf32>
    %527 = arith.addf %521, %526 : vector<8x128xf32>
    %528 = vector.broadcast %132 : f32 to vector<8x128xf32>
    %529 = arith.mulf %254, %528 : vector<8x128xf32>
    %530 = arith.addf %524, %529 : vector<8x128xf32>
    %531 = vector.broadcast %34 : f32 to vector<8x128xf32>
    %532 = arith.mulf %256, %531 : vector<8x128xf32>
    %533 = arith.addf %527, %532 : vector<8x128xf32>
    %534 = vector.broadcast %133 : f32 to vector<8x128xf32>
    %535 = arith.mulf %256, %534 : vector<8x128xf32>
    %536 = arith.addf %530, %535 : vector<8x128xf32>
    %537 = vector.broadcast %35 : f32 to vector<8x128xf32>
    %538 = arith.mulf %258, %537 : vector<8x128xf32>
    %539 = arith.addf %533, %538 : vector<8x128xf32>
    %540 = vector.broadcast %134 : f32 to vector<8x128xf32>
    %541 = arith.mulf %258, %540 : vector<8x128xf32>
    %542 = arith.addf %536, %541 : vector<8x128xf32>
    %543 = vector.broadcast %36 : f32 to vector<8x128xf32>
    %544 = arith.mulf %260, %543 : vector<8x128xf32>
    %545 = arith.addf %539, %544 : vector<8x128xf32>
    %546 = vector.broadcast %135 : f32 to vector<8x128xf32>
    %547 = arith.mulf %260, %546 : vector<8x128xf32>
    %548 = arith.addf %542, %547 : vector<8x128xf32>
    %549 = vector.broadcast %37 : f32 to vector<8x128xf32>
    %550 = arith.mulf %262, %549 : vector<8x128xf32>
    %551 = arith.addf %545, %550 : vector<8x128xf32>
    %552 = vector.broadcast %136 : f32 to vector<8x128xf32>
    %553 = arith.mulf %262, %552 : vector<8x128xf32>
    %554 = arith.addf %548, %553 : vector<8x128xf32>
    %555 = vector.broadcast %38 : f32 to vector<8x128xf32>
    %556 = arith.mulf %264, %555 : vector<8x128xf32>
    %557 = arith.addf %551, %556 : vector<8x128xf32>
    %558 = vector.broadcast %137 : f32 to vector<8x128xf32>
    %559 = arith.mulf %264, %558 : vector<8x128xf32>
    %560 = arith.addf %554, %559 : vector<8x128xf32>
    %561 = vector.broadcast %39 : f32 to vector<8x128xf32>
    %562 = arith.mulf %266, %561 : vector<8x128xf32>
    %563 = arith.addf %557, %562 : vector<8x128xf32>
    %564 = vector.broadcast %138 : f32 to vector<8x128xf32>
    %565 = arith.mulf %266, %564 : vector<8x128xf32>
    %566 = arith.addf %560, %565 : vector<8x128xf32>
    %567 = vector.broadcast %40 : f32 to vector<8x128xf32>
    %568 = arith.mulf %268, %567 : vector<8x128xf32>
    %569 = arith.addf %563, %568 : vector<8x128xf32>
    %570 = vector.broadcast %139 : f32 to vector<8x128xf32>
    %571 = arith.mulf %268, %570 : vector<8x128xf32>
    %572 = arith.addf %566, %571 : vector<8x128xf32>
    %573 = vector.broadcast %41 : f32 to vector<8x128xf32>
    %574 = arith.mulf %270, %573 : vector<8x128xf32>
    %575 = arith.addf %569, %574 : vector<8x128xf32>
    %576 = vector.broadcast %140 : f32 to vector<8x128xf32>
    %577 = arith.mulf %270, %576 : vector<8x128xf32>
    %578 = arith.addf %572, %577 : vector<8x128xf32>
    %579 = vector.broadcast %42 : f32 to vector<8x128xf32>
    %580 = arith.mulf %272, %579 : vector<8x128xf32>
    %581 = arith.addf %575, %580 : vector<8x128xf32>
    %582 = vector.broadcast %141 : f32 to vector<8x128xf32>
    %583 = arith.mulf %272, %582 : vector<8x128xf32>
    %584 = arith.addf %578, %583 : vector<8x128xf32>
    %585 = vector.broadcast %43 : f32 to vector<8x128xf32>
    %586 = arith.mulf %384, %585 : vector<8x128xf32>
    %587 = arith.addf %581, %586 : vector<8x128xf32>
    %588 = vector.broadcast %142 : f32 to vector<8x128xf32>
    %589 = arith.mulf %384, %588 : vector<8x128xf32>
    %590 = arith.addf %584, %589 : vector<8x128xf32>
    %591 = vector.broadcast %44 : f32 to vector<8x128xf32>
    %592 = arith.mulf %502, %591 : vector<8x128xf32>
    %593 = arith.addf %587, %592 : vector<8x128xf32>
    %594 = vector.broadcast %143 : f32 to vector<8x128xf32>
    %595 = arith.mulf %502, %594 : vector<8x128xf32>
    %596 = arith.addf %590, %595 : vector<8x128xf32>
    %597 = arith.addf %593, %596 : vector<8x128xf32>
    %598 = arith.subf %593, %596 : vector<8x128xf32>
    %599 = arith.mulf %593, %596 : vector<8x128xf32>
    %cst_466 = arith.constant 9.99999974E-5 : f32
    %600 = vector.broadcast %cst_466 : f32 to vector<8x128xf32>
    %601 = arith.addf %596, %600 : vector<8x128xf32>
    %602 = arith.divf %593, %601 : vector<8x128xf32>
    %603 = arith.maximumf %593, %596 : vector<8x128xf32>
    %604 = arith.minimumf %593, %596 : vector<8x128xf32>
    %605 = math.absf %593 : vector<8x128xf32>
    %606 = vector.broadcast %212 : f32 to vector<8x128xf32>
    %607 = arith.mulf %597, %606 : vector<8x128xf32>
    %608 = vector.broadcast %213 : f32 to vector<8x128xf32>
    %609 = arith.mulf %598, %608 : vector<8x128xf32>
    %610 = arith.addf %607, %609 : vector<8x128xf32>
    %611 = vector.broadcast %214 : f32 to vector<8x128xf32>
    %612 = arith.mulf %599, %611 : vector<8x128xf32>
    %613 = arith.addf %610, %612 : vector<8x128xf32>
    %614 = vector.broadcast %215 : f32 to vector<8x128xf32>
    %615 = arith.mulf %602, %614 : vector<8x128xf32>
    %616 = arith.addf %613, %615 : vector<8x128xf32>
    %617 = vector.broadcast %216 : f32 to vector<8x128xf32>
    %618 = arith.mulf %603, %617 : vector<8x128xf32>
    %619 = arith.addf %616, %618 : vector<8x128xf32>
    %620 = vector.broadcast %217 : f32 to vector<8x128xf32>
    %621 = arith.mulf %604, %620 : vector<8x128xf32>
    %622 = arith.addf %619, %621 : vector<8x128xf32>
    %623 = vector.broadcast %218 : f32 to vector<8x128xf32>
    %624 = arith.mulf %605, %623 : vector<8x128xf32>
    %625 = arith.addf %622, %624 : vector<8x128xf32>
    %626 = math.tanh %625 : vector<8x128xf32>
    %627 = vector.broadcast %45 : f32 to vector<8x128xf32>
    %628 = arith.mulf %246, %627 : vector<8x128xf32>
    %629 = vector.broadcast %144 : f32 to vector<8x128xf32>
    %630 = arith.mulf %246, %629 : vector<8x128xf32>
    %631 = vector.broadcast %46 : f32 to vector<8x128xf32>
    %632 = arith.mulf %248, %631 : vector<8x128xf32>
    %633 = arith.addf %628, %632 : vector<8x128xf32>
    %634 = vector.broadcast %145 : f32 to vector<8x128xf32>
    %635 = arith.mulf %248, %634 : vector<8x128xf32>
    %636 = arith.addf %630, %635 : vector<8x128xf32>
    %637 = vector.broadcast %47 : f32 to vector<8x128xf32>
    %638 = arith.mulf %250, %637 : vector<8x128xf32>
    %639 = arith.addf %633, %638 : vector<8x128xf32>
    %640 = vector.broadcast %146 : f32 to vector<8x128xf32>
    %641 = arith.mulf %250, %640 : vector<8x128xf32>
    %642 = arith.addf %636, %641 : vector<8x128xf32>
    %643 = vector.broadcast %48 : f32 to vector<8x128xf32>
    %644 = arith.mulf %252, %643 : vector<8x128xf32>
    %645 = arith.addf %639, %644 : vector<8x128xf32>
    %646 = vector.broadcast %147 : f32 to vector<8x128xf32>
    %647 = arith.mulf %252, %646 : vector<8x128xf32>
    %648 = arith.addf %642, %647 : vector<8x128xf32>
    %649 = vector.broadcast %49 : f32 to vector<8x128xf32>
    %650 = arith.mulf %254, %649 : vector<8x128xf32>
    %651 = arith.addf %645, %650 : vector<8x128xf32>
    %652 = vector.broadcast %148 : f32 to vector<8x128xf32>
    %653 = arith.mulf %254, %652 : vector<8x128xf32>
    %654 = arith.addf %648, %653 : vector<8x128xf32>
    %655 = vector.broadcast %50 : f32 to vector<8x128xf32>
    %656 = arith.mulf %256, %655 : vector<8x128xf32>
    %657 = arith.addf %651, %656 : vector<8x128xf32>
    %658 = vector.broadcast %149 : f32 to vector<8x128xf32>
    %659 = arith.mulf %256, %658 : vector<8x128xf32>
    %660 = arith.addf %654, %659 : vector<8x128xf32>
    %661 = vector.broadcast %51 : f32 to vector<8x128xf32>
    %662 = arith.mulf %258, %661 : vector<8x128xf32>
    %663 = arith.addf %657, %662 : vector<8x128xf32>
    %664 = vector.broadcast %150 : f32 to vector<8x128xf32>
    %665 = arith.mulf %258, %664 : vector<8x128xf32>
    %666 = arith.addf %660, %665 : vector<8x128xf32>
    %667 = vector.broadcast %52 : f32 to vector<8x128xf32>
    %668 = arith.mulf %260, %667 : vector<8x128xf32>
    %669 = arith.addf %663, %668 : vector<8x128xf32>
    %670 = vector.broadcast %151 : f32 to vector<8x128xf32>
    %671 = arith.mulf %260, %670 : vector<8x128xf32>
    %672 = arith.addf %666, %671 : vector<8x128xf32>
    %673 = vector.broadcast %53 : f32 to vector<8x128xf32>
    %674 = arith.mulf %262, %673 : vector<8x128xf32>
    %675 = arith.addf %669, %674 : vector<8x128xf32>
    %676 = vector.broadcast %152 : f32 to vector<8x128xf32>
    %677 = arith.mulf %262, %676 : vector<8x128xf32>
    %678 = arith.addf %672, %677 : vector<8x128xf32>
    %679 = vector.broadcast %54 : f32 to vector<8x128xf32>
    %680 = arith.mulf %264, %679 : vector<8x128xf32>
    %681 = arith.addf %675, %680 : vector<8x128xf32>
    %682 = vector.broadcast %153 : f32 to vector<8x128xf32>
    %683 = arith.mulf %264, %682 : vector<8x128xf32>
    %684 = arith.addf %678, %683 : vector<8x128xf32>
    %685 = vector.broadcast %55 : f32 to vector<8x128xf32>
    %686 = arith.mulf %266, %685 : vector<8x128xf32>
    %687 = arith.addf %681, %686 : vector<8x128xf32>
    %688 = vector.broadcast %154 : f32 to vector<8x128xf32>
    %689 = arith.mulf %266, %688 : vector<8x128xf32>
    %690 = arith.addf %684, %689 : vector<8x128xf32>
    %691 = vector.broadcast %56 : f32 to vector<8x128xf32>
    %692 = arith.mulf %268, %691 : vector<8x128xf32>
    %693 = arith.addf %687, %692 : vector<8x128xf32>
    %694 = vector.broadcast %155 : f32 to vector<8x128xf32>
    %695 = arith.mulf %268, %694 : vector<8x128xf32>
    %696 = arith.addf %690, %695 : vector<8x128xf32>
    %697 = vector.broadcast %57 : f32 to vector<8x128xf32>
    %698 = arith.mulf %270, %697 : vector<8x128xf32>
    %699 = arith.addf %693, %698 : vector<8x128xf32>
    %700 = vector.broadcast %156 : f32 to vector<8x128xf32>
    %701 = arith.mulf %270, %700 : vector<8x128xf32>
    %702 = arith.addf %696, %701 : vector<8x128xf32>
    %703 = vector.broadcast %58 : f32 to vector<8x128xf32>
    %704 = arith.mulf %272, %703 : vector<8x128xf32>
    %705 = arith.addf %699, %704 : vector<8x128xf32>
    %706 = vector.broadcast %157 : f32 to vector<8x128xf32>
    %707 = arith.mulf %272, %706 : vector<8x128xf32>
    %708 = arith.addf %702, %707 : vector<8x128xf32>
    %709 = vector.broadcast %59 : f32 to vector<8x128xf32>
    %710 = arith.mulf %384, %709 : vector<8x128xf32>
    %711 = arith.addf %705, %710 : vector<8x128xf32>
    %712 = vector.broadcast %158 : f32 to vector<8x128xf32>
    %713 = arith.mulf %384, %712 : vector<8x128xf32>
    %714 = arith.addf %708, %713 : vector<8x128xf32>
    %715 = vector.broadcast %60 : f32 to vector<8x128xf32>
    %716 = arith.mulf %502, %715 : vector<8x128xf32>
    %717 = arith.addf %711, %716 : vector<8x128xf32>
    %718 = vector.broadcast %159 : f32 to vector<8x128xf32>
    %719 = arith.mulf %502, %718 : vector<8x128xf32>
    %720 = arith.addf %714, %719 : vector<8x128xf32>
    %721 = vector.broadcast %61 : f32 to vector<8x128xf32>
    %722 = arith.mulf %626, %721 : vector<8x128xf32>
    %723 = arith.addf %717, %722 : vector<8x128xf32>
    %724 = vector.broadcast %160 : f32 to vector<8x128xf32>
    %725 = arith.mulf %626, %724 : vector<8x128xf32>
    %726 = arith.addf %720, %725 : vector<8x128xf32>
    %727 = arith.addf %723, %726 : vector<8x128xf32>
    %728 = arith.subf %723, %726 : vector<8x128xf32>
    %729 = arith.mulf %723, %726 : vector<8x128xf32>
    %cst_467 = arith.constant 9.99999974E-5 : f32
    %730 = vector.broadcast %cst_467 : f32 to vector<8x128xf32>
    %731 = arith.addf %726, %730 : vector<8x128xf32>
    %732 = arith.divf %723, %731 : vector<8x128xf32>
    %733 = arith.maximumf %723, %726 : vector<8x128xf32>
    %734 = arith.minimumf %723, %726 : vector<8x128xf32>
    %735 = math.absf %723 : vector<8x128xf32>
    %736 = vector.broadcast %219 : f32 to vector<8x128xf32>
    %737 = arith.mulf %727, %736 : vector<8x128xf32>
    %738 = vector.broadcast %220 : f32 to vector<8x128xf32>
    %739 = arith.mulf %728, %738 : vector<8x128xf32>
    %740 = arith.addf %737, %739 : vector<8x128xf32>
    %741 = vector.broadcast %221 : f32 to vector<8x128xf32>
    %742 = arith.mulf %729, %741 : vector<8x128xf32>
    %743 = arith.addf %740, %742 : vector<8x128xf32>
    %744 = vector.broadcast %222 : f32 to vector<8x128xf32>
    %745 = arith.mulf %732, %744 : vector<8x128xf32>
    %746 = arith.addf %743, %745 : vector<8x128xf32>
    %747 = vector.broadcast %223 : f32 to vector<8x128xf32>
    %748 = arith.mulf %733, %747 : vector<8x128xf32>
    %749 = arith.addf %746, %748 : vector<8x128xf32>
    %750 = vector.broadcast %224 : f32 to vector<8x128xf32>
    %751 = arith.mulf %734, %750 : vector<8x128xf32>
    %752 = arith.addf %749, %751 : vector<8x128xf32>
    %753 = vector.broadcast %225 : f32 to vector<8x128xf32>
    %754 = arith.mulf %735, %753 : vector<8x128xf32>
    %755 = arith.addf %752, %754 : vector<8x128xf32>
    %756 = math.tanh %755 : vector<8x128xf32>
    %757 = vector.broadcast %62 : f32 to vector<8x128xf32>
    %758 = arith.mulf %246, %757 : vector<8x128xf32>
    %759 = vector.broadcast %161 : f32 to vector<8x128xf32>
    %760 = arith.mulf %246, %759 : vector<8x128xf32>
    %761 = vector.broadcast %63 : f32 to vector<8x128xf32>
    %762 = arith.mulf %248, %761 : vector<8x128xf32>
    %763 = arith.addf %758, %762 : vector<8x128xf32>
    %764 = vector.broadcast %162 : f32 to vector<8x128xf32>
    %765 = arith.mulf %248, %764 : vector<8x128xf32>
    %766 = arith.addf %760, %765 : vector<8x128xf32>
    %767 = vector.broadcast %64 : f32 to vector<8x128xf32>
    %768 = arith.mulf %250, %767 : vector<8x128xf32>
    %769 = arith.addf %763, %768 : vector<8x128xf32>
    %770 = vector.broadcast %163 : f32 to vector<8x128xf32>
    %771 = arith.mulf %250, %770 : vector<8x128xf32>
    %772 = arith.addf %766, %771 : vector<8x128xf32>
    %773 = vector.broadcast %65 : f32 to vector<8x128xf32>
    %774 = arith.mulf %252, %773 : vector<8x128xf32>
    %775 = arith.addf %769, %774 : vector<8x128xf32>
    %776 = vector.broadcast %164 : f32 to vector<8x128xf32>
    %777 = arith.mulf %252, %776 : vector<8x128xf32>
    %778 = arith.addf %772, %777 : vector<8x128xf32>
    %779 = vector.broadcast %66 : f32 to vector<8x128xf32>
    %780 = arith.mulf %254, %779 : vector<8x128xf32>
    %781 = arith.addf %775, %780 : vector<8x128xf32>
    %782 = vector.broadcast %165 : f32 to vector<8x128xf32>
    %783 = arith.mulf %254, %782 : vector<8x128xf32>
    %784 = arith.addf %778, %783 : vector<8x128xf32>
    %785 = vector.broadcast %67 : f32 to vector<8x128xf32>
    %786 = arith.mulf %256, %785 : vector<8x128xf32>
    %787 = arith.addf %781, %786 : vector<8x128xf32>
    %788 = vector.broadcast %166 : f32 to vector<8x128xf32>
    %789 = arith.mulf %256, %788 : vector<8x128xf32>
    %790 = arith.addf %784, %789 : vector<8x128xf32>
    %791 = vector.broadcast %68 : f32 to vector<8x128xf32>
    %792 = arith.mulf %258, %791 : vector<8x128xf32>
    %793 = arith.addf %787, %792 : vector<8x128xf32>
    %794 = vector.broadcast %167 : f32 to vector<8x128xf32>
    %795 = arith.mulf %258, %794 : vector<8x128xf32>
    %796 = arith.addf %790, %795 : vector<8x128xf32>
    %797 = vector.broadcast %69 : f32 to vector<8x128xf32>
    %798 = arith.mulf %260, %797 : vector<8x128xf32>
    %799 = arith.addf %793, %798 : vector<8x128xf32>
    %800 = vector.broadcast %168 : f32 to vector<8x128xf32>
    %801 = arith.mulf %260, %800 : vector<8x128xf32>
    %802 = arith.addf %796, %801 : vector<8x128xf32>
    %803 = vector.broadcast %70 : f32 to vector<8x128xf32>
    %804 = arith.mulf %262, %803 : vector<8x128xf32>
    %805 = arith.addf %799, %804 : vector<8x128xf32>
    %806 = vector.broadcast %169 : f32 to vector<8x128xf32>
    %807 = arith.mulf %262, %806 : vector<8x128xf32>
    %808 = arith.addf %802, %807 : vector<8x128xf32>
    %809 = vector.broadcast %71 : f32 to vector<8x128xf32>
    %810 = arith.mulf %264, %809 : vector<8x128xf32>
    %811 = arith.addf %805, %810 : vector<8x128xf32>
    %812 = vector.broadcast %170 : f32 to vector<8x128xf32>
    %813 = arith.mulf %264, %812 : vector<8x128xf32>
    %814 = arith.addf %808, %813 : vector<8x128xf32>
    %815 = vector.broadcast %72 : f32 to vector<8x128xf32>
    %816 = arith.mulf %266, %815 : vector<8x128xf32>
    %817 = arith.addf %811, %816 : vector<8x128xf32>
    %818 = vector.broadcast %171 : f32 to vector<8x128xf32>
    %819 = arith.mulf %266, %818 : vector<8x128xf32>
    %820 = arith.addf %814, %819 : vector<8x128xf32>
    %821 = vector.broadcast %73 : f32 to vector<8x128xf32>
    %822 = arith.mulf %268, %821 : vector<8x128xf32>
    %823 = arith.addf %817, %822 : vector<8x128xf32>
    %824 = vector.broadcast %172 : f32 to vector<8x128xf32>
    %825 = arith.mulf %268, %824 : vector<8x128xf32>
    %826 = arith.addf %820, %825 : vector<8x128xf32>
    %827 = vector.broadcast %74 : f32 to vector<8x128xf32>
    %828 = arith.mulf %270, %827 : vector<8x128xf32>
    %829 = arith.addf %823, %828 : vector<8x128xf32>
    %830 = vector.broadcast %173 : f32 to vector<8x128xf32>
    %831 = arith.mulf %270, %830 : vector<8x128xf32>
    %832 = arith.addf %826, %831 : vector<8x128xf32>
    %833 = vector.broadcast %75 : f32 to vector<8x128xf32>
    %834 = arith.mulf %272, %833 : vector<8x128xf32>
    %835 = arith.addf %829, %834 : vector<8x128xf32>
    %836 = vector.broadcast %174 : f32 to vector<8x128xf32>
    %837 = arith.mulf %272, %836 : vector<8x128xf32>
    %838 = arith.addf %832, %837 : vector<8x128xf32>
    %839 = vector.broadcast %76 : f32 to vector<8x128xf32>
    %840 = arith.mulf %384, %839 : vector<8x128xf32>
    %841 = arith.addf %835, %840 : vector<8x128xf32>
    %842 = vector.broadcast %175 : f32 to vector<8x128xf32>
    %843 = arith.mulf %384, %842 : vector<8x128xf32>
    %844 = arith.addf %838, %843 : vector<8x128xf32>
    %845 = vector.broadcast %77 : f32 to vector<8x128xf32>
    %846 = arith.mulf %502, %845 : vector<8x128xf32>
    %847 = arith.addf %841, %846 : vector<8x128xf32>
    %848 = vector.broadcast %176 : f32 to vector<8x128xf32>
    %849 = arith.mulf %502, %848 : vector<8x128xf32>
    %850 = arith.addf %844, %849 : vector<8x128xf32>
    %851 = vector.broadcast %78 : f32 to vector<8x128xf32>
    %852 = arith.mulf %626, %851 : vector<8x128xf32>
    %853 = arith.addf %847, %852 : vector<8x128xf32>
    %854 = vector.broadcast %177 : f32 to vector<8x128xf32>
    %855 = arith.mulf %626, %854 : vector<8x128xf32>
    %856 = arith.addf %850, %855 : vector<8x128xf32>
    %857 = vector.broadcast %79 : f32 to vector<8x128xf32>
    %858 = arith.mulf %756, %857 : vector<8x128xf32>
    %859 = arith.addf %853, %858 : vector<8x128xf32>
    %860 = vector.broadcast %178 : f32 to vector<8x128xf32>
    %861 = arith.mulf %756, %860 : vector<8x128xf32>
    %862 = arith.addf %856, %861 : vector<8x128xf32>
    %863 = arith.addf %859, %862 : vector<8x128xf32>
    %864 = arith.subf %859, %862 : vector<8x128xf32>
    %865 = arith.mulf %859, %862 : vector<8x128xf32>
    %cst_468 = arith.constant 9.99999974E-5 : f32
    %866 = vector.broadcast %cst_468 : f32 to vector<8x128xf32>
    %867 = arith.addf %862, %866 : vector<8x128xf32>
    %868 = arith.divf %859, %867 : vector<8x128xf32>
    %869 = arith.maximumf %859, %862 : vector<8x128xf32>
    %870 = arith.minimumf %859, %862 : vector<8x128xf32>
    %871 = math.absf %859 : vector<8x128xf32>
    %872 = vector.broadcast %226 : f32 to vector<8x128xf32>
    %873 = arith.mulf %863, %872 : vector<8x128xf32>
    %874 = vector.broadcast %227 : f32 to vector<8x128xf32>
    %875 = arith.mulf %864, %874 : vector<8x128xf32>
    %876 = arith.addf %873, %875 : vector<8x128xf32>
    %877 = vector.broadcast %228 : f32 to vector<8x128xf32>
    %878 = arith.mulf %865, %877 : vector<8x128xf32>
    %879 = arith.addf %876, %878 : vector<8x128xf32>
    %880 = vector.broadcast %229 : f32 to vector<8x128xf32>
    %881 = arith.mulf %868, %880 : vector<8x128xf32>
    %882 = arith.addf %879, %881 : vector<8x128xf32>
    %883 = vector.broadcast %230 : f32 to vector<8x128xf32>
    %884 = arith.mulf %869, %883 : vector<8x128xf32>
    %885 = arith.addf %882, %884 : vector<8x128xf32>
    %886 = vector.broadcast %231 : f32 to vector<8x128xf32>
    %887 = arith.mulf %870, %886 : vector<8x128xf32>
    %888 = arith.addf %885, %887 : vector<8x128xf32>
    %889 = vector.broadcast %232 : f32 to vector<8x128xf32>
    %890 = arith.mulf %871, %889 : vector<8x128xf32>
    %891 = arith.addf %888, %890 : vector<8x128xf32>
    %892 = math.tanh %891 : vector<8x128xf32>
    %893 = vector.broadcast %80 : f32 to vector<8x128xf32>
    %894 = arith.mulf %246, %893 : vector<8x128xf32>
    %895 = vector.broadcast %179 : f32 to vector<8x128xf32>
    %896 = arith.mulf %246, %895 : vector<8x128xf32>
    %897 = vector.broadcast %81 : f32 to vector<8x128xf32>
    %898 = arith.mulf %248, %897 : vector<8x128xf32>
    %899 = arith.addf %894, %898 : vector<8x128xf32>
    %900 = vector.broadcast %180 : f32 to vector<8x128xf32>
    %901 = arith.mulf %248, %900 : vector<8x128xf32>
    %902 = arith.addf %896, %901 : vector<8x128xf32>
    %903 = vector.broadcast %82 : f32 to vector<8x128xf32>
    %904 = arith.mulf %250, %903 : vector<8x128xf32>
    %905 = arith.addf %899, %904 : vector<8x128xf32>
    %906 = vector.broadcast %181 : f32 to vector<8x128xf32>
    %907 = arith.mulf %250, %906 : vector<8x128xf32>
    %908 = arith.addf %902, %907 : vector<8x128xf32>
    %909 = vector.broadcast %83 : f32 to vector<8x128xf32>
    %910 = arith.mulf %252, %909 : vector<8x128xf32>
    %911 = arith.addf %905, %910 : vector<8x128xf32>
    %912 = vector.broadcast %182 : f32 to vector<8x128xf32>
    %913 = arith.mulf %252, %912 : vector<8x128xf32>
    %914 = arith.addf %908, %913 : vector<8x128xf32>
    %915 = vector.broadcast %84 : f32 to vector<8x128xf32>
    %916 = arith.mulf %254, %915 : vector<8x128xf32>
    %917 = arith.addf %911, %916 : vector<8x128xf32>
    %918 = vector.broadcast %183 : f32 to vector<8x128xf32>
    %919 = arith.mulf %254, %918 : vector<8x128xf32>
    %920 = arith.addf %914, %919 : vector<8x128xf32>
    %921 = vector.broadcast %85 : f32 to vector<8x128xf32>
    %922 = arith.mulf %256, %921 : vector<8x128xf32>
    %923 = arith.addf %917, %922 : vector<8x128xf32>
    %924 = vector.broadcast %184 : f32 to vector<8x128xf32>
    %925 = arith.mulf %256, %924 : vector<8x128xf32>
    %926 = arith.addf %920, %925 : vector<8x128xf32>
    %927 = vector.broadcast %86 : f32 to vector<8x128xf32>
    %928 = arith.mulf %258, %927 : vector<8x128xf32>
    %929 = arith.addf %923, %928 : vector<8x128xf32>
    %930 = vector.broadcast %185 : f32 to vector<8x128xf32>
    %931 = arith.mulf %258, %930 : vector<8x128xf32>
    %932 = arith.addf %926, %931 : vector<8x128xf32>
    %933 = vector.broadcast %87 : f32 to vector<8x128xf32>
    %934 = arith.mulf %260, %933 : vector<8x128xf32>
    %935 = arith.addf %929, %934 : vector<8x128xf32>
    %936 = vector.broadcast %186 : f32 to vector<8x128xf32>
    %937 = arith.mulf %260, %936 : vector<8x128xf32>
    %938 = arith.addf %932, %937 : vector<8x128xf32>
    %939 = vector.broadcast %88 : f32 to vector<8x128xf32>
    %940 = arith.mulf %262, %939 : vector<8x128xf32>
    %941 = arith.addf %935, %940 : vector<8x128xf32>
    %942 = vector.broadcast %187 : f32 to vector<8x128xf32>
    %943 = arith.mulf %262, %942 : vector<8x128xf32>
    %944 = arith.addf %938, %943 : vector<8x128xf32>
    %945 = vector.broadcast %89 : f32 to vector<8x128xf32>
    %946 = arith.mulf %264, %945 : vector<8x128xf32>
    %947 = arith.addf %941, %946 : vector<8x128xf32>
    %948 = vector.broadcast %188 : f32 to vector<8x128xf32>
    %949 = arith.mulf %264, %948 : vector<8x128xf32>
    %950 = arith.addf %944, %949 : vector<8x128xf32>
    %951 = vector.broadcast %90 : f32 to vector<8x128xf32>
    %952 = arith.mulf %266, %951 : vector<8x128xf32>
    %953 = arith.addf %947, %952 : vector<8x128xf32>
    %954 = vector.broadcast %189 : f32 to vector<8x128xf32>
    %955 = arith.mulf %266, %954 : vector<8x128xf32>
    %956 = arith.addf %950, %955 : vector<8x128xf32>
    %957 = vector.broadcast %91 : f32 to vector<8x128xf32>
    %958 = arith.mulf %268, %957 : vector<8x128xf32>
    %959 = arith.addf %953, %958 : vector<8x128xf32>
    %960 = vector.broadcast %190 : f32 to vector<8x128xf32>
    %961 = arith.mulf %268, %960 : vector<8x128xf32>
    %962 = arith.addf %956, %961 : vector<8x128xf32>
    %963 = vector.broadcast %92 : f32 to vector<8x128xf32>
    %964 = arith.mulf %270, %963 : vector<8x128xf32>
    %965 = arith.addf %959, %964 : vector<8x128xf32>
    %966 = vector.broadcast %191 : f32 to vector<8x128xf32>
    %967 = arith.mulf %270, %966 : vector<8x128xf32>
    %968 = arith.addf %962, %967 : vector<8x128xf32>
    %969 = vector.broadcast %93 : f32 to vector<8x128xf32>
    %970 = arith.mulf %272, %969 : vector<8x128xf32>
    %971 = arith.addf %965, %970 : vector<8x128xf32>
    %972 = vector.broadcast %192 : f32 to vector<8x128xf32>
    %973 = arith.mulf %272, %972 : vector<8x128xf32>
    %974 = arith.addf %968, %973 : vector<8x128xf32>
    %975 = vector.broadcast %94 : f32 to vector<8x128xf32>
    %976 = arith.mulf %384, %975 : vector<8x128xf32>
    %977 = arith.addf %971, %976 : vector<8x128xf32>
    %978 = vector.broadcast %193 : f32 to vector<8x128xf32>
    %979 = arith.mulf %384, %978 : vector<8x128xf32>
    %980 = arith.addf %974, %979 : vector<8x128xf32>
    %981 = vector.broadcast %95 : f32 to vector<8x128xf32>
    %982 = arith.mulf %502, %981 : vector<8x128xf32>
    %983 = arith.addf %977, %982 : vector<8x128xf32>
    %984 = vector.broadcast %194 : f32 to vector<8x128xf32>
    %985 = arith.mulf %502, %984 : vector<8x128xf32>
    %986 = arith.addf %980, %985 : vector<8x128xf32>
    %987 = vector.broadcast %96 : f32 to vector<8x128xf32>
    %988 = arith.mulf %626, %987 : vector<8x128xf32>
    %989 = arith.addf %983, %988 : vector<8x128xf32>
    %990 = vector.broadcast %195 : f32 to vector<8x128xf32>
    %991 = arith.mulf %626, %990 : vector<8x128xf32>
    %992 = arith.addf %986, %991 : vector<8x128xf32>
    %993 = vector.broadcast %97 : f32 to vector<8x128xf32>
    %994 = arith.mulf %756, %993 : vector<8x128xf32>
    %995 = arith.addf %989, %994 : vector<8x128xf32>
    %996 = vector.broadcast %196 : f32 to vector<8x128xf32>
    %997 = arith.mulf %756, %996 : vector<8x128xf32>
    %998 = arith.addf %992, %997 : vector<8x128xf32>
    %999 = vector.broadcast %98 : f32 to vector<8x128xf32>
    %1000 = arith.mulf %892, %999 : vector<8x128xf32>
    %1001 = arith.addf %995, %1000 : vector<8x128xf32>
    %1002 = vector.broadcast %197 : f32 to vector<8x128xf32>
    %1003 = arith.mulf %892, %1002 : vector<8x128xf32>
    %1004 = arith.addf %998, %1003 : vector<8x128xf32>
    %1005 = arith.addf %1001, %1004 : vector<8x128xf32>
    %1006 = arith.subf %1001, %1004 : vector<8x128xf32>
    %1007 = arith.mulf %1001, %1004 : vector<8x128xf32>
    %cst_469 = arith.constant 9.99999974E-5 : f32
    %1008 = vector.broadcast %cst_469 : f32 to vector<8x128xf32>
    %1009 = arith.addf %1004, %1008 : vector<8x128xf32>
    %1010 = arith.divf %1001, %1009 : vector<8x128xf32>
    %1011 = arith.maximumf %1001, %1004 : vector<8x128xf32>
    %1012 = arith.minimumf %1001, %1004 : vector<8x128xf32>
    %1013 = math.absf %1001 : vector<8x128xf32>
    %1014 = vector.broadcast %233 : f32 to vector<8x128xf32>
    %1015 = arith.mulf %1005, %1014 : vector<8x128xf32>
    %1016 = vector.broadcast %234 : f32 to vector<8x128xf32>
    %1017 = arith.mulf %1006, %1016 : vector<8x128xf32>
    %1018 = arith.addf %1015, %1017 : vector<8x128xf32>
    %1019 = vector.broadcast %235 : f32 to vector<8x128xf32>
    %1020 = arith.mulf %1007, %1019 : vector<8x128xf32>
    %1021 = arith.addf %1018, %1020 : vector<8x128xf32>
    %1022 = vector.broadcast %236 : f32 to vector<8x128xf32>
    %1023 = arith.mulf %1010, %1022 : vector<8x128xf32>
    %1024 = arith.addf %1021, %1023 : vector<8x128xf32>
    %1025 = vector.broadcast %237 : f32 to vector<8x128xf32>
    %1026 = arith.mulf %1011, %1025 : vector<8x128xf32>
    %1027 = arith.addf %1024, %1026 : vector<8x128xf32>
    %1028 = vector.broadcast %238 : f32 to vector<8x128xf32>
    %1029 = arith.mulf %1012, %1028 : vector<8x128xf32>
    %1030 = arith.addf %1027, %1029 : vector<8x128xf32>
    %1031 = vector.broadcast %239 : f32 to vector<8x128xf32>
    %1032 = arith.mulf %1013, %1031 : vector<8x128xf32>
    %1033 = arith.addf %1030, %1032 : vector<8x128xf32>
    %1034 = math.tanh %1033 : vector<8x128xf32>
    %cst_470 = arith.constant -1.000000e+02 : f32
    %cst_471 = arith.constant 1.000000e+02 : f32
    %1035 = vector.broadcast %cst_470 : f32 to vector<8x128xf32>
    %1036 = arith.maximumf %1035, %1034 : vector<8x128xf32>
    %1037 = vector.broadcast %cst_471 : f32 to vector<8x128xf32>
    %1038 = arith.minimumf %1037, %1036 : vector<8x128xf32>
    %1039 = arith.index_cast %241 : i32 to index
    %c0_472 = arith.constant 0 : index
    %c0_473 = arith.constant 0 : index
    %1040 = vector.load %arg5[%1039, %c0_472, %c0_473] : memref<1x8x128xf32, #tpu.memory_space<vmem>>, vector<1x8x128xf32>
    %1041 = vector.shape_cast %1040 : vector<1x8x128xf32> to vector<8x128xf32>
    %1042 = vector.shape_cast %1038 : vector<8x128xf32> to vector<1x8x128xf32>
    tpu.vector_store %arg5[%1039, %c0_472, %c0_473], %1042 {strides = array<i32>} : memref<1x8x128xf32, #tpu.memory_space<vmem>>, vector<1x8x128xf32>,
    %c1_i32_474 = arith.constant 1 : i32
    return
  }
  func.func @transform_0(%arg0: i32, %arg1: memref<6x19xf32, #tpu.memory_space<smem>>, %arg2: memref<6x19xf32, #tpu.memory_space<smem>>, %arg3: memref<6x7xf32, #tpu.memory_space<smem>>) -> (i32, i32, i32, i32) {
    %c0_i32 = arith.constant 0 : i32
    %c0_i32_0 = arith.constant 0 : i32
    %c0_i32_1 = arith.constant 0 : i32
    %c0_i32_2 = arith.constant 0 : i32
    return %arg0, %c0_i32, %c0_i32_0, %c0_i32_1 : i32, i32, i32, i32
  }
  func.func @transform_1(%arg0: i32, %arg1: memref<6x19xf32, #tpu.memory_space<smem>>, %arg2: memref<6x19xf32, #tpu.memory_space<smem>>, %arg3: memref<6x7xf32, #tpu.memory_space<smem>>) -> (i32, i32, i32) {
    %c0_i32 = arith.constant 0 : i32
    %c0_i32_0 = arith.constant 0 : i32
    %c0_i32_1 = arith.constant 0 : i32
    return %arg0, %c0_i32, %c0_i32_0 : i32, i32, i32
  }
}

</mosaic_0001>

<bundles_post_ra>
// kernel: tpu_custom_call.1
= control target key start
LH: loop header
LB: loop body
LE: loop exit
PB: predicated region body
PF: predicated region fallthrough
CT: control target
= control target key end

     0   :  { %s1421_s15 = smov [#allocation3]   ;;  %s1422_s18 = smov [#allocation4]   ;;  %s2457_s0 = inlined_call_operand.hbm [shape: f32[6,19], index: 0, kind: input, shape index: {}]   ;;  %s2458_s3 = inlined_call_operand.hbm [shape: f32[1,14,8,128], index: 3, kind: input, shape index: {}]   ;;  %s2459_s4 = inlined_call_operand.hbm [shape: f32[1,8,128], index: 4, kind: output, shape index: {}]   ;;  %s2460_s1 = inlined_call_operand.hbm [shape: f32[6,19], index: 1, kind: input, shape index: {}]   ;;  %s2461_s2 = inlined_call_operand.hbm [shape: f32[6,7], index: 2, kind: input, shape index: {}]  }
   0x1   :  { %2465 = sst [smem:[#allocation31_spill]] %s2459_s4  ;;  %s1423_s21 = smov [#allocation5]  }
   0x2   :  { %10 = dma.hbm_to_smem %s2457_s0, 128, %s1421_s15, [#allocation2] }
   0x3   :  { %12 = dma.hbm_to_smem %s2460_s1, 128, %s1422_s18, [#allocation2] }
   0x4   :  { %14 = dma.hbm_to_smem %s2461_s2, 128, %s1423_s21, [#allocation2] }
   0x5   :  { %1415 = dma.done.wait [#allocation2], 384 }
   0x6   :  { %1416 = vsyncadd [#allocation2], 4294966912 }
   0x7   :  { %16 = sfence }
   0x8   :  { %17 = vsyncpa [#allocation7], 0 }
   0x9   :  { %18 = vsyncpa [#allocation8], 0  ;;  %s1424_s24 = smov [#allocation6]  }
   0xa   :  { %s24_s25 = sshll.u32 %s1424_s24, 4  ;;  %s25_s25 = int_to_ptr.vmem [resolvable:$true] %s24_s25 }
   0xb   :  { %s1383_s26 = scalar_lea.vmem %s25_s25, 1792  ;;  %p1388_p1 = scmp.lt.s32.totalorder %s25_s25, %s25_s25 }
   0xc   :  { %p1384_p0 = scmp.ne.s32.totalorder %s25_s25, %s1383_s26  ;;  %p1389_p2 = scmp.lt.s32.totalorder %s1383_s26, %s1383_s26 }
   0xe   :  { %p1390_p3 = por %p1389_p2, %p1388_p1 }
  0x10   :  { %p1391_p4 = pnand %p1390_p3, %p1384_p0 }
  0x12   :  { %1394 = shalt.err (!%p1391_p4)
}
  0x13   :  { %s1425_s0 = smov 128   ;;  %s1426_s1 = smov 8  }
  0x14   :  { %30 = dma.hbm_to_vmem [thread:$0]  %s2458_s3, 1792, %s25_s25, [#allocation7], %s1425_s0, %s1425_s0, %s1426_s1  }
  0x15   :  { %1417 = dma.done.wait [#allocation7], 1792  }
  0x16   :  { %1418 = vsyncadd [#allocation7], 4294965504  ;;  %s1465_s2 = sld [smem:[#allocation3]]  ;;  %v1533_v0 = vld [vmem:[#allocation6] sm:$0xff]  ;;  %v1535_v1 = vld [vmem:[#allocation6 + $0x8] sm:$0xff] }
  0x17   :  { %s1467_s29 = sld [smem:[#allocation3 + $0x1]]  ;;  %v1547_v6 = vld [vmem:[#allocation6 + $0x10] sm:$0xff]  ;;  %v1560_v12 = vld [vmem:[#allocation6 + $0x18] sm:$0xff]  ;;  %v1574_v19 = vld [vmem:[#allocation6 + $0x20] sm:$0xff] }
  0x18   :  { %s1469_s30 = sld [smem:[#allocation3 + $0x2]]  ;;  %v1590_v28 = vld [vmem:[#allocation6 + $0x28] sm:$0xff]  ;;  %v1607_v38 = vld [vmem:[#allocation6 + $0x30] sm:$0xff]  ;;  %v1625_v50 = vld [vmem:[#allocation6 + $0x38] sm:$0xff] }
  0x19   :  { %s1471_s5 = sld [smem:[#allocation3 + $0x3]]  ;;  %v1644_v63 = vld [vmem:[#allocation6 + $0x40] sm:$0xff] }
  0x1a   :  { %s1473_s6 = sld [smem:[#allocation3 + $0x4]] }
  0x1b   :  { %s1475_s7 = sld [smem:[#allocation3 + $0x5]] }
  0x1c   :  { %s1477_s8 = sld [smem:[#allocation3 + $0x6]]  ;;  %v288_v8 = vstv %s1465_s2 }
  0x1d   :  { %s1479_s9 = sld [smem:[#allocation3 + $0x7]]  ;;  %v292_v9 = vstv %s1467_s29  ;;  %v289_v14 = vmul.f32 %v288_v8, %v1533_v0 }
  0x1e   :  { %s1481_s10 = sld [smem:[#allocation3 + $0x8]]  ;;  %v293_v15 = vmul.f32 %v292_v9, %v1535_v1  ;;  %v298_v16 = vstv %s1469_s30 }
  0x1f   :  { %s1483_s3 = sld [smem:[#allocation3 + $0x9]]  ;;  %v299_v24 = vmul.f32 %v298_v16, %v1547_v6  ;;  %v304_v25 = vstv %s1471_s5  ;;  %v1662_v16 = vld [vmem:[#allocation6 + $0x48] sm:$0xff] }
  0x20   :  { %s1485_s11 = sld [smem:[#allocation3 + $0xa]]  ;;  %v294_v23 = vadd.f32 %v293_v15, %v289_v14  ;;  %v305_v34 = vmul.f32 %v304_v25, %v1560_v12  ;;  %v310_v35 = vstv %s1473_s6 }
  0x21   :  { %s1487_s12 = sld [smem:[#allocation3 + $0xb]]  ;;  %v311_v44 = vmul.f32 %v310_v35, %v1574_v19  ;;  %v316_v47 = vstv %s1475_s7 }
  0x22   :  { %s1489_s13 = sld [smem:[#allocation3 + $0xc]]  ;;  %v300_v33 = vadd.f32 %v299_v24, %v294_v23  ;;  %v317_v58 = vmul.f32 %v316_v47, %v1590_v28  ;;  %v322_v60 = vstv %s1477_s8 }
  0x23   :  { %s1491_s14 = sld [smem:[#allocation3 + $0xd]] }
  0x24   :  { %s1493_s15 = sld [smem:[#allocation3 + $0x80]]  ;;  %v306_v43 = vadd.f32 %v305_v34, %v300_v33 }
  0x25   :  { %s1495_s16 = sld [smem:[#allocation3 + $0x81]] }
  0x26   :  { %2466 = sst [smem:[#allocation13_spill]] %s1485_s11  ;;  %v312_v57 = vadd.f32 %v311_v44, %v306_v43 }
  0x27   :  { %2467 = sst [smem:[#allocation14_spill]] %s1487_s12 }
  0x28   :  { %2468 = sst [smem:[#allocation15_spill]] %s1489_s13  ;;  %v318_v9 = vadd.f32 %v317_v58, %v312_v57 }
  0x29   :  { %2469 = sst [smem:[#allocation16_spill]] %s1491_s14 }
  0x2a   :  { %s1497_s17 = sld [smem:[#allocation3 + $0x82]]  ;;  %v400_v21 = vstv %s1493_s15 }
  0x2b   :  { %s1499_s18 = sld [smem:[#allocation3 + $0x83]]  ;;  %v404_v22 = vstv %s1495_s16  ;;  %v401_v30 = vmul.f32 %v400_v21, %v1533_v0 }
  0x2c   :  { %s1501_s19 = sld [smem:[#allocation3 + $0x84]]  ;;  %v405_v31 = vmul.f32 %v404_v22, %v1535_v1 }
  0x2d   :  { %s1503_s20 = sld [smem:[#allocation3 + $0x85]] }
  0x2e   :  { %s1505_s21 = sld [smem:[#allocation3 + $0x86]]  ;;  %v406_v40 = vadd.f32 %v405_v31, %v401_v30  ;;  %v1680_v31 = vld [vmem:[#allocation6 + $0x50] sm:$0xff] }
  0x2f   :  { %s1507_s22 = sld [smem:[#allocation3 + $0x87]] }
  0x30   :  { %s1509_s23 = sld [smem:[#allocation3 + $0x88]]  ;;  %v410_v32 = vstv %s1497_s17 }
  0x31   :  { %s1511_s24 = sld [smem:[#allocation3 + $0x89]]  ;;  %v411_v41 = vmul.f32 %v410_v32, %v1547_v6  ;;  %v416_v42 = vstv %s1499_s18 }
  0x32   :  { %s1513_s25 = sld [smem:[#allocation3 + $0x8a]]  ;;  %v417_v53 = vmul.f32 %v416_v42, %v1560_v12  ;;  %v422_v56 = vstv %s1501_s19  ;;  %v340_v42 = vstv %s1483_s3 }
  0x33   :  { %s1515_s26 = sld [smem:[#allocation3 + $0x8b]]  ;;  %v412_v52 = vadd.f32 %v411_v41, %v406_v40  ;;  %v428_v8 = vstv %s1503_s20 }
  0x34   :  { %s1517_s0 = sld [smem:[#allocation3 + $0x8c]]  ;;  %v434_v23 = vstv %s1505_s21 }
  0x35   :  { %s1519_s1 = sld [smem:[#allocation3 + $0x8d]]  ;;  %v435_v34 = vmul.f32 %v434_v23, %v1607_v38 }
  0x36   :  { %s133_s27 = sld [smem:[#allocation4]] }
  0x37   :  { %2470 = sst [smem:[#allocation17_spill]] %s1511_s24 }
  0x38   :  { %2471 = sst [smem:[#allocation18_spill]] %s1513_s25 }
  0x39   :  { %2472 = sst [smem:[#allocation19_spill]] %s1515_s26 }
  0x3a   :  { %2473 = sst [smem:[#allocation20_spill]] %s1517_s0 }
  0x3b   :  { %2474 = sst [smem:[#allocation21_spill]] %s1519_s1 }
  0x3c   :  { %s1166_s28 = sld [smem:[#allocation4 + $0x1]]  ;;  %v290_v2 = vstv %s133_s27 }
  0x3d   :  { %s1521_s4 = sld [smem:[#allocation3 + $0x8e]]  ;;  %v291_v4 = vmul.f32 %v290_v2, %v1533_v0 }
  0x3e   :  { %s1523_s14 = sld [smem:[#allocation3 + $0x100]] }
  0x3f   :  { %s1525_s13 = sld [smem:[#allocation3 + $0x101]] }
  0x40   :  { %s1167_s12 = sld [smem:[#allocation4 + $0x2]] }
  0x41   :  { %s1527_s11 = sld [smem:[#allocation3 + $0x102]] }
  0x42   :  { %s1529_s24 = sld [smem:[#allocation3 + $0x103]]  ;;  %v295_v3 = vstv %s1166_s28 }
  0x43   :  { %2475 = sst [smem:[#allocation22_spill]] %s1521_s4  ;;  %v296_v5 = vmul.f32 %v295_v3, %v1535_v1  ;;  %v418_v3 = vadd.f32 %v417_v53, %v412_v52  ;;  %v446_v52 = vstv %s1509_s23 }
  0x44   :  { %s1531_s25 = sld [smem:[#allocation3 + $0x104]] }
  0x45   :  { %s1168_s26 = sld [smem:[#allocation4 + $0x3]]  ;;  %v297_v10 = vadd.f32 %v296_v5, %v291_v4  ;;  %v423_v4 = vmul.f32 %v422_v56, %v1574_v19 }
  0x46   :  { %s1537_s4 = sld [smem:[#allocation3 + $0x105]]  ;;  %v301_v7 = vstv %s1167_s12 }
  0x47   :  { %s1539_s1 = sld [smem:[#allocation3 + $0x106]]  ;;  %v302_v11 = vmul.f32 %v301_v7, %v1547_v6 }
  0x48   :  { %2476 = sst [smem:[#allocation23_spill]] %s1529_s24 }
  0x49   :  { %s1541_s0 = sld [smem:[#allocation3 + $0x107]]  ;;  %v303_v17 = vadd.f32 %v302_v11, %v297_v10  ;;  %v323_v10 = vmul.f32 %v322_v60, %v1607_v38 }
  0x4a   :  { %2477 = sst [smem:[#allocation24_spill]] %s1531_s25 }
  0x4b   :  { %s1545_s25 = sld [smem:[#allocation4 + $0x4]]  ;;  %v307_v13 = vstv %s1168_s26  ;;  %v324_v24 = vadd.f32 %v323_v10, %v318_v9 }
  0x4c   :  { %s1549_s24 = sld [smem:[#allocation3 + $0x108]]  ;;  %v308_v18 = vmul.f32 %v307_v13, %v1560_v12  ;;  %v328_v13 = vstv %s1479_s9 }
  0x4d   :  { %s1551_s27 = sld [smem:[#allocation3 + $0x109]]  ;;  %v329_v25 = vmul.f32 %v328_v13, %v1625_v50  ;;  %v1734_v13 = vld [vmem:[#allocation6 + $0x68] sm:$0xff] }
  0x4e   :  { %s1553_s28 = sld [smem:[#allocation3 + $0x10a]]  ;;  %v309_v26 = vadd.f32 %v308_v18, %v303_v17  ;;  %v424_v18 = vadd.f32 %v423_v4, %v418_v3 }
  0x4f   :  { %2478 = sst [smem:[#allocation25_spill]] %s1541_s0 }
  0x50   :  { %s1558_s0 = sld [smem:[#allocation4 + $0x5]] }
  0x51   :  { %s1562_s12 = sld [smem:[#allocation3 + $0x10b]]  ;;  %v313_v20 = vstv %s1545_s25 }
  0x52   :  { %2479 = sst [smem:[#allocation26_spill]] %s1549_s24  ;;  %v314_v27 = vmul.f32 %v313_v20, %v1574_v19  ;;  %v429_v20 = vmul.f32 %v428_v8, %v1590_v28 }
  0x53   :  { %s1564_s24 = sld [smem:[#allocation3 + $0x10c]] }
  0x54   :  { %s1568_s2 = sld [smem:[#allocation3 + $0x10d]]  ;;  %v315_v36 = vadd.f32 %v314_v27, %v309_v26  ;;  %v334_v27 = vstv %s1481_s10  ;;  %v430_v33 = vadd.f32 %v429_v20, %v424_v18 }
  0x55   :  { %s1572_s29 = sld [smem:[#allocation4 + $0x6]]  ;;  %v335_v40 = vmul.f32 %v334_v27, %v1644_v63  ;;  %v518_v27 = vstv %s1523_s14 }
  0x56   :  { %s1577_s26 = sld [smem:[#allocation4 + $0x80]]  ;;  %v319_v29 = vstv %s1558_s0  ;;  %v436_v47 = vadd.f32 %v435_v34, %v430_v33 }
  0x57   :  { %s1584_s30 = sld [smem:[#allocation3 + $0x10e]]  ;;  %v320_v37 = vmul.f32 %v319_v29, %v1590_v28 }
  0x58   :  { %s1595_s15 = sld [smem:[#allocation3 + $0x10f]] }
  0x59   :  { %2480 = sst [smem:[#allocation27_spill]] %s1564_s24  ;;  %v321_v48 = vadd.f32 %v320_v37, %v315_v36  ;;  %v440_v37 = vstv %s1507_s22 }
  0x5a   :  { %2481 = sst [smem:[#allocation28_spill]] %s1568_s2 }
  0x5b   :  { %s1581_s24 = sld [smem:[#allocation4 + $0x81]]  ;;  %v325_v39 = vstv %s1572_s29 }
  0x5c   :  { %s1588_s2 = sld [smem:[#allocation4 + $0x7]]  ;;  %v402_v45 = vstv %s1577_s26  ;;  %v326_v49 = vmul.f32 %v325_v39, %v1607_v38  ;;  %v330_v39 = vadd.f32 %v329_v25, %v324_v24 }
  0x5d   :  { %s1598_s16 = sld [smem:[#allocation4 + $0x82]]  ;;  %v403_v54 = vmul.f32 %v402_v45, %v1533_v0  ;;  %v1698_v45 = vld [vmem:[#allocation6 + $0x58] sm:$0xff] }
  0x5e   :  { %2482 = sst [smem:[#allocation29_spill]] %s1595_s15  ;;  %v327_v61 = vadd.f32 %v326_v49, %v321_v48  ;;  %v441_v48 = vmul.f32 %v440_v37, %v1625_v50  ;;  %v336_v53 = vadd.f32 %v335_v40, %v330_v39  ;;  %v519_v40 = vmul.f32 %v518_v27, %v1533_v0 }
  0x5f   :  { %s1601_s5 = sld [smem:[#allocation3 + $0x180]] }
  0x60   :  { %s1605_s25 = sld [smem:[#allocation4 + $0x8]] }
  0x61   :  { %s1611_s17 = sld [smem:[#allocation3 + $0x181]]  ;;  %v407_v46 = vstv %s1581_s24 }
  0x62   :  { %s1614_s0 = sld [smem:[#allocation4 + $0x83]]  ;;  %v331_v51 = vstv %s1588_s2  ;;  %v408_v55 = vmul.f32 %v407_v46, %v1535_v1 }
  0x63   :  { %s1619_s6 = sld [smem:[#allocation3 + $0x182]]  ;;  %v413_v59 = vstv %s1598_s16  ;;  %v332_v62 = vmul.f32 %v331_v51, %v1625_v50 }
  0x64   :  { %s1623_s29 = sld [smem:[#allocation4 + $0x9]]  ;;  %v409_v5 = vadd.f32 %v408_v55, %v403_v54  ;;  %v414_v7 = vmul.f32 %v413_v59, %v1547_v6  ;;  %v341_v54 = vmul.f32 %v340_v42, %v1662_v16  ;;  %v1716_v59 = vld [vmem:[#allocation6 + $0x60] sm:$0xff] }
  0x65   :  { %s1629_s18 = sld [smem:[#allocation3 + $0x183]]  ;;  %v333_v14 = vadd.f32 %v332_v62, %v327_v61  ;;  %v442_v61 = vadd.f32 %v441_v48, %v436_v47  ;;  %v447_v62 = vmul.f32 %v446_v52, %v1644_v63 }
  0x66   :  { %s1634_s7 = sld [smem:[#allocation4 + $0x84]]  ;;  %v337_v2 = vstv %s1605_s25  ;;  %v415_v21 = vadd.f32 %v414_v7, %v409_v5  ;;  %v342_v5 = vadd.f32 %v341_v54, %v336_v53 }
  0x67   :  { %s1638_s24 = sld [smem:[#allocation3 + $0x184]]  ;;  %v338_v15 = vmul.f32 %v337_v2, %v1644_v63 }
  0x68   :  { %s1642_s2 = sld [smem:[#allocation4 + $0xa]]  ;;  %v419_v11 = vstv %s1614_s0 }
  0x69   :  { %s1648_s19 = sld [smem:[#allocation3 + $0x185]]  ;;  %v420_v22 = vmul.f32 %v419_v11, %v1560_v12  ;;  %v339_v29 = vadd.f32 %v338_v15, %v333_v14  ;;  %v448_v15 = vadd.f32 %v447_v62, %v442_v61 }
  0x6a   :  { %s1652_s8 = sld [smem:[#allocation4 + $0x85]]  ;;  %v343_v17 = vstv %s1623_s29 }
  0x6b   :  { %s1656_s26 = sld [smem:[#allocation3 + $0x186]]  ;;  %v344_v30 = vmul.f32 %v343_v17, %v1662_v16  ;;  %v421_v35 = vadd.f32 %v420_v22, %v415_v21 }
  0x6c   :  { %s1660_s16 = sld [smem:[#allocation4 + $0xb]]  ;;  %v425_v26 = vstv %s1634_s7 }
  0x6d   :  { %s1666_s20 = sld [smem:[#allocation3 + $0x187]]  ;;  %v426_v36 = vmul.f32 %v425_v26, %v1574_v19  ;;  %v345_v43 = vadd.f32 %v344_v30, %v339_v29  ;;  %v522_v29 = vstv %s1525_s13 }
  0x6e   :  { %s1670_s9 = sld [smem:[#allocation4 + $0x86]]  ;;  %v349_v32 = vstv %s1642_s2 }
  0x6f   :  { %s1674_s25 = sld [smem:[#allocation3 + $0x188]]  ;;  %v350_v44 = vmul.f32 %v349_v32, %v1680_v31  ;;  %v427_v49 = vadd.f32 %v426_v36, %v421_v35 }
  0x70   :  { %s1678_s0 = sld [smem:[#allocation4 + $0xc]]  ;;  %v431_v41 = vstv %s1652_s8 }
  0x71   :  { %s1684_s21 = sld [smem:[#allocation3 + $0x189]]  ;;  %v432_v51 = vmul.f32 %v431_v41, %v1590_v28  ;;  %v351_v57 = vadd.f32 %v350_v44, %v345_v43  ;;  %v523_v41 = vmul.f32 %v522_v29, %v1535_v1 }
  0x72   :  { %s1688_s10 = sld [smem:[#allocation4 + $0x87]]  ;;  %v355_v46 = vstv %s1660_s16 }
  0x73   :  { %s1692_s29 = sld [smem:[#allocation3 + $0x18a]]  ;;  %v356_v58 = vmul.f32 %v355_v46, %v1698_v45  ;;  %v433_v2 = vadd.f32 %v432_v51, %v427_v49  ;;  %v528_v46 = vstv %s1527_s11 }
  0x74   :  { %s2484_s7 = sld [smem:[#allocation13_spill]]  ;;  %v437_v55 = vstv %s1670_s9 }
  0x75   :  { %s1696_s2 = sld [smem:[#allocation4 + $0xd]]  ;;  %v438_v3 = vmul.f32 %v437_v55, %v1607_v38  ;;  %v357_v10 = vadd.f32 %v356_v58, %v351_v57  ;;  %v524_v57 = vadd.f32 %v523_v41, %v519_v40 }
  0x76   :  { %s1702_s22 = sld [smem:[#allocation3 + $0x18b]]  ;;  %v361_v60 = vstv %s1678_s0 }
  0x77   :  { %s1706_s3 = sld [smem:[#allocation4 + $0x88]]  ;;  %v362_v11 = vmul.f32 %v361_v60, %v1716_v59  ;;  %v439_v18 = vadd.f32 %v438_v3, %v433_v2  ;;  %v529_v60 = vmul.f32 %v528_v46, %v1547_v6 }
  0x78   :  { %s2486_s8 = sld [smem:[#allocation17_spill]]  ;;  %v443_v8 = vstv %s1688_s10 }
  0x79   :  { %2483 = sst [smem:[#allocation30_spill]] %s1692_s29  ;;  %v444_v20 = vmul.f32 %v443_v8, %v1625_v50  ;;  %v363_v25 = vadd.f32 %v362_v11, %v357_v10 }
  0x7a   :  { %s1710_s29 = sld [smem:[#allocation3 + $0x18c]]  ;;  %v346_v56 = vstv %s2484_s7 }
  0x7b   :  { %s2488_s16 = sld [smem:[#allocation14_spill]]  ;;  %v347_v7 = vmul.f32 %v346_v56, %v1680_v31  ;;  %v367_v14 = vstv %s1696_s2  ;;  %v445_v34 = vadd.f32 %v444_v20, %v439_v18 }
  0x7c   :  { %2485 = sst [smem:[#allocation13_spill]] %s1702_s22  ;;  %v368_v26 = vmul.f32 %v367_v14, %v1734_v13 }
  0x7d   :  { %s1714_s22 = sld [smem:[#allocation3 + $0x18d]]  ;;  %v348_v22 = vadd.f32 %v347_v7, %v342_v5  ;;  %v449_v24 = vstv %s1706_s3 }
  0x7e   :  { %s1720_s23 = sld [smem:[#allocation4 + $0x89]]  ;;  %v452_v4 = vstv %s2486_s8  ;;  %v450_v35 = vmul.f32 %v449_v24, %v1644_v63  ;;  %v1766_v42 = vadd.f32 %v368_v26, %v363_v25 }
  0x7f   :  { %s1724_s9 = sld [smem:[#allocation4 + $0x100]]  ;;  %v453_v17 = vmul.f32 %v452_v4, %v1662_v16 }
  0x80   :  { %2487 = sst [smem:[#allocation17_spill]] %s1710_s29  ;;  %v451_v52 = vadd.f32 %v450_v35, %v445_v34  ;;  %v373_v61 = vadd.f32 0.0001, %v1766_v42 }
  0x81   :  { %s2490_s7 = sld [smem:[#allocation18_spill]]  ;;  %v352_v9 = vstv %s2488_s16  ;;  %v454_v30 = vadd.f32 %v453_v17, %v448_v15  ;;  %v530_v15 = vadd.f32 %v529_v60, %v524_v57  ;;  %v552_v57 = vstv %s1539_s1 }
  0x82   :  { %s1732_s0 = sld [smem:[#allocation3 + $0x18e]]  ;;  %v353_v23 = vmul.f32 %v352_v9, %v1698_v45  ;;  %1313 = vrcp.f32 %v373_v61 }
  0x83   :  { %2489 = sst [smem:[#allocation14_spill]] %s1714_s22 }
  0x84   :  { %s1728_s22 = sld [smem:[#allocation4 + $0x101]]  ;;  %v354_v37 = vadd.f32 %v353_v23, %v348_v22  ;;  %v455_v39 = vstv %s1720_s23 }
  0x85   :  { %s1738_s8 = sld [smem:[#allocation4 + $0x8a]]  ;;  %v520_v43 = vstv %s1724_s9  ;;  %v456_v53 = vmul.f32 %v455_v39, %v1662_v16 }
  0x86   :  { %s2492_s10 = sld [smem:[#allocation15_spill]]  ;;  %v521_v56 = vmul.f32 %v520_v43, %v1533_v0 }
  0x87   :  { %v458_v21 = vstv %s2490_s7  ;;  %s1742_s16 = sld [smem:[#allocation3 + $0x18f]]  ;;  %v457_v8 = vadd.f32 %v456_v53, %v451_v52 }
  0x88   :  { %2491 = sst [smem:[#allocation18_spill]] %s1732_s0  ;;  %v459_v32 = vmul.f32 %v458_v21, %v1680_v31 }
  0x89   :  { %s2494_s29 = sld [smem:[#allocation19_spill]] }
  0x8a   :  { %s1746_s0 = sld [smem:[#allocation4 + $0x102]]  ;;  %v525_v44 = vstv %s1728_s22  ;;  %v460_v49 = vadd.f32 %v459_v32, %v454_v30 }
  0x8b   :  { %s1751_s2 = sld [smem:[#allocation3 + $0x200]]  ;;  %v461_v54 = vstv %s1738_s8  ;;  %v526_v58 = vmul.f32 %v525_v44, %v1535_v1 }
  0x8c   :  { %s1754_s7 = sld [smem:[#allocation4 + $0x8b]]  ;;  %v358_v33 = vstv %s2492_s10  ;;  %v462_v9 = vmul.f32 %v461_v54, %v1680_v31 }
  0x8d   :  { %2493 = sst [smem:[#allocation15_spill]] %s1742_s16  ;;  %v359_v47 = vmul.f32 %v358_v33, %v1716_v59  ;;  %v527_v14 = vadd.f32 %v526_v58, %v521_v56 }
  0x8e   :  { %s2495_s3 = sld [smem:[#allocation16_spill]]  ;;  %v463_v26 = vadd.f32 %v462_v9, %v457_v8  ;;  %v553_v9 = vmul.f32 %v552_v57, %v1607_v38 }
  0x8f   :  { %v464_v36 = vstv %s2494_s29  ;;  %s1759_s16 = sld [smem:[#allocation4 + $0x8c]]  ;;  %v360_v3 = vadd.f32 %v359_v47, %v354_v37  ;;  %v546_v37 = vstv %s1537_s4  ;;  %v642_v47 = vstv %s1601_s5 }
  0x90   :  { %s2496_s13 = sld [smem:[#allocation20_spill]]  ;;  %v465_v51 = vmul.f32 %v464_v36, %v1698_v45  ;;  %v531_v62 = vstv %s1746_s0  ;;  %v547_v52 = vmul.f32 %v546_v37, %v1590_v28  ;;  %v643_v61 = vmul.f32 %v642_v47, %v1533_v0 }
  0x91   :  { %s1764_s14 = sld [smem:[#allocation4 + $0x103]]  ;;  %v532_v17 = vmul.f32 %v531_v62, %v1547_v6 }
  0x92   :  { %s1771_s10 = sld [smem:[#allocation4 + $0x8d]]  ;;  %v466_v5 = vadd.f32 %v465_v51, %v460_v49  ;;  %v467_v10 = vstv %s1754_s7 }
  0x93   :  { %s2497_s29 = sld [smem:[#allocation23_spill]]  ;;  %v468_v23 = vmul.f32 %v467_v10, %v1698_v45  ;;  %v533_v32 = vadd.f32 %v532_v17, %v527_v14 }
  0x94   :  { %v364_v48 = vstv %s2495_s3  ;;  %s1776_s23 = sld [smem:[#allocation4 + $0x104]] }
  0x95   :  { %s1781_s9 = sld [smem:[#allocation3 + $0x201]]  ;;  %v365_v4 = vmul.f32 %v364_v48, %v1734_v13  ;;  %v473_v27 = vstv %s1759_s16  ;;  %v469_v44 = vadd.f32 %v468_v23, %v463_v26  ;;  %v646_v48 = vstv %s1611_s17 }
  0x96   :  { %v470_v55 = vstv %s2496_s13  ;;  %s2498_s11 = sld [smem:[#allocation21_spill]]  ;;  %v474_v39 = vmul.f32 %v473_v27, %v1716_v59  ;;  %v647_v62 = vmul.f32 %v646_v48, %v1535_v1  ;;  %v658_v27 = vstv %s1629_s18 }
  0x97   :  { %s1786_s22 = sld [smem:[#allocation3 + $0x202]]  ;;  %v471_v7 = vmul.f32 %v470_v55, %v1716_v59  ;;  %v537_v20 = vstv %s1764_s14  ;;  %v1810_v22 = vadd.f32 %v365_v4, %v360_v3  ;;  %v659_v47 = vmul.f32 %v658_v27, %v1560_v12 }
  0x98   :  { %s1791_s3 = sld [smem:[#allocation3 + $0x203]]  ;;  %v479_v29 = vstv %s1771_s10  ;;  %v538_v34 = vmul.f32 %v537_v20, %v1560_v12  ;;  %v648_v23 = vadd.f32 %v647_v62, %v643_v61 }
  0x99   :  { %v534_v2 = vstv %s2497_s29  ;;  %s2499_s8 = sld [smem:[#allocation24_spill]]  ;;  %v472_v24 = vadd.f32 %v471_v7, %v466_v5  ;;  %v378_v36 = vand.u32 2147483647, %v1810_v22  ;;  %v480_v41 = vmul.f32 %v479_v29, %v1734_v13 }
  0x9a   :  { %s1795_s13 = sld [smem:[#allocation3 + $0x204]]  ;;  %v535_v18 = vmul.f32 %v534_v2, %v1560_v12  ;;  %v543_v30 = vstv %s1776_s23  ;;  %v539_v49 = vadd.f32 %v538_v34, %v533_v32  ;;  %v370_v54 = vadd.f32 %v1766_v42, %v1810_v22 }
  0x9b   :  { %s1800_s15 = sld [smem:[#allocation4 + $0x105]]  ;;  %v544_v46 = vmul.f32 %v543_v30, %v1574_v19  ;;  %v371_v55 = vsub.f32 %v1810_v22, %v1766_v42  ;;  %v372_v58 = vmul.f32 %v1766_v42, %v1810_v22  ;;  %v475_v2 = vadd.f32 %v474_v39, %v469_v44 }
  0x9c   :  { %v476_v11 = vstv %s2498_s11  ;;  %s1804_s0 = sld [smem:[#allocation4 + $0x8e]]  ;;  %v536_v33 = vadd.f32 %v535_v18, %v530_v15  ;;  %v652_v5 = vstv %s1619_s6  ;;  %v377_v14 = vmin.f32 %v1810_v22, %v1766_v42  ;;  %v1314_v18 = vpop.eup %1313 }
  0x9d   :  { %s1808_s29 = sld [smem:[#allocation4 + $0x106]]  ;;  %v477_v25 = vmul.f32 %v476_v11, %v1734_v13  ;;  %v545_v7 = vadd.f32 %v544_v46, %v539_v49  ;;  %v376_v11 = vmax.f32 %v1810_v22, %v1766_v42  ;;  %v375_v34 = vmul.f32 %v1314_v18, %v1810_v22 }
  0x9e   :  { %s1814_s7 = sld [smem:[#allocation3 + $0x205]] }
  0x9f   :  { %v540_v21 = vstv %s2499_s8  ;;  %s2501_s11 = sld [smem:[#allocation22_spill]]  ;;  %v1830_v40 = vadd.f32 %v477_v25, %v472_v24  ;;  %v653_v24 = vmul.f32 %v652_v5, %v1547_v6  ;;  %v1882_v25 = vadd.f32 %v480_v41, %v475_v2 }
  0xa0   :  { %2500 = sst [smem:[#allocation19_spill]] %s1795_s13  ;;  %v541_v35 = vmul.f32 %v540_v21, %v1574_v19  ;;  %v570_v21 = vstv %s1551_s27 }
  0xa1   :  { %s1819_s13 = sld [smem:[#allocation4 + $0x107]]  ;;  %v549_v53 = vstv %s1800_s15  ;;  %v1899_v39 = vmul.f32 %v570_v21, %v1662_v16  ;;  %v654_v46 = vadd.f32 %v653_v24, %v648_v23 }
  0xa2   :  { %s1823_s14 = sld [smem:[#allocation3 + $0x206]]  ;;  %v542_v51 = vadd.f32 %v541_v35, %v536_v33  ;;  %v485_v56 = vstv %s1804_s0  ;;  %v550_v3 = vmul.f32 %v549_v53, %v1590_v28 }
  0xa3   :  { %s1827_s8 = sld [smem:[#allocation4 + $0x108]]  ;;  %v555_v60 = vstv %s1808_s29  ;;  %v660_v5 = vadd.f32 %v659_v47, %v654_v46 }
  0xa4   :  { %s1834_s16 = sld [smem:[#allocation4 + $0x109]]  ;;  %v548_v8 = vadd.f32 %v547_v52, %v542_v51  ;;  %v556_v15 = vmul.f32 %v555_v60, %v1607_v38  ;;  %v551_v29 = vadd.f32 %v550_v3, %v545_v7  ;;  %v664_v52 = vstv %s1638_s24 }
  0xa5   :  { %v482_v43 = vstv %s2501_s11  ;;  %s1839_s4 = sld [smem:[#allocation4 + $0x10a]]  ;;  %v576_v60 = vstv %s1553_s28  ;;  %v665_v7 = vmul.f32 %v664_v52, %v1574_v19 }
  0xa6   :  { %s2502_s10 = sld [smem:[#allocation25_spill]]  ;;  %v554_v30 = vadd.f32 %v553_v9, %v548_v8  ;;  %v557_v57 = vadd.f32 %v556_v15, %v551_v29  ;;  %v1932_v18 = vmul.f32 %v576_v60, %v1680_v31 }
  0xa7   :  { %s1843_s23 = sld [smem:[#allocation4 + $0x10b]]  ;;  %v561_v10 = vstv %s1819_s13 }
  0xa8   :  { %s1851_s5 = sld [smem:[#allocation4 + $0x200]]  ;;  %v562_v26 = vmul.f32 %v561_v10, %v1625_v50  ;;  %v670_v10 = vstv %s1648_s19 }
  0xa9   :  { %s2503_s15 = sld [smem:[#allocation26_spill]]  ;;  %v567_v20 = vstv %s1827_s8 }
  0xaa   :  { %s1858_s17 = sld [smem:[#allocation5]]  ;;  %v573_v33 = vstv %s1834_s16  ;;  %v1896_v37 = vmul.f32 %v567_v20, %v1644_v63 }
  0xab   :  { %s1863_s1 = sld [smem:[#allocation5 + $0x1]]  ;;  %v1909_v51 = vmul.f32 %v573_v33, %v1662_v16 }
  0xac   :  { %v558_v4 = vstv %s2502_s10  ;;  %s1867_s29 = sld [smem:[#allocation5 + $0x2]] }
  0xad   :  { %s1875_s6 = sld [smem:[#allocation5 + $0x3]]  ;;  %v559_v42 = vmul.f32 %v558_v4, %v1625_v50  ;;  %v582_v4 = vstv %s1562_s12  ;;  %v585_v24 = vstv %s1843_s23 }
  0xae   :  { %s1880_s13 = sld [smem:[#allocation5 + $0x4]]  ;;  %v1940_v23 = vmul.f32 %v582_v4, %v1698_v45  ;;  %v774_v27 = vstv %s1851_s5 }
  0xaf   :  { %v564_v17 = vstv %s2503_s15  ;;  %s1887_s10 = sld [smem:[#allocation5 + $0x5]]  ;;  %v560_v9 = vadd.f32 %v559_v42, %v554_v30  ;;  %v666_v42 = vadd.f32 %v665_v7, %v660_v5  ;;  %v775_v22 = vmul.f32 %v774_v27, %v1533_v0 }
  0xb0   :  { %v565_v32 = vmul.f32 %v564_v17, %v1644_v63  ;;  %s1891_s27 = sld [smem:[#allocation5 + $0x6]]  ;;  %v379_v35 = vstv %s1858_s17  ;;  %v563_v17 = vadd.f32 %v562_v26, %v557_v57  ;;  %v671_v26 = vmul.f32 %v670_v10, %v1590_v28 }
  0xb1   :  { %s1901_s18 = sld [smem:[#allocation4 + $0x201]]  ;;  %v380_v41 = vmul.f32 %v379_v35, %v370_v54  ;;  %v381_v44 = vstv %s1863_s1 }
  0xb2   :  { %s1905_s8 = sld [smem:[#allocation4 + $0x180]]  ;;  %v382_v48 = vmul.f32 %v381_v44, %v371_v55  ;;  %v384_v49 = vstv %s1867_s29  ;;  %v579_v55 = vstv %s1839_s4  ;;  %v566_v35 = vadd.f32 %v565_v32, %v560_v9 }
  0xb3   :  { %s1912_s16 = sld [smem:[#allocation4 + $0x181]]  ;;  %v385_v53 = vmul.f32 %v384_v49, %v372_v58  ;;  %v387_v54 = vstv %s1875_s6  ;;  %v1935_v20 = vmul.f32 %v579_v55, %v1680_v31  ;;  %v569_v32 = vadd.f32 %v1896_v37, %v563_v17 }
  0xb4   :  { %s1916_s15 = sld [smem:[#allocation4 + $0x10c]]  ;;  %v383_v61 = vadd.f32 %v382_v48, %v380_v41  ;;  %v388_v62 = vmul.f32 %v387_v54, %v375_v34  ;;  %v390_v2 = vstv %s1880_s13  ;;  %v676_v34 = vstv %s1656_s26 }
  0xb5   :  { %s1920_s17 = sld [smem:[#allocation4 + $0x202]]  ;;  %v393_v3 = vstv %s1887_s10  ;;  %v391_v8 = vmul.f32 %v390_v2, %v376_v11  ;;  %v1957_v41 = vmul.f32 %v585_v24, %v1698_v45  ;;  %v672_v49 = vadd.f32 %v671_v26, %v666_v42 }
  0xb6   :  { %s1925_s24 = sld [smem:[#allocation3 + $0x207]]  ;;  %v386_v58 = vadd.f32 %v385_v53, %v383_v61  ;;  %v396_v15 = vstv %s1891_s27  ;;  %v394_v11 = vmul.f32 %v393_v3, %v377_v14  ;;  %v677_v52 = vmul.f32 %v676_v34, %v1607_v38 }
  0xb7   :  { %s1928_s28 = sld [smem:[#allocation4 + $0x10d]]  ;;  %v779_v29 = vstv %s1901_s18  ;;  %v397_v14 = vmul.f32 %v396_v15, %v378_v36  ;;  %v682_v61 = vstv %s1666_s20  ;;  %v572_v7 = vadd.f32 %v1899_v39, %v566_v35 }
  0xb8   :  { %s2504_s4 = sld [smem:[#allocation27_spill]]  ;;  %v389_v21 = vadd.f32 %v388_v62, %v386_v58  ;;  %v644_v44 = vstv %s1905_s8  ;;  %v780_v36 = vmul.f32 %v779_v29, %v1535_v1  ;;  %v678_v58 = vadd.f32 %v677_v52, %v672_v49 }
  0xb9   :  { %s1937_s12 = sld [smem:[#allocation4 + $0x182]]  ;;  %v649_v46 = vstv %s1912_s16  ;;  %v645_v57 = vmul.f32 %v644_v44, %v1533_v0  ;;  %v575_v10 = vadd.f32 %v1909_v51, %v569_v32  ;;  %v772_v24 = vstv %s1751_s2 }
  0xba   :  { %s1943_s19 = sld [smem:[#allocation4 + $0x203]]  ;;  %v392_v30 = vadd.f32 %v391_v8, %v389_v21  ;;  %v591_v48 = vstv %s1916_s15  ;;  %v650_v60 = vmul.f32 %v649_v46, %v1535_v1  ;;  %v781_v4 = vadd.f32 %v780_v36, %v775_v22 }
  0xbb   :  { %s1948_s1 = sld [smem:[#allocation3 + $0x208]]  ;;  %v785_v53 = vstv %s1920_s17  ;;  %v1982_v37 = vmul.f32 %v591_v48, %v1716_v59  ;;  %v683_v8 = vmul.f32 %v682_v61, %v1625_v50  ;;  %v688_v21 = vstv %s1674_s25 }
  0xbc   :  { %s1954_s29 = sld [smem:[#allocation4 + $0x183]]  ;;  %v395_v47 = vadd.f32 %v394_v11, %v392_v30  ;;  %v786_v5 = vmul.f32 %v785_v53, %v1547_v6  ;;  %v651_v17 = vadd.f32 %v650_v60, %v645_v57  ;;  %v776_v42 = vstv %s1781_s9 }
  0xbd   :  { %s1961_s23 = sld [smem:[#allocation3 + $0x209]]  ;;  %v597_v55 = vstv %s1928_s28  ;;  %v773_v51 = vmul.f32 %v772_v24, %v1533_v0  ;;  %v777_v26 = vmul.f32 %v776_v42, %v1535_v1  ;;  %v684_v30 = vadd.f32 %v683_v8, %v678_v58 }
  0xbe   :  { %v588_v33 = vstv %s2504_s4  ;;  %s2505_s5 = sld [smem:[#allocation28_spill]]  ;;  %v398_v54 = vadd.f32 %v397_v14, %v395_v47  ;;  %v787_v27 = vadd.f32 %v786_v5, %v781_v4  ;;  %v689_v14 = vmul.f32 %v688_v21, %v1644_v63 }
  0xbf   :  { %s1966_s26 = sld [smem:[#allocation4 + $0x204]]  ;;  %v1979_v62 = vmul.f32 %v588_v33, %v1716_v59  ;;  %v655_v3 = vstv %s1937_s12  ;;  %v782_v33 = vstv %s1786_s22  ;;  %v578_v35 = vadd.f32 %v1932_v18, %v572_v7 }
  0xc0   :  { %s1971_s6 = sld [smem:[#allocation3 + $0x20a]]  ;;  %1315 = vtanh.f32 %v398_v54  ;;  %v791_v9 = vstv %s1943_s19  ;;  %v656_v11 = vmul.f32 %v655_v3, %v1547_v6  ;;  %v2022_v0 = vmul.f32 %v597_v55, %v1734_v13 }
  0xc1   :  { %s1976_s13 = sld [smem:[#allocation3 + $0x20b]]  ;;  %v792_v29 = vmul.f32 %v791_v9, %v1560_v12  ;;  %v600_v1 = vstv %s1584_s30  ;;  %v694_v44 = vstv %s1684_s21  ;;  %v778_v48 = vadd.f32 %v777_v26, %v773_v51 }
  0xc2   :  { %s1986_s10 = sld [smem:[#allocation4 + $0x184]]  ;;  %v661_v39 = vstv %s1954_s29  ;;  %v657_v46 = vadd.f32 %v656_v11, %v651_v17  ;;  %v783_v22 = vmul.f32 %v782_v33, %v1547_v6  ;;  %v788_v36 = vstv %s1791_s3 }
  0xc3   :  { %s1990_s20 = sld [smem:[#allocation4 + $0x205]]  ;;  %v662_v47 = vmul.f32 %v661_v39, %v1560_v12  ;;  %v793_v32 = vadd.f32 %v792_v29, %v787_v27  ;;  %v581_v52 = vadd.f32 %v1935_v20, %v575_v10  ;;  %v690_v53 = vadd.f32 %v689_v14, %v684_v30 }
  0xc4   :  { %v594_v2 = vstv %s2505_s5  ;;  %s1995_s27 = sld [smem:[#allocation4 + $0x10e]]  ;;  %v695_v54 = vmul.f32 %v694_v44, %v1662_v16  ;;  %v584_v6 = vadd.f32 %v1940_v23, %v578_v35  ;;  %v784_v20 = vadd.f32 %v783_v22, %v778_v48 }
  0xc5   :  { %v1999_v15 = vmul.f32 %v594_v2, %v1734_v13  ;;  %s2002_s18 = sld [smem:[#allocation3 + $0x20c]]  ;;  %v797_v34 = vstv %s1966_s26  ;;  %v663_v55 = vadd.f32 %v662_v47, %v657_v46  ;;  %v789_v4 = vmul.f32 %v788_v36, %v1560_v12 }
  0xc6   :  { %s2008_s8 = sld [smem:[#allocation4 + $0x10f]]  ;;  %v798_v49 = vmul.f32 %v797_v34, %v1574_v19  ;;  %v587_v9 = vadd.f32 %v1957_v41, %v581_v52  ;;  %v696_v10 = vadd.f32 %v695_v54, %v690_v53  ;;  %v590_v41 = vadd.f32 %v1979_v62, %v584_v6 }
  0xc7   :  { %s2013_s16 = sld [smem:[#allocation4 + $0x206]]  ;;  %v790_v51 = vadd.f32 %v789_v4, %v784_v20 }
  0xc8   :  { %s2018_s25 = sld [smem:[#allocation4 + $0x185]]  ;;  %v667_v18 = vstv %s1986_s10  ;;  %v799_v7 = vadd.f32 %v798_v49, %v793_v32  ;;  %v593_v34 = vadd.f32 %v1982_v37, %v587_v9  ;;  %v2099_v44 = vadd.f32 %v1999_v15, %v590_v41 }
  0xc9   :  { %s2026_s2 = sld [smem:[#allocation3 + $0x20d]]  ;;  %v803_v57 = vstv %s1990_s20  ;;  %v668_v3 = vmul.f32 %v667_v18, %v1574_v19  ;;  %v818_v41 = vstv %s1948_s1 }
  0xca   :  { %s2506_s9 = sld [smem:[#allocation29_spill]]  ;;  %v603_v60 = vstv %s1995_s27  ;;  %v804_v58 = vmul.f32 %v803_v57, %v1590_v28 }
  0xcb   :  { %s2507_s22 = sld [smem:[#allocation30_spill]]  ;;  %v669_v42 = vadd.f32 %v668_v3, %v663_v55  ;;  %v812_v3 = vstv %s1925_s24 }
  0xcc   :  { %s2030_s15 = sld [smem:[#allocation3 + $0x20e]]  ;;  %v609_v5 = vstv %s2008_s8 }
  0xcd   :  { %s2035_s17 = sld [smem:[#allocation4 + $0x207]]  ;;  %v2055_v8 = vpop.eup %1315  ;;  %v809_v21 = vstv %s2013_s16 }
  0xce   :  { %s2508_s21 = sld [smem:[#allocation19_spill]]  ;;  %v483_v12 = vmul.f32 %v2055_v8, %v482_v43  ;;  %v486_v11 = vmul.f32 %v2055_v8, %v485_v56  ;;  %v673_v39 = vstv %s2018_s25  ;;  %v800_v43 = vstv %s1814_s7 }
  0xcf   :  { %s2040_s28 = sld [smem:[#allocation3 + $0x20f]]  ;;  %v805_v56 = vadd.f32 %v804_v58, %v799_v7  ;;  %v810_v29 = vmul.f32 %v809_v21, %v1607_v38  ;;  %v674_v30 = vmul.f32 %v673_v39, %v1590_v28  ;;  %v801_v48 = vmul.f32 %v800_v43, %v1590_v28 }
  0xd0   :  { %v606_v61 = vstv %s2506_s9  ;;  %s2046_s3 = sld [smem:[#allocation4 + $0x186]]  ;;  %v2079_v27 = vadd.f32 %v486_v11, %v1882_v25  ;;  %v813_v39 = vmul.f32 %v812_v3, %v1625_v50 }
  0xd1   :  { %v700_v2 = vstv %s2507_s22  ;;  %s2509_s4 = sld [smem:[#allocation13_spill]]  ;;  %v811_v22 = vadd.f32 %v810_v29, %v805_v56  ;;  %v675_v18 = vadd.f32 %v674_v30, %v669_v42 }
  0xd2   :  { %s2050_s12 = sld [smem:[#allocation3 + $0x280]]  ;;  %v701_v17 = vmul.f32 %v700_v2, %v1680_v31  ;;  %v491_v25 = vadd.f32 0.0001, %v2079_v27 }
  0xd3   :  { %s2057_s19 = sld [smem:[#allocation4 + $0x208]]  ;;  %v815_v33 = vstv %s2035_s17 }
  0xd4   :  { %v794_v23 = vstv %s2508_s21  ;;  %s2062_s29 = sld [smem:[#allocation5 + $0x80]]  ;;  %v702_v62 = vadd.f32 %v701_v17, %v696_v10  ;;  %1317 = vrcp.f32 %v491_v25  ;;  %v816_v37 = vmul.f32 %v815_v33, %v1625_v50 }
  0xd5   :  { %s2072_s5 = sld [smem:[#allocation5 + $0x81]]  ;;  %v795_v26 = vmul.f32 %v794_v23, %v1574_v19  ;;  %v2091_v19 = vadd.f32 %v483_v12, %v1830_v40  ;;  %v806_v40 = vstv %s1823_s14  ;;  %v2132_v23 = vadd.f32 %v2022_v0, %v593_v34 }
  0xd6   :  { %s2510_s26 = sld [smem:[#allocation17_spill]]  ;;  %v679_v46 = vstv %s2046_s3  ;;  %v807_v2 = vmul.f32 %v806_v40, %v1607_v38  ;;  %v817_v20 = vadd.f32 %v816_v37, %v811_v22  ;;  %v819_v34 = vmul.f32 %v818_v41, %v1644_v63  ;;  %v2229_v41 = vld [vmem:[#allocation6 + $0x18] sm:$0xff] }
  0xd7   :  { %v706_v24 = vstv %s2509_s4  ;;  %s2076_s10 = sld [smem:[#allocation4 + $0x187]]  ;;  %v796_v47 = vadd.f32 %v795_v26, %v790_v51  ;;  %v488_v28 = vadd.f32 %v2079_v27, %v2091_v19  ;;  %v489_v49 = vsub.f32 %v2091_v19, %v2079_v27 }
  0xd8   :  { %s2083_s0 = sld [smem:[#allocation4 + $0x209]]  ;;  %v707_v14 = vmul.f32 %v706_v24, %v1698_v45  ;;  %v680_v52 = vmul.f32 %v679_v46, %v1607_v38  ;;  %v490_v38 = vmul.f32 %v2079_v27, %v2091_v19  ;;  %v494_v46 = vmax.f32 %v2091_v19, %v2079_v27 }
  0xd9   :  { %s2088_s11 = sld [smem:[#allocation4 + $0x188]]  ;;  %v821_v32 = vstv %s2057_s19  ;;  %v802_v6 = vadd.f32 %v801_v48, %v796_v47 }
  0xda   :  { %s2096_s7 = sld [smem:[#allocation5 + $0x82]]  ;;  %v708_v15 = vadd.f32 %v707_v14, %v702_v62  ;;  %v497_v54 = vstv %s2062_s29  ;;  %v822_v4 = vmul.f32 %v821_v32, %v1644_v63  ;;  %v2140_v21 = vadd.f32 %v680_v52, %v675_v18 }
  0xdb   :  { %s2511_s20 = sld [smem:[#allocation14_spill]]  ;;  %v499_v57 = vstv %s2072_s5  ;;  %v498_v10 = vmul.f32 %v497_v54, %v488_v28  ;;  %v808_v11 = vadd.f32 %v807_v2, %v802_v6  ;;  %v601_v14 = vmul.f32 %v2055_v8, %v600_v1  ;;  %v2208_v6 = vld [vmem:[#allocation6 + $0x8] sm:$0xff] }
  0xdc   :  { %v712_v35 = vstv %s2510_s26  ;;  %s2103_s16 = sld [smem:[#allocation4 + $0x20a]]  ;;  %v500_v17 = vmul.f32 %v499_v57, %v489_v49  ;;  %v823_v42 = vadd.f32 %v822_v4, %v817_v20  ;;  %v495_v1 = vmin.f32 %v2091_v19, %v2079_v27  ;;  %v2205_v57 = vld [vmem:[#allocation6] sm:$0xff] }
  0xdd   :  { %s2107_s25 = sld [smem:[#allocation5 + $0x83]]  ;;  %v713_v36 = vmul.f32 %v712_v35, %v1716_v59  ;;  %v685_v55 = vstv %s2076_s10  ;;  %v814_v25 = vadd.f32 %v813_v39, %v808_v11  ;;  %v824_v35 = vstv %s1961_s23 }
  0xde   :  { %s2111_s22 = sld [smem:[#allocation5 + $0x84]]  ;;  %v827_v9 = vstv %s2083_s0  ;;  %v2146_v12 = vmul.f32 %v685_v55, %v1625_v50  ;;  %v501_v50 = vadd.f32 %v500_v17, %v498_v10  ;;  %v2185_v63 = vmul.f32 %v2055_v8, %v603_v60 }
  0xdf   :  { %s2119_s14 = sld [smem:[#allocation5 + $0x85]]  ;;  %v714_v7 = vadd.f32 %v713_v36, %v708_v15  ;;  %v691_v24 = vstv %s2088_s11  ;;  %v828_v51 = vmul.f32 %v827_v9, %v1662_v16  ;;  %v830_v18 = vstv %s1971_s6 }
  0xe0   :  { %s2124_s17 = sld [smem:[#allocation5 + $0x86]]  ;;  %v502_v0 = vstv %s2096_s7  ;;  %v2195_v32 = vadd.f32 %v601_v14, %v2099_v44  ;;  %v825_v28 = vmul.f32 %v824_v35, %v1662_v16  ;;  %v496_v60 = vand.u32 2147483647, %v2091_v19 }
  0xe1   :  { %v718_v53 = vstv %s2511_s20  ;;  %s2129_s21 = sld [smem:[#allocation3 + $0x281]]  ;;  %v503_v30 = vmul.f32 %v502_v0, %v490_v38  ;;  %v829_v48 = vadd.f32 %v828_v51, %v823_v42  ;;  %v1318_v22 = vpop.eup %1317  ;;  %v820_v27 = vadd.f32 %v819_v34, %v814_v25 }
  0xe2   :  { %v719_v58 = vmul.f32 %v718_v53, %v1734_v13  ;;  %s2136_s3 = sld [smem:[#allocation4 + $0x280]]  ;;  %v833_v40 = vstv %s2103_s16  ;;  %v493_v15 = vmul.f32 %v1318_v22, %v2091_v19  ;;  %v831_v2 = vmul.f32 %v830_v18, %v1680_v31 }
  0xe3   :  { %s2512_s24 = sld [smem:[#allocation18_spill]]  ;;  %v505_v26 = vstv %s2107_s25  ;;  %v504_v36 = vadd.f32 %v503_v30, %v501_v50  ;;  %v834_v55 = vmul.f32 %v833_v40, %v1680_v31  ;;  %v826_v10 = vadd.f32 %v825_v28, %v820_v27  ;;  %v1343_v27 = vld [vmem:[#allocation6 + $0x30] sm:$0xff] }
  0xe4   :  { %s2513_s4 = sld [smem:[#allocation15_spill]]  ;;  %v2157_v43 = vadd.f32 %v719_v58, %v714_v7  ;;  %v508_v62 = vstv %s2111_s22  ;;  %v506_v53 = vmul.f32 %v505_v26, %v493_v15  ;;  %v2219_v58 = vld [vmem:[#allocation6 + $0x10] sm:$0xff]  ;;  %v836_v17 = vstv %s1976_s13 }
  0xe5   :  { %s2142_s19 = sld [smem:[#allocation4 + $0x281]]  ;;  %v511_v33 = vstv %s2119_s14  ;;  %v509_v54 = vmul.f32 %v508_v62, %v494_v46  ;;  %v842_v11 = vstv %s2002_s18  ;;  %v835_v51 = vadd.f32 %v834_v55, %v829_v48  ;;  %v1344_v55 = vld [vmem:[#allocation6 + $0x38] sm:$0xff] }
  0xe6   :  { %s2149_s29 = sld [smem:[#allocation3 + $0x282]]  ;;  %v514_v47 = vstv %s2124_s17  ;;  %v512_v19 = vmul.f32 %v511_v33, %v495_v1  ;;  %v507_v20 = vadd.f32 %v506_v53, %v504_v36  ;;  %v2240_v33 = vld [vmem:[#allocation6 + $0x20] sm:$0xff]  ;;  %v832_v34 = vadd.f32 %v831_v2, %v826_v10  ;;  %v2251_v1 = vld [vmem:[#allocation6 + $0x28] sm:$0xff] }
  0xe7   :  { %s2154_s5 = sld [smem:[#allocation4 + $0x282]]  ;;  %v515_v38 = vmul.f32 %v514_v47, %v496_v60  ;;  %v837_v35 = vmul.f32 %v836_v17, %v1698_v45  ;;  %v843_v46 = vmul.f32 %v842_v11, %v1716_v59  ;;  %v848_v15 = vstv %s2026_s2 }
  0xe8   :  { %s2161_s26 = sld [smem:[#allocation4 + $0x20b]]  ;;  %v910_v49 = vstv %s2136_s3  ;;  %v510_v31 = vadd.f32 %v509_v54, %v507_v20  ;;  %v854_v60 = vstv %s2030_s15  ;;  %v908_v53 = vstv %s2050_s12 }
  0xe9   :  { %v724_v56 = vstv %s2512_s24  ;;  %s2167_s1 = sld [smem:[#allocation4 + $0x283]]  ;;  %v911_v44 = vmul.f32 %v2205_v57, %v910_v49  ;;  %v912_v54 = vstv %s2129_s21 }
  0xea   :  { %v730_v29 = vstv %s2513_s4  ;;  %s2172_s10 = sld [smem:[#allocation4 + $0x20c]]  ;;  %v2188_v37 = vmul.f32 %v2055_v8, %v724_v56  ;;  %v513_v30 = vadd.f32 %v512_v19, %v510_v31  ;;  %v913_v19 = vmul.f32 %v2208_v6, %v912_v54 }
  0xeb   :  { %s2178_s30 = sld [smem:[#allocation4 + $0x284]]  ;;  %v915_v52 = vstv %s2142_s19  ;;  %v849_v31 = vmul.f32 %v848_v15, %v1734_v13 }
  0xec   :  { %s2191_s23 = sld [smem:[#allocation4 + $0x20d]]  ;;  %v916_v16 = vmul.f32 %v2208_v6, %v915_v52  ;;  %v516_v48 = vadd.f32 %v515_v38, %v513_v30  ;;  %v838_v52 = vadd.f32 %v837_v35, %v832_v34 }
  0xed   :  { %s2198_s0 = sld [smem:[#allocation4 + $0x285]]  ;;  %v921_v3 = vstv %s2154_s5 }
  0xee   :  { %s2203_s6 = sld [smem:[#allocation3 + $0x283]]  ;;  %v839_v4 = vstv %s2161_s26  ;;  %v917_v7 = vadd.f32 %v916_v16, %v911_v44  ;;  %v922_v9 = vmul.f32 %v2219_v58, %v921_v3  ;;  %1319 = vtanh.f32 %v516_v48 }
  0xef   :  { %s2211_s27 = sld [smem:[#allocation4 + $0x286]]  ;;  %v927_v0 = vstv %s2167_s1  ;;  %v840_v26 = vmul.f32 %v839_v4, %v1698_v45  ;;  %v909_v16 = vmul.f32 %v2205_v57, %v908_v53  ;;  %v2279_v57 = vld [vmem:[#allocation6 + $0x40] sm:$0xff] }
  0xf0   :  { %s2216_s7 = sld [smem:[#allocation3 + $0x284]]  ;;  %v923_v39 = vadd.f32 %v922_v9, %v917_v7  ;;  %v928_v42 = vmul.f32 %v2229_v41, %v927_v0  ;;  %v845_v56 = vstv %s2172_s10  ;;  %v918_v7 = vstv %s2149_s29 }
  0xf1   :  { %s2222_s20 = sld [smem:[#allocation4 + $0x287]]  ;;  %v933_v50 = vstv %s2178_s30  ;;  %v846_v40 = vmul.f32 %v845_v56, %v1716_v59  ;;  %v841_v45 = vadd.f32 %v840_v26, %v835_v51  ;;  %v914_v38 = vadd.f32 %v913_v19, %v909_v16 }
  0xf2   :  { %s2226_s16 = sld [smem:[#allocation4 + $0x20e]]  ;;  %v851_v62 = vstv %s2191_s23  ;;  %v929_v14 = vadd.f32 %v928_v42, %v923_v39  ;;  %v934_v25 = vmul.f32 %v2240_v33, %v933_v50  ;;  %v919_v10 = vmul.f32 %v2219_v58, %v918_v7 }
  0xf3   :  { %s2232_s25 = sld [smem:[#allocation4 + $0x288]]  ;;  %v939_v47 = vstv %s2198_s0  ;;  %v852_v36 = vmul.f32 %v851_v62, %v1734_v13  ;;  %v847_v20 = vadd.f32 %v846_v40, %v841_v45  ;;  %v844_v0 = vadd.f32 %v843_v46, %v838_v52 }
  0xf4   :  { %s2237_s22 = sld [smem:[#allocation3 + $0x285]]  ;;  %v935_v22 = vadd.f32 %v934_v25, %v929_v14  ;;  %v940_v18 = vmul.f32 %v2251_v1, %v939_v47  ;;  %v924_v11 = vstv %s2203_s6  ;;  %v605_v42 = vadd.f32 %v2185_v63, %v2132_v23 }
  0xf5   :  { %s2243_s13 = sld [smem:[#allocation4 + $0x289]]  ;;  %v945_v28 = vstv %s2211_s27  ;;  %v726_v58 = vadd.f32 %v2188_v37, %v2157_v43  ;;  %v920_v51 = vadd.f32 %v919_v10, %v914_v38  ;;  %v925_v26 = vmul.f32 %v2229_v41, %v924_v11  ;;  %v2302_v37 = vld [vmem:[#allocation6 + $0x48] sm:$0xff]  ;;  %v2363_v38 = vld [vmem:[#allocation6 + $0x58] sm:$0xff] }
  0xf6   :  { %s2248_s18 = sld [smem:[#allocation3 + $0x286]]  ;;  %v941_v59 = vadd.f32 %v940_v18, %v935_v22  ;;  %v946_v49 = vmul.f32 %v1343_v27, %v945_v28  ;;  %v853_v56 = vadd.f32 %v852_v36, %v847_v20  ;;  %v855_v13 = vmul.f32 %v2055_v8, %v854_v60  ;;  %v2322_v28 = vld [vmem:[#allocation6 + $0x50] sm:$0xff] }
  0xf7   :  { %s2254_s14 = sld [smem:[#allocation3 + $0x287]]  ;;  %v951_v44 = vstv %s2222_s20  ;;  %v930_v30 = vstv %s2216_s7  ;;  %v926_v23 = vadd.f32 %v925_v26, %v920_v51  ;;  %v850_v62 = vadd.f32 %v849_v31, %v844_v0 }
  0xf8   :  { %s2259_s17 = sld [smem:[#allocation3 + $0x288]]  ;;  %v947_v2 = vadd.f32 %v946_v49, %v941_v59  ;;  %v952_v3 = vmul.f32 %v1344_v55, %v951_v44  ;;  %v857_v4 = vstv %s2226_s16  ;;  %v931_v43 = vmul.f32 %v2240_v33, %v930_v30 }
  0xf9   :  { %s2262_s3 = sld [smem:[#allocation4 + $0x28a]]  ;;  %v957_v9 = vstv %s2232_s25  ;;  %v858_v50 = vmul.f32 %v2055_v8, %v857_v4  ;;  %v860_v14 = vstv %s2040_s28  ;;  %v856_v59 = vadd.f32 %v855_v13, %v850_v62 }
  0xfa   :  { %s2267_s2 = sld [smem:[#allocation3 + $0x289]]  ;;  %v953_v17 = vadd.f32 %v952_v3, %v947_v2  ;;  %v958_v6 = vmul.f32 %v2279_v57, %v957_v9  ;;  %v936_v25 = vstv %s2237_s22  ;;  %v932_v35 = vadd.f32 %v931_v43, %v926_v23  ;;  %v2392_v43 = vld [vmem:[#allocation6 + $0x60] sm:$0xff] }
  0xfb   :  { %s2271_s15 = sld [smem:[#allocation4 + $0x20f]]  ;;  %v963_v39 = vstv %s2243_s13  ;;  %v937_v46 = vmul.f32 %v2251_v1, %v936_v25  ;;  %v859_v45 = vadd.f32 %v858_v50, %v853_v56  ;;  %v2325_v60 = vpop.eup %1319  ;;  %v692_v0 = vmul.f32 %v2279_v57, %v691_v24 }
  0xfc   :  { %s2276_s12 = sld [smem:[#allocation3 + $0x28a]]  ;;  %v959_v63 = vadd.f32 %v958_v6, %v953_v17  ;;  %v964_v41 = vmul.f32 %v2302_v37, %v963_v39  ;;  %v942_v47 = vstv %s2248_s18  ;;  %v607_v53 = vmul.f32 %v2325_v60, %v606_v61 }
  0xfd   :  { %s2282_s21 = sld [smem:[#allocation4 + $0x28b]]  ;;  %v948_v33 = vstv %s2254_s14  ;;  %v943_v40 = vmul.f32 %v1343_v27, %v942_v47  ;;  %v938_v15 = vadd.f32 %v937_v46, %v932_v35  ;;  %v610_v54 = vmul.f32 %v2325_v60, %v609_v5  ;;  %v1350_v47 = vld [vmem:[#allocation6 + $0x68] sm:$0xff] }
  0xfe   :  { %s2287_s24 = sld [smem:[#allocation3 + $0x28b]]  ;;  %v954_v22 = vstv %s2259_s17  ;;  %v965_v36 = vadd.f32 %v964_v41, %v959_v63  ;;  %v949_v27 = vmul.f32 %v1344_v55, %v948_v33  ;;  %v731_v44 = vmul.f32 %v2325_v60, %v730_v29 }
  0xff   :  { %s2294_s19 = sld [smem:[#allocation3 + $0x28c]]  ;;  %v969_v34 = vstv %s2262_s3  ;;  %v955_v49 = vmul.f32 %v2279_v57, %v954_v22  ;;  %v861_v19 = vmul.f32 %v2325_v60, %v860_v14  ;;  %v944_v55 = vadd.f32 %v943_v40, %v938_v15 }
 0x100   :  { %s2299_s29 = sld [smem:[#allocation3 + $0x28d]]  ;;  %v960_v18 = vstv %s2267_s2  ;;  %v970_v1 = vmul.f32 %v2322_v28, %v969_v34  ;;  %v2351_v61 = vadd.f32 %v607_v53, %v2195_v32  ;;  %v2353_v5 = vadd.f32 %v610_v54, %v605_v42 }
 0x101   :  { %s2305_s5 = sld [smem:[#allocation3 + $0x28e]]  ;;  %v863_v48 = vstv %s2271_s15  ;;  %v961_v16 = vmul.f32 %v2302_v37, %v960_v18  ;;  %v2355_v29 = vadd.f32 %v731_v44, %v726_v58  ;;  %v2359_v4 = vadd.f32 %v861_v19, %v856_v59 }
 0x102   :  { %s2310_s26 = sld [smem:[#allocation4 + $0x189]]  ;;  %v864_v2 = vmul.f32 %v2325_v60, %v863_v48  ;;  %v966_v3 = vstv %s2276_s12  ;;  %v971_v20 = vadd.f32 %v970_v1, %v965_v36  ;;  %v950_v9 = vadd.f32 %v949_v27, %v944_v55 }
 0x103   :  { %s2315_s1 = sld [smem:[#allocation5 + $0x100]]  ;;  %v975_v52 = vstv %s2282_s21  ;;  %v615_v10 = vadd.f32 0.0001, %v2353_v5  ;;  %v687_v17 = vadd.f32 %v2146_v12, %v2140_v21  ;;  %v967_v39 = vmul.f32 %v2322_v28, %v966_v3 }
 0x104   :  { %s2320_s28 = sld [smem:[#allocation5 + $0x101]]  ;;  %v2361_v7 = vadd.f32 %v864_v2, %v859_v45  ;;  %v976_v32 = vmul.f32 %v2363_v38, %v975_v52  ;;  %v972_v6 = vstv %s2287_s24  ;;  %v956_v11 = vadd.f32 %v955_v49, %v950_v9 }
 0x105   :  { %s2327_s10 = sld [smem:[#allocation5 + $0x102]]  ;;  %v612_v42 = vadd.f32 %v2353_v5, %v2351_v61  ;;  %1321 = vrcp.f32 %v615_v10  ;;  %v973_v21 = vmul.f32 %v2363_v38, %v972_v6  ;;  %v613_v24 = vsub.f32 %v2351_v61, %v2353_v5 }
 0x106   :  { %s2331_s30 = sld [smem:[#allocation4 + $0x28c]]  ;;  %v962_v56 = vadd.f32 %v961_v16, %v956_v11  ;;  %v977_v12 = vadd.f32 %v976_v32, %v971_v20  ;;  %v978_v57 = vstv %s2294_s19  ;;  %v984_v50 = vstv %s2299_s29 }
 0x107   :  { %s2343_s23 = sld [smem:[#allocation4 + $0x28d]]  ;;  %v614_v30 = vmul.f32 %v2353_v5, %v2351_v61  ;;  %v979_v63 = vmul.f32 %v2392_v43, %v978_v57  ;;  %v990_v25 = vstv %s2305_s5  ;;  %v985_v33 = vmul.f32 %v1350_v47, %v984_v50 }
 0x108   :  { %s2348_s9 = sld [smem:[#allocation4 + $0x28e]]  ;;  %v697_v31 = vstv %s2310_s26  ;;  %v968_v23 = vadd.f32 %v967_v39, %v962_v56  ;;  %v991_v1 = vmul.f32 %v2055_v8, %v990_v25  ;;  %v693_v27 = vadd.f32 %v692_v0, %v687_v17 }
 0x109   :  { %s2357_s8 = sld [smem:[#allocation3 + $0x28f]]  ;;  %v621_v58 = vstv %s2315_s1  ;;  %v698_v49 = vmul.f32 %v2302_v37, %v697_v31  ;;  %v618_v3 = vmax.f32 %v2351_v61, %v2353_v5  ;;  %v619_v6 = vmin.f32 %v2351_v61, %v2353_v5 }
 0x10a   :  { %s2366_s4 = sld [smem:[#allocation4 + $0x28f]]  ;;  %v623_v51 = vstv %s2320_s28  ;;  %v622_v62 = vmul.f32 %v621_v58, %v612_v42  ;;  %v974_v35 = vadd.f32 %v973_v21, %v968_v23  ;;  %v620_v42 = vand.u32 2147483647, %v2351_v61 }
 0x10b   :  { %v626_v26 = vstv %s2327_s10  ;;  %s2388_s11 = sld [smem:[#allocation4 + $0x18a]]  ;;  %v624_v40 = vmul.f32 %v623_v51, %v613_v24  ;;  %v699_v32 = vadd.f32 %v698_v49, %v693_v27 }
 0x10c   :  { %v981_v13 = vstv %s2331_s30  ;;  %s2396_s0 = sld [smem:[#allocation5 + $0x103]]  ;;  %v980_v15 = vadd.f32 %v979_v63, %v974_v35  ;;  %v627_v16 = vmul.f32 %v626_v26, %v614_v30 }
 0x10d   :  { %v982_v41 = vmul.f32 %v2392_v43, %v981_v13  ;;  %v987_v14 = vstv %s2343_s23  ;;  %s2401_s6 = sld [smem:[#allocation5 + $0x104]]  ;;  %v625_v44 = vadd.f32 %v624_v40, %v622_v62 }
 0x10e   :  { %v993_v34 = vstv %s2348_s9  ;;  %v988_v48 = vmul.f32 %v1350_v47, %v987_v14  ;;  %s2403_s27 = sld [smem:[#allocation4 + $0x18b]]  ;;  %v986_v52 = vadd.f32 %v985_v33, %v980_v15 }
 0x10f   :  { %v983_v46 = vadd.f32 %v982_v41, %v977_v12  ;;  %v994_v22 = vmul.f32 %v2055_v8, %v993_v34  ;;  %v996_v18 = vstv %s2357_s8  ;;  %s2408_s7 = sld [smem:[#allocation5 + $0x105]]  ;;  %v628_v0 = vadd.f32 %v627_v16, %v625_v44 }
 0x110   :  { %v999_v45 = vstv %s2366_s4  ;;  %s2412_s20 = sld [smem:[#allocation5 + $0x106]]  ;;  %v997_v54 = vmul.f32 %v2325_v60, %v996_v18  ;;  %v992_v2 = vadd.f32 %v991_v1, %v986_v52 }
 0x111   :  { %v989_v36 = vadd.f32 %v988_v48, %v983_v46  ;;  %v1000_v59 = vmul.f32 %v2325_v60, %v999_v45  ;;  %s2416_s16 = sld [smem:[#allocation4 + $0x18c]]  ;;  %v703_v19 = vstv %s2388_s11 }
 0x112   :  { %v1322_v20 = vpop.eup %1321  ;;  %v629_v37 = vstv %s2396_s0  ;;  %v2425_v10 = vadd.f32 %v997_v54, %v992_v2  ;;  %v704_v31 = vmul.f32 %v2322_v28, %v703_v19  ;;  %s1223_s25 = sld [smem:[#allocation4 + $0x18d]] }
 0x113   :  { %v995_v53 = vadd.f32 %v994_v22, %v989_v36  ;;  %v632_v9 = vstv %s2401_s6  ;;  %v617_v17 = vmul.f32 %v1322_v20, %v2351_v61  ;;  %s1224_s22 = sld [smem:[#allocation4 + $0x18e]] }
 0x114   :  { %v709_v39 = vstv %s2403_s27  ;;  %v633_v51 = vmul.f32 %v632_v9, %v618_v3  ;;  %v705_v12 = vadd.f32 %v704_v31, %v699_v32  ;;  %s1225_s13 = sld [smem:[#allocation4 + $0x18f]] }
 0x115   :  { %v2419_v55 = vadd.f32 %v1000_v59, %v995_v53  ;;  %v635_v11 = vstv %s2408_s7  ;;  %v630_v58 = vmul.f32 %v629_v37, %v617_v17  ;;  %v710_v24 = vmul.f32 %v2363_v38, %v709_v39  ;;  %s1128_s18 = sld [smem:[#allocation3 + $0x190]] }
 0x116   :  { %v638_v26 = vstv %s2412_s20  ;;  %v636_v21 = vmul.f32 %v635_v11, %v619_v6  ;;  %s1145_s14 = sld [smem:[#allocation3 + $0x210]] }
 0x117   :  { %v631_v56 = vadd.f32 %v630_v58, %v628_v0  ;;  %v715_v57 = vstv %s2416_s16  ;;  %v639_v5 = vmul.f32 %v638_v26, %v620_v42  ;;  %v711_v30 = vadd.f32 %v710_v24, %v705_v12  ;;  %s1163_s17 = sld [smem:[#allocation3 + $0x290]] }
 0x118   :  { %v716_v28 = vmul.f32 %v2392_v43, %v715_v57  ;;  %v721_v23 = vstv %s1223_s25  ;;  %s1226_s3 = sld [smem:[#allocation4 + $0x190]] }
 0x119   :  { %v634_v13 = vadd.f32 %v633_v51, %v631_v56  ;;  %v722_v41 = vmul.f32 %v1350_v47, %v721_v23  ;;  %v727_v62 = vstv %s1224_s22  ;;  %s1243_s2 = sld [smem:[#allocation4 + $0x210]] }
 0x11a   :  { %v717_v61 = vadd.f32 %v716_v28, %v711_v30  ;;  %s1261_s15 = sld [smem:[#allocation4 + $0x290]]  ;;  %v728_v14 = vmul.f32 %v2055_v8, %v727_v62  ;;  %v733_v25 = vstv %s1225_s13 }
 0x11b   :  { %v637_v50 = vadd.f32 %v636_v21, %v634_v13  ;;  %s2439_s12 = sld [smem:[#allocation5 + $0x180]]  ;;  %v734_v34 = vmul.f32 %v2325_v60, %v733_v25  ;;  %v736_v35 = vstv %s1128_s18 }
 0x11c   :  { %v723_v38 = vadd.f32 %v722_v41, %v717_v61  ;;  %s2441_s21 = sld [smem:[#allocation5 + $0x181]]  ;;  %v866_v47 = vstv %s1145_s14 }
 0x11d   :  { %v640_v63 = vadd.f32 %v639_v5, %v637_v50  ;;  %s2444_s24 = sld [smem:[#allocation5 + $0x182]]  ;;  %v1002_v40 = vstv %s1163_s17  ;;  %s1427_s17 = smov [#allocation9]  }
 0x11e   :  { %v729_v43 = vadd.f32 %v728_v14, %v723_v38  ;;  %v739_v46 = vstv %s1226_s3  ;;  %s1287_s19 = sld [smem:[#allocation5 + $0x183]]  ;;  %s1059_s3 = sshll.u32 %s1427_s17, 4  ;;  %s1060_s3 = int_to_ptr.vmem [resolvable:$true] %s1059_s3 }
 0x11f   :  { %1323 = vtanh.f32 %v640_v63  ;;  %v869_v33 = vstv %s1243_s2  ;;  %s1288_s29 = sld [smem:[#allocation5 + $0x184]]  ;;  %s1395_s2 = scalar_lea.vmem %s1060_s3, 128 }
 0x120   :  { %v735_v48 = vadd.f32 %v734_v34, %v729_v43  ;;  %v1005_v8 = vstv %s1261_s15  ;;  %s1289_s5 = sld [smem:[#allocation5 + $0x185]]  ;;  %p1396_p5 = scmp.ne.s32.totalorder %s1060_s3, %s1395_s2 }
 0x121   :  { %v751_v1 = vstv %s2439_s12  ;;  %s1290_s26 = sld [smem:[#allocation5 + $0x186]]  ;;  %p1400_p6 = scmp.lt.s32.totalorder %s1060_s3, %s1060_s3 }
 0x122   :  { %v753_v54 = vstv %s2441_s21  ;;  %s1146_s1 = sld [smem:[#allocation3 + $0x211]]  ;;  %p1401_p7 = scmp.lt.s32.totalorder %s1395_s2, %s1395_s2 }
 0x123   :  { %v756_v44 = vstv %s2444_s24  ;;  %s1164_s28 = sld [smem:[#allocation3 + $0x291]] }
 0x124   :  { %s1244_s10 = sld [smem:[#allocation4 + $0x211]]  ;;  %p1402_p8 = por %p1401_p7, %p1400_p6 }
 0x125   :  { %v762_v31 = vstv %s1288_s29  ;;  %s1262_s30 = sld [smem:[#allocation4 + $0x291]] }
 0x126   :  { %v765_v11 = vstv %s1289_s5  ;;  %s1291_s23 = sld [smem:[#allocation5 + $0x200]]  ;;  %p1403_p9 = pnand %p1402_p8, %p1396_p5 }
 0x127   :  { %v768_v51 = vstv %s1290_s26  ;;  %s1292_s9 = sld [smem:[#allocation5 + $0x201]] }
 0x128   :  { %s1293_s8 = sld [smem:[#allocation5 + $0x202]]  ;;  %v872_v13 = vstv %s1146_s1 }
 0x129   :  { %v1008_v50 = vstv %s1164_s28  ;;  %s1294_s4 = sld [smem:[#allocation5 + $0x203]] }
 0x12a   :  { %v875_v5 = vstv %s1244_s10  ;;  %s1295_s11 = sld [smem:[#allocation5 + $0x204]] }
 0x12b   :  { %v1011_v30 = vstv %s1262_s30  ;;  %s1296_s0 = sld [smem:[#allocation5 + $0x205]] }
 0x12c   :  { %v1324_v22 = vpop.eup %1323  ;;  %v887_v43 = vstv %s1291_s23  ;;  %s1297_s6 = sld [smem:[#allocation5 + $0x206]] }
 0x12d   :  { %v737_v18 = vmul.f32 %v1324_v22, %v736_v35  ;;  %v740_v45 = vmul.f32 %v1324_v22, %v739_v46  ;;  %v867_v15 = vmul.f32 %v1324_v22, %v866_v47  ;;  %v870_v36 = vmul.f32 %v1324_v22, %v869_v33  ;;  %s1165_s27 = sld [smem:[#allocation3 + $0x292]] }
 0x12e   :  { %v1003_v59 = vmul.f32 %v1324_v22, %v1002_v40  ;;  %v1006_v27 = vmul.f32 %v1324_v22, %v1005_v8  ;;  %v889_v34 = vstv %s1292_s9  ;;  %v892_v35 = vstv %s1293_s8  ;;  %s1263_s7 = sld [smem:[#allocation4 + $0x292]] }
 0x12f   :  { %v738_v60 = vadd.f32 %v737_v18, %v2355_v29  ;;  %v741_v49 = vadd.f32 %v740_v45, %v735_v48  ;;  %v868_v52 = vadd.f32 %v867_v15, %v2359_v4  ;;  %v871_v53 = vadd.f32 %v870_v36, %v2361_v7  ;;  %s1298_s20 = sld [smem:[#allocation5 + $0x280]] }
 0x130   :  { %v1004_v16 = vadd.f32 %v1003_v59, %v2425_v10  ;;  %v1007_v19 = vadd.f32 %v1006_v27, %v2419_v55  ;;  %v759_v10 = vstv %s1287_s19  ;;  %v895_v59 = vstv %s1294_s4  ;;  %s1299_s16 = sld [smem:[#allocation5 + $0x281]] }
 0x131   :  { %v742_v2 = vadd.f32 %v741_v49, %v738_v60  ;;  %v743_v3 = vsub.f32 %v738_v60, %v741_v49  ;;  %v744_v20 = vmul.f32 %v741_v49, %v738_v60  ;;  %v745_v37 = vadd.f32 0.0001, %v741_v49  ;;  %s1300_s25 = sld [smem:[#allocation5 + $0x282]] }
 0x132   :  { %v748_v9 = vmax.f32 %v738_v60, %v741_v49  ;;  %v749_v32 = vmin.f32 %v738_v60, %v741_v49  ;;  %v750_v39 = vand.u32 2147483647, %v738_v60  ;;  %v898_v27 = vstv %s1295_s11  ;;  %s1301_s22 = sld [smem:[#allocation5 + $0x283]] }
 0x133   :  { %1325 = vrcp.f32 %v745_v37  ;;  %v752_v17 = vmul.f32 %v751_v1, %v742_v2  ;;  %v754_v29 = vmul.f32 %v753_v54, %v743_v3  ;;  %v757_v6 = vmul.f32 %v756_v44, %v744_v20  ;;  %s1302_s13 = sld [smem:[#allocation5 + $0x284]] }
 0x134   :  { %v763_v58 = vmul.f32 %v762_v31, %v748_v9  ;;  %v766_v56 = vmul.f32 %v765_v11, %v749_v32  ;;  %v769_v12 = vmul.f32 %v768_v51, %v750_v39  ;;  %v901_v49 = vstv %s1296_s0  ;;  %s1303_s18 = sld [smem:[#allocation5 + $0x285]] }
 0x135   :  { %v755_v0 = vadd.f32 %v754_v29, %v752_v17  ;;  %v904_v44 = vstv %s1297_s6  ;;  %v1014_v9 = vstv %s1165_s27  ;;  %v1017_v32 = vstv %s1263_s7  ;;  %s1304_s14 = sld [smem:[#allocation5 + $0x286]] }
 0x137   :  { %v758_v4 = vadd.f32 %v757_v6, %v755_v0  ;;  %v1034_v31 = vstv %s1300_s25 }
 0x140   :  { %v1326_v7 = vpop.eup %1325 }
 0x141   :  { %v747_v55 = vmul.f32 %v1326_v7, %v738_v60  ;;  %v1029_v7 = vstv %s1298_s20 }
 0x143   :  { %v760_v42 = vmul.f32 %v759_v10, %v747_v55  ;;  %v1031_v10 = vstv %s1299_s16 }
 0x145   :  { %v761_v26 = vadd.f32 %v760_v42, %v758_v4 }
 0x147   :  { %v764_v21 = vadd.f32 %v763_v58, %v761_v26 }
 0x149   :  { %v767_v24 = vadd.f32 %v766_v56, %v764_v21 }
 0x14b   :  { %v770_v57 = vadd.f32 %v769_v12, %v767_v24 }
 0x14d   :  { %1327 = vtanh.f32 %v770_v57 }
 0x15a   :  { %v1328_v28 = vpop.eup %1327 }
 0x15b   :  { %v873_v23 = vmul.f32 %v1328_v28, %v872_v13  ;;  %v876_v63 = vmul.f32 %v1328_v28, %v875_v5  ;;  %v1009_v61 = vmul.f32 %v1328_v28, %v1008_v50  ;;  %v1012_v41 = vmul.f32 %v1328_v28, %v1011_v30 }
 0x15c   :  { %v1037_v13 = vstv %s1301_s22  ;;  %v1040_v5 = vstv %s1302_s13  ;;  %v1043_v30 = vstv %s1303_s18 }
 0x15d   :  { %v874_v62 = vadd.f32 %v873_v23, %v868_v52  ;;  %v877_v38 = vadd.f32 %v876_v63, %v871_v53  ;;  %v1010_v14 = vadd.f32 %v1009_v61, %v1004_v16  ;;  %v1013_v25 = vadd.f32 %v1012_v41, %v1007_v19 }
 0x15e   :  { %v1046_v61 = vstv %s1304_s14 }
 0x15f   :  { %v878_v46 = vadd.f32 %v877_v38, %v874_v62  ;;  %v879_v47 = vsub.f32 %v874_v62, %v877_v38  ;;  %v880_v33 = vmul.f32 %v877_v38, %v874_v62  ;;  %v881_v48 = vadd.f32 0.0001, %v877_v38 }
 0x160   :  { %v884_v40 = vmax.f32 %v874_v62, %v877_v38  ;;  %v885_v8 = vmin.f32 %v874_v62, %v877_v38  ;;  %v886_v52 = vand.u32 2147483647, %v874_v62 }
 0x161   :  { %1329 = vrcp.f32 %v881_v48  ;;  %v888_v22 = vmul.f32 %v887_v43, %v878_v46  ;;  %v890_v18 = vmul.f32 %v889_v34, %v879_v47  ;;  %v893_v45 = vmul.f32 %v892_v35, %v880_v33 }
 0x162   :  { %v899_v54 = vmul.f32 %v898_v27, %v884_v40  ;;  %v902_v19 = vmul.f32 %v901_v49, %v885_v8  ;;  %v905_v3 = vmul.f32 %v904_v44, %v886_v52 }
 0x163   :  { %v891_v15 = vadd.f32 %v890_v18, %v888_v22 }
 0x165   :  { %v894_v36 = vadd.f32 %v893_v45, %v891_v15 }
 0x16e   :  { %v1330_v1 = vpop.eup %1329 }
 0x16f   :  { %v883_v60 = vmul.f32 %v1330_v1, %v874_v62 }
 0x171   :  { %v896_v53 = vmul.f32 %v895_v59, %v883_v60 }
 0x173   :  { %v897_v16 = vadd.f32 %v896_v53, %v894_v36 }
 0x175   :  { %v900_v2 = vadd.f32 %v899_v54, %v897_v16 }
 0x177   :  { %v903_v20 = vadd.f32 %v902_v19, %v900_v2 }
 0x179   :  { %v906_v37 = vadd.f32 %v905_v3, %v903_v20 }
 0x17b   :  { %1331 = vtanh.f32 %v906_v37 }
 0x188   :  { %v1332_v17 = vpop.eup %1331 }
 0x189   :  { %v1015_v29 = vmul.f32 %v1332_v17, %v1014_v9  ;;  %v1018_v6 = vmul.f32 %v1332_v17, %v1017_v32 }
 0x18b   :  { %v1016_v0 = vadd.f32 %v1015_v29, %v1010_v14  ;;  %v1019_v4 = vadd.f32 %v1018_v6, %v1013_v25 }
 0x18d   :  { %v1020_v55 = vadd.f32 %v1019_v4, %v1016_v0  ;;  %v1021_v11 = vsub.f32 %v1016_v0, %v1019_v4  ;;  %v1022_v39 = vmul.f32 %v1019_v4, %v1016_v0  ;;  %v1023_v42 = vadd.f32 0.0001, %v1019_v4 }
 0x18e   :  { %v1026_v58 = vmax.f32 %v1016_v0, %v1019_v4  ;;  %v1027_v51 = vmin.f32 %v1016_v0, %v1019_v4  ;;  %v1028_v28 = vand.u32 2147483647, %v1016_v0 }
 0x18f   :  { %1333 = vrcp.f32 %v1023_v42  ;;  %v1030_v26 = vmul.f32 %v1029_v7, %v1020_v55  ;;  %v1032_v56 = vmul.f32 %v1031_v10, %v1021_v11  ;;  %v1035_v21 = vmul.f32 %v1034_v31, %v1022_v39 }
 0x190   :  { %v1041_v63 = vmul.f32 %v1040_v5, %v1026_v58  ;;  %v1044_v62 = vmul.f32 %v1043_v30, %v1027_v51  ;;  %v1047_v14 = vmul.f32 %v1046_v61, %v1028_v28 }
 0x191   :  { %v1033_v12 = vadd.f32 %v1032_v56, %v1030_v26 }
 0x193   :  { %v1036_v24 = vadd.f32 %v1035_v21, %v1033_v12 }
 0x19c   :  { %v1334_v57 = vpop.eup %1333 }
 0x19d   :  { %v1025_v50 = vmul.f32 %v1334_v57, %v1016_v0 }
 0x19f   :  { %v1038_v23 = vmul.f32 %v1037_v13, %v1025_v50 }
 0x1a1   :  { %v1039_v41 = vadd.f32 %v1038_v23, %v1036_v24 }
 0x1a3   :  { %v1042_v38 = vadd.f32 %v1041_v63, %v1039_v41 }
 0x1a5   :  { %v1045_v25 = vadd.f32 %v1044_v62, %v1042_v38 }
 0x1a7   :  { %v1048_v43 = vadd.f32 %v1047_v14, %v1045_v25 }
 0x1a9   :  { %1335 = vtanh.f32 %v1048_v43 }
 0x1b6   :  { %v1336_v34 = vpop.eup %1335 }
 0x1b7   :  { %v1305_v35 = vclamps-f32 %v1336_v34, 100.0 }
 0x1b9   :  { %1052 = vst [vmem:[#allocation9] sm:$0xff] %v1305_v35 }
 0x1ba   :  { %1406 = shalt.err (!%p1403_p9)
}
 0x1bb   :  { %s2514_s21 = sld [smem:[#allocation31_spill]] }
 0x1c1   :  { %1062 = dma.vmem_to_hbm [thread:$0]  %s1060_s3, 128, %s2514_s21, [#allocation8]  }
 0x1c2   :  { %1419 = dma.done.wait [#allocation8], 128  }
 0x1c3   :  { %1420 = vsyncadd [#allocation8], 4294967168 }
 0x1c4   :  { %1066 = vsyncpa [#allocation7], 1 }
 0x1c5   :  { %1067 = vsyncpa [#allocation8], 1 }

</bundles_post_ra>
